<compile_context>
chip_gen: v6e
topology: v6e:2x2x1
jax: 0.10.0
libtpu: 0.0.40
codegen_flags: <defaults>
</compile_context>

<pallas_src>
import math

import numpy as np

import jax
import jax.numpy as jnp
from jax.experimental import pallas as pl
from jax.experimental.pallas import tpu as pltpu

MXU_DTYPE = jnp.bfloat16   # matmul-input dtype; accumulation is always float32
LANE = 128                 # lane (batch) tile width
SUB = 8                    # sublane alignment for feature dims


def _round_up(n, m):
    return ((n + m - 1) // m) * m


# ----------------------------------------------------------------------------
# Fused kernel: the whole AETCN forward, static-unrolled over blocks/layers
# ----------------------------------------------------------------------------
def _make_kernel(enc_has_ds, dec_has_ds):
    """enc_has_ds / dec_has_ds: tuple[bool] -- whether each TemporalBlock has a
    1x1 downsample conv on the residual path.  Weight ref order (all 2D):
      per block: M1, b1, M2, b2 [, Md, bd]   then fc1_w, fc1_b, fc2_w, fc2_b."""

    def _mm(w_ref, a):
        # bf16 weights (pre-cast at init) x bf16 activations, f32 accumulation.
        return jnp.dot(w_ref[...], a.astype(MXU_DTYPE),
                       preferred_element_type=jnp.float32)

    def kernel(*refs):
        x_ref, o_ref = refs[0], refs[-1]
        w = refs[1:-1]

        def tcn(act, has_ds, include_last_relu, idx):
            n = len(has_ds)
            for i, ds in enumerate(has_ds):          # static unroll over blocks
                m1, b1, m2, b2 = w[idx], w[idx + 1], w[idx + 2], w[idx + 3]
                idx += 4
                out = jnp.maximum(_mm(m1, act) + b1[...], 0.0)
                out = jnp.maximum(_mm(m2, out) + b2[...], 0.0)
                if ds:                               # 1x1 conv residual
                    md, bd = w[idx], w[idx + 1]
                    idx += 2
                    res = _mm(md, act) + bd[...]
                else:
                    res = act
                act = out + res
                if include_last_relu or i < n - 1:
                    act = jnp.maximum(act, 0.0)
            return act, idx

        act = x_ref[...].astype(jnp.float32)         # (F_in, 128) lane tile
        idx = 0
        # Encoder TCN (include_last_relu=True).
        act, idx = tcn(act, enc_has_ds, True, idx)
        # Bottleneck: features already ordered c*T+t == torch.flatten order.
        w1, b1, w2, b2 = w[idx], w[idx + 1], w[idx + 2], w[idx + 3]
        idx += 4
        h = jnp.maximum(_mm(w1, act) + b1[...], 0.0)      # (hidden_pad, 128)
        act = jnp.maximum(_mm(w2, h) + b2[...], 0.0)      # (F_enc_pad, 128)
        # Decoder TCN (include_last_relu=False).
        act, idx = tcn(act, dec_has_ds, False, idx)
        o_ref[...] = act.astype(o_ref.dtype)

    return kernel


def _flatten_params(params):
    args, enc_hd, dec_hd = [], [], []
    for blk in params["enc"]:
        enc_hd.append(blk["Md"] is not None)
        args += [blk["M1"], blk["b1"], blk["M2"], blk["b2"]]
        if blk["Md"] is not None:
            args += [blk["Md"], blk["bd"]]
    args += [params["fc1_w"], params["fc1_b"], params["fc2_w"], params["fc2_b"]]
    for blk in params["dec"]:
        dec_hd.append(blk["Md"] is not None)
        args += [blk["M1"], blk["b1"], blk["M2"], blk["b2"]]
        if blk["Md"] is not None:
            args += [blk["Md"], blk["bd"]]
    return args, tuple(enc_hd), tuple(dec_hd)


# ----------------------------------------------------------------------------
# Model forward: one pallas_call, batch tiled on the lane axis
# ----------------------------------------------------------------------------
def aetcn_forward(x, params):
    """x: (B, C_in, T) float32, PyTorch nn.Conv1d layout."""
    B, c_in, T = x.shape
    assert c_in == params["c_in"] and T == params["T"]
    b_pad = _round_up(max(B, 1), LANE)               # lane-dense batch

    # Kernel layout: rows = c*T + t (torch flatten order), cols = batch.
    x2 = jnp.transpose(x, (1, 2, 0)).reshape(c_in * T, B)
    x2 = jnp.pad(x2, ((0, params["f_in"] - c_in * T), (0, b_pad - B)))

    args, enc_hd, dec_hd = _flatten_params(params)
    kernel = _make_kernel(enc_hd, dec_hd)

    n_tiles = b_pad // LANE
    w_specs = [pl.BlockSpec(a.shape, lambda i: (0, 0)) for a in args]
    out2 = pl.pallas_call(
        kernel,
        grid=(n_tiles,),
        in_specs=[pl.BlockSpec((params["f_in"], LANE), lambda i: (0, i))]
                 + w_specs,
        out_specs=pl.BlockSpec((params["f_out"], LANE), lambda i: (0, i)),
        out_shape=jax.ShapeDtypeStruct((params["f_out"], b_pad), jnp.float32),
        compiler_params=pltpu.CompilerParams(
            dimension_semantics=("parallel",)),      # megacore over batch tiles
    )(x2, *args)

    c_out = params["c_out"]
    y = out2[: c_out * T, :B].reshape(c_out, T, B)
    return jnp.transpose(y, (2, 0, 1))               # (B, C_out, T)


# ----------------------------------------------------------------------------
# Parameter init (PyTorch-style uniform bounds) + conv->matrix folding
# ----------------------------------------------------------------------------
def _init_conv(key, c_out, c_in, k):
    k1, k2 = jax.random.split(key)
    bound = 1.0 / math.sqrt(c_in * k)
    w = jax.random.uniform(k1, (c_out, c_in, k), jnp.float32, -bound, bound)
    b = jax.random.uniform(k2, (c_out,), jnp.float32, -bound, bound)
    return w, b


def _init_linear(key, out_f, in_f):
    k1, k2 = jax.random.split(key)
    bound = 1.0 / math.sqrt(in_f)
    w = jax.random.uniform(k1, (out_f, in_f), jnp.float32, -bound, bound)
    b = jax.random.uniform(k2, (out_f,), jnp.float32, -bound, bound)
    return w, b


def _conv_to_matrix(w, b, T, dilation, f_in_pad, f_out_pad):
    """Fold a dilated 'same' Conv1d (C_out, C_in, K) into a dense Toeplitz
    matrix M (f_out_pad, f_in_pad) bf16 with M[(o,t),(i,t')] = sum_k
    w[o,i,k]*[t' == t + k*d - pad], plus an expanded bias (f_out_pad, 1) f32.
    Padded rows/cols are zero so padded features stay exactly 0 downstream."""
    c_out, c_in, K = w.shape
    pad = (K - 1) * dilation // 2
    sel = np.zeros((K, T, T), np.float32)            # compile-time constant
    for k in range(K):
        for t in range(T):
            tp = t + k * dilation - pad
            if 0 <= tp < T:
                sel[k, t, tp] = 1.0
    m = jnp.einsum("oik,ktp->otip", w, jnp.asarray(sel))
    m = m.reshape(c_out * T, c_in * T)
    m = jnp.pad(m, ((0, f_out_pad - c_out * T), (0, f_in_pad - c_in * T)))
    b_exp = jnp.repeat(b, T)                         # index = c_out*T + t
    b_exp = jnp.pad(b_exp, (0, f_out_pad - c_out * T)).reshape(f_out_pad, 1)
    return m.astype(MXU_DTYPE), b_exp.astype(jnp.float32)


def _prep_fc(w, b, out_pad, in_pad):
    out_f, in_f = w.shape
    wp = jnp.pad(w, ((0, out_pad - out_f), (0, in_pad - in_f))).astype(MXU_DTYPE)
    bp = jnp.pad(b, (0, out_pad - out_f)).reshape(out_pad, 1).astype(jnp.float32)
    return wp, bp


def init_aetcn_params(key, input_dim, window, layers, kernel_size):
    assert kernel_size % 2 == 1 and kernel_size > 1
    T = window
    enc_ch, hidden, dec_ch = layers[0], layers[1], layers[2]

    def f_pad(c):                                    # feature-dim padding
        return _round_up(c * T, SUB)

    def init_tcn(key, c0, chans):
        blocks, c_in = [], c0
        for i, c_out in enumerate(chans):
            d = 2 ** i                               # standard TCN dilation
            key, k1, k2, k3 = jax.random.split(key, 4)
            w1, b1 = _init_conv(k1, c_out, c_in, kernel_size)
            w2, b2 = _init_conv(k2, c_out, c_out, kernel_size)
            M1, B1 = _conv_to_matrix(w1, b1, T, d, f_pad(c_in), f_pad(c_out))
            M2, B2 = _conv_to_matrix(w2, b2, T, d, f_pad(c_out), f_pad(c_out))
            if c_in != c_out:                        # 1x1 downsample residual
                wd, bd = _init_conv(k3, c_out, c_in, 1)
                Md, Bd = _conv_to_matrix(wd, bd, T, 1, f_pad(c_in), f_pad(c_out))
            else:
                Md, Bd = None, None
            blocks.append(dict(M1=M1, b1=B1, M2=M2, b2=B2, Md=Md, bd=Bd))
            c_in = c_out
        return blocks, key

    enc, key = init_tcn(key, input_dim, enc_ch)
    c_enc = enc_ch[-1]
    flatten_dim = c_enc * T
    hidden_pad = _round_up(hidden, SUB)
    key, k1, k2 = jax.random.split(key, 3)
    fw1, fb1 = _init_linear(k1, hidden, flatten_dim)
    fw2, fb2 = _init_linear(k2, flatten_dim, hidden)
    fc1_w, fc1_b = _prep_fc(fw1, fb1, hidden_pad, f_pad(c_enc))
    fc2_w, fc2_b = _prep_fc(fw2, fb2, f_pad(c_enc), hidden_pad)
    dec, key = init_tcn(key, c_enc, dec_ch)

    return dict(enc=enc, dec=dec,
                fc1_w=fc1_w, fc1_b=fc1_b, fc2_w=fc2_w, fc2_b=fc2_b,
                c_in=input_dim, c_out=dec_ch[-1], T=T,
                f_in=f_pad(input_dim), f_out=f_pad(dec_ch[-1]))


# ----------------------------------------------------------------------------
if __name__ == "__main__":
    # Small config consistent with AETCNPyTorch(input_dim, window, layers, k, p)
    input_dim, window = 4, 16
    layers = [[8, 8], 32, [8, 4]]   # [encoder channels, fc hidden, decoder channels]
    kernel_size = 3
    # dropout = 0.0 (eval-mode identity)

    key = jax.random.PRNGKey(0)
    key, pkey, xkey = jax.random.split(key, 3)
    params = init_aetcn_params(pkey, input_dim, window, layers, kernel_size)

    # Input in PyTorch Conv1d layout: (batch, channels, seq)
    x = jax.random.normal(xkey, (2, input_dim, window), jnp.float32)

    fwd = jax.jit(lambda xx: aetcn_forward(xx, params))
    out = fwd(x)
    jax.block_until_ready(out)

    assert out.shape == (2, layers[2][-1], window), out.shape
    assert bool(jnp.all(jnp.isfinite(out)))
    print("KERNEL_OK")
</pallas_src>

<mosaic_0001>
module attributes {stable_mosaic.version = 11 : i64} {
  func.func @kernel(%arg0: i32, %arg1: memref<64x128xf32, #tpu.memory_space<vmem>>, %arg2: memref<128x64xbf16, #tpu.memory_space<vmem>>, %arg3: memref<128x1xf32, #tpu.memory_space<vmem>>, %arg4: memref<128x128xbf16, #tpu.memory_space<vmem>>, %arg5: memref<128x1xf32, #tpu.memory_space<vmem>>, %arg6: memref<128x64xbf16, #tpu.memory_space<vmem>>, %arg7: memref<128x1xf32, #tpu.memory_space<vmem>>, %arg8: memref<128x128xbf16, #tpu.memory_space<vmem>>, %arg9: memref<128x1xf32, #tpu.memory_space<vmem>>, %arg10: memref<128x128xbf16, #tpu.memory_space<vmem>>, %arg11: memref<128x1xf32, #tpu.memory_space<vmem>>, %arg12: memref<32x128xbf16, #tpu.memory_space<vmem>>, %arg13: memref<32x1xf32, #tpu.memory_space<vmem>>, %arg14: memref<128x32xbf16, #tpu.memory_space<vmem>>, %arg15: memref<128x1xf32, #tpu.memory_space<vmem>>, %arg16: memref<128x128xbf16, #tpu.memory_space<vmem>>, %arg17: memref<128x1xf32, #tpu.memory_space<vmem>>, %arg18: memref<128x128xbf16, #tpu.memory_space<vmem>>, %arg19: memref<128x1xf32, #tpu.memory_space<vmem>>, %arg20: memref<64x128xbf16, #tpu.memory_space<vmem>>, %arg21: memref<64x1xf32, #tpu.memory_space<vmem>>, %arg22: memref<64x64xbf16, #tpu.memory_space<vmem>>, %arg23: memref<64x1xf32, #tpu.memory_space<vmem>>, %arg24: memref<64x128xbf16, #tpu.memory_space<vmem>>, %arg25: memref<64x1xf32, #tpu.memory_space<vmem>>, %arg26: memref<64x128xf32, #tpu.memory_space<vmem>>) attributes {dimension_semantics = [#tpu.dimension_semantics<parallel>], iteration_bounds = array<i64: 1>, scalar_prefetch = 0 : i64, scratch_operands = 0 : i64, tpu.core_type = #tpu.core_type<tc>, window_params = [{transform_indices = @transform_0, window_bounds = array<i64: 64, 128>}, {pipeline_mode = #tpu.pipeline_mode<synchronous>, transform_indices = @transform_1, window_bounds = array<i64: 128, 64>}, {pipeline_mode = #tpu.pipeline_mode<synchronous>, transform_indices = @transform_2, window_bounds = array<i64: 128, 1>}, {pipeline_mode = #tpu.pipeline_mode<synchronous>, transform_indices = @transform_3, window_bounds = array<i64: 128, 128>}, {pipeline_mode = #tpu.pipeline_mode<synchronous>, transform_indices = @transform_4, window_bounds = array<i64: 128, 1>}, {pipeline_mode = #tpu.pipeline_mode<synchronous>, transform_indices = @transform_5, window_bounds = array<i64: 128, 64>}, {pipeline_mode = #tpu.pipeline_mode<synchronous>, transform_indices = @transform_6, window_bounds = array<i64: 128, 1>}, {pipeline_mode = #tpu.pipeline_mode<synchronous>, transform_indices = @transform_7, window_bounds = array<i64: 128, 128>}, {pipeline_mode = #tpu.pipeline_mode<synchronous>, transform_indices = @transform_8, window_bounds = array<i64: 128, 1>}, {pipeline_mode = #tpu.pipeline_mode<synchronous>, transform_indices = @transform_9, window_bounds = array<i64: 128, 128>}, {pipeline_mode = #tpu.pipeline_mode<synchronous>, transform_indices = @transform_10, window_bounds = array<i64: 128, 1>}, {pipeline_mode = #tpu.pipeline_mode<synchronous>, transform_indices = @transform_11, window_bounds = array<i64: 32, 128>}, {pipeline_mode = #tpu.pipeline_mode<synchronous>, transform_indices = @transform_12, window_bounds = array<i64: 32, 1>}, {pipeline_mode = #tpu.pipeline_mode<synchronous>, transform_indices = @transform_13, window_bounds = array<i64: 128, 32>}, {pipeline_mode = #tpu.pipeline_mode<synchronous>, transform_indices = @transform_14, window_bounds = array<i64: 128, 1>}, {pipeline_mode = #tpu.pipeline_mode<synchronous>, transform_indices = @transform_15, window_bounds = array<i64: 128, 128>}, {pipeline_mode = #tpu.pipeline_mode<synchronous>, transform_indices = @transform_16, window_bounds = array<i64: 128, 1>}, {pipeline_mode = #tpu.pipeline_mode<synchronous>, transform_indices = @transform_17, window_bounds = array<i64: 128, 128>}, {pipeline_mode = #tpu.pipeline_mode<synchronous>, transform_indices = @transform_18, window_bounds = array<i64: 128, 1>}, {pipeline_mode = #tpu.pipeline_mode<synchronous>, transform_indices = @transform_19, window_bounds = array<i64: 64, 128>}, {pipeline_mode = #tpu.pipeline_mode<synchronous>, transform_indices = @transform_20, window_bounds = array<i64: 64, 1>}, {pipeline_mode = #tpu.pipeline_mode<synchronous>, transform_indices = @transform_21, window_bounds = array<i64: 64, 64>}, {pipeline_mode = #tpu.pipeline_mode<synchronous>, transform_indices = @transform_22, window_bounds = array<i64: 64, 1>}, {pipeline_mode = #tpu.pipeline_mode<synchronous>, transform_indices = @transform_23, window_bounds = array<i64: 64, 128>}, {pipeline_mode = #tpu.pipeline_mode<synchronous>, transform_indices = @transform_24, window_bounds = array<i64: 64, 1>}, {transform_indices = @transform_25, window_bounds = array<i64: 64, 128>}]} {
    %c0 = arith.constant 0 : index
    %c0_0 = arith.constant 0 : index
    %0 = vector.load %arg1[%c0, %c0_0] : memref<64x128xf32, #tpu.memory_space<vmem>>, vector<64x128xf32>
    %c0_1 = arith.constant 0 : index
    %c0_2 = arith.constant 0 : index
    %1 = vector.load %arg2[%c0_1, %c0_2] : memref<128x64xbf16, #tpu.memory_space<vmem>>, vector<128x64xbf16>
    %2 = arith.truncf %0 : vector<64x128xf32> to vector<64x128xbf16>
    %cst = arith.constant dense<0.000000e+00> : vector<128x128xf32>
    %3 = tpu.matmul %1, %2, %cst {dimension_numbers = #tpu.dot_dimension_numbers<[1], [0], [0], [1], [0, 0, 1, 1], [], []>} : vector<128x64xbf16>, vector<64x128xbf16>, vector<128x128xf32> -> vector<128x128xf32>
    %c0_3 = arith.constant 0 : index
    %c0_4 = arith.constant 0 : index
    %4 = vector.load %arg3[%c0_3, %c0_4] : memref<128x1xf32, #tpu.memory_space<vmem>>, vector<128x1xf32>
    %5 = vector.broadcast %4 : vector<128x1xf32> to vector<128x128xf32>
    %6 = arith.addf %3, %5 : vector<128x128xf32>
    %cst_5 = arith.constant 0.000000e+00 : f32
    %7 = vector.broadcast %cst_5 : f32 to vector<128x128xf32>
    %8 = arith.maximumf %6, %7 : vector<128x128xf32>
    %c0_6 = arith.constant 0 : index
    %c0_7 = arith.constant 0 : index
    %9 = vector.load %arg4[%c0_6, %c0_7] : memref<128x128xbf16, #tpu.memory_space<vmem>>, vector<128x128xbf16>
    %10 = arith.truncf %8 : vector<128x128xf32> to vector<128x128xbf16>
    %cst_8 = arith.constant dense<0.000000e+00> : vector<128x128xf32>
    %11 = tpu.matmul %9, %10, %cst_8 {dimension_numbers = #tpu.dot_dimension_numbers<[1], [0], [0], [1], [0, 0, 1, 1], [], []>} : vector<128x128xbf16>, vector<128x128xbf16>, vector<128x128xf32> -> vector<128x128xf32>
    %c0_9 = arith.constant 0 : index
    %c0_10 = arith.constant 0 : index
    %12 = vector.load %arg5[%c0_9, %c0_10] : memref<128x1xf32, #tpu.memory_space<vmem>>, vector<128x1xf32>
    %13 = vector.broadcast %12 : vector<128x1xf32> to vector<128x128xf32>
    %14 = arith.addf %11, %13 : vector<128x128xf32>
    %cst_11 = arith.constant 0.000000e+00 : f32
    %15 = vector.broadcast %cst_11 : f32 to vector<128x128xf32>
    %16 = arith.maximumf %14, %15 : vector<128x128xf32>
    %c0_12 = arith.constant 0 : index
    %c0_13 = arith.constant 0 : index
    %17 = vector.load %arg6[%c0_12, %c0_13] : memref<128x64xbf16, #tpu.memory_space<vmem>>, vector<128x64xbf16>
    %18 = arith.truncf %0 : vector<64x128xf32> to vector<64x128xbf16>
    %cst_14 = arith.constant dense<0.000000e+00> : vector<128x128xf32>
    %19 = tpu.matmul %17, %18, %cst_14 {dimension_numbers = #tpu.dot_dimension_numbers<[1], [0], [0], [1], [0, 0, 1, 1], [], []>} : vector<128x64xbf16>, vector<64x128xbf16>, vector<128x128xf32> -> vector<128x128xf32>
    %c0_15 = arith.constant 0 : index
    %c0_16 = arith.constant 0 : index
    %20 = vector.load %arg7[%c0_15, %c0_16] : memref<128x1xf32, #tpu.memory_space<vmem>>, vector<128x1xf32>
    %21 = vector.broadcast %20 : vector<128x1xf32> to vector<128x128xf32>
    %22 = arith.addf %19, %21 : vector<128x128xf32>
    %23 = arith.addf %16, %22 : vector<128x128xf32>
    %cst_17 = arith.constant 0.000000e+00 : f32
    %24 = vector.broadcast %cst_17 : f32 to vector<128x128xf32>
    %25 = arith.maximumf %23, %24 : vector<128x128xf32>
    %c0_18 = arith.constant 0 : index
    %c0_19 = arith.constant 0 : index
    %26 = vector.load %arg8[%c0_18, %c0_19] : memref<128x128xbf16, #tpu.memory_space<vmem>>, vector<128x128xbf16>
    %27 = arith.truncf %25 : vector<128x128xf32> to vector<128x128xbf16>
    %cst_20 = arith.constant dense<0.000000e+00> : vector<128x128xf32>
    %28 = tpu.matmul %26, %27, %cst_20 {dimension_numbers = #tpu.dot_dimension_numbers<[1], [0], [0], [1], [0, 0, 1, 1], [], []>} : vector<128x128xbf16>, vector<128x128xbf16>, vector<128x128xf32> -> vector<128x128xf32>
    %c0_21 = arith.constant 0 : index
    %c0_22 = arith.constant 0 : index
    %29 = vector.load %arg9[%c0_21, %c0_22] : memref<128x1xf32, #tpu.memory_space<vmem>>, vector<128x1xf32>
    %30 = vector.broadcast %29 : vector<128x1xf32> to vector<128x128xf32>
    %31 = arith.addf %28, %30 : vector<128x128xf32>
    %cst_23 = arith.constant 0.000000e+00 : f32
    %32 = vector.broadcast %cst_23 : f32 to vector<128x128xf32>
    %33 = arith.maximumf %31, %32 : vector<128x128xf32>
    %c0_24 = arith.constant 0 : index
    %c0_25 = arith.constant 0 : index
    %34 = vector.load %arg10[%c0_24, %c0_25] : memref<128x128xbf16, #tpu.memory_space<vmem>>, vector<128x128xbf16>
    %35 = arith.truncf %33 : vector<128x128xf32> to vector<128x128xbf16>
    %cst_26 = arith.constant dense<0.000000e+00> : vector<128x128xf32>
    %36 = tpu.matmul %34, %35, %cst_26 {dimension_numbers = #tpu.dot_dimension_numbers<[1], [0], [0], [1], [0, 0, 1, 1], [], []>} : vector<128x128xbf16>, vector<128x128xbf16>, vector<128x128xf32> -> vector<128x128xf32>
    %c0_27 = arith.constant 0 : index
    %c0_28 = arith.constant 0 : index
    %37 = vector.load %arg11[%c0_27, %c0_28] : memref<128x1xf32, #tpu.memory_space<vmem>>, vector<128x1xf32>
    %38 = vector.broadcast %37 : vector<128x1xf32> to vector<128x128xf32>
    %39 = arith.addf %36, %38 : vector<128x128xf32>
    %cst_29 = arith.constant 0.000000e+00 : f32
    %40 = vector.broadcast %cst_29 : f32 to vector<128x128xf32>
    %41 = arith.maximumf %39, %40 : vector<128x128xf32>
    %42 = arith.addf %41, %25 : vector<128x128xf32>
    %cst_30 = arith.constant 0.000000e+00 : f32
    %43 = vector.broadcast %cst_30 : f32 to vector<128x128xf32>
    %44 = arith.maximumf %42, %43 : vector<128x128xf32>
    %c0_31 = arith.constant 0 : index
    %c0_32 = arith.constant 0 : index
    %45 = vector.load %arg12[%c0_31, %c0_32] : memref<32x128xbf16, #tpu.memory_space<vmem>>, vector<32x128xbf16>
    %46 = arith.truncf %44 : vector<128x128xf32> to vector<128x128xbf16>
    %cst_33 = arith.constant dense<0.000000e+00> : vector<32x128xf32>
    %47 = tpu.matmul %45, %46, %cst_33 {dimension_numbers = #tpu.dot_dimension_numbers<[1], [0], [0], [1], [0, 0, 1, 1], [], []>} : vector<32x128xbf16>, vector<128x128xbf16>, vector<32x128xf32> -> vector<32x128xf32>
    %c0_34 = arith.constant 0 : index
    %c0_35 = arith.constant 0 : index
    %48 = vector.load %arg13[%c0_34, %c0_35] : memref<32x1xf32, #tpu.memory_space<vmem>>, vector<32x1xf32>
    %49 = vector.broadcast %48 : vector<32x1xf32> to vector<32x128xf32>
    %50 = arith.addf %47, %49 : vector<32x128xf32>
    %cst_36 = arith.constant 0.000000e+00 : f32
    %51 = vector.broadcast %cst_36 : f32 to vector<32x128xf32>
    %52 = arith.maximumf %50, %51 : vector<32x128xf32>
    %c0_37 = arith.constant 0 : index
    %c0_38 = arith.constant 0 : index
    %53 = vector.load %arg14[%c0_37, %c0_38] : memref<128x32xbf16, #tpu.memory_space<vmem>>, vector<128x32xbf16>
    %54 = arith.truncf %52 : vector<32x128xf32> to vector<32x128xbf16>
    %cst_39 = arith.constant dense<0.000000e+00> : vector<128x128xf32>
    %55 = tpu.matmul %53, %54, %cst_39 {dimension_numbers = #tpu.dot_dimension_numbers<[1], [0], [0], [1], [0, 0, 1, 1], [], []>} : vector<128x32xbf16>, vector<32x128xbf16>, vector<128x128xf32> -> vector<128x128xf32>
    %c0_40 = arith.constant 0 : index
    %c0_41 = arith.constant 0 : index
    %56 = vector.load %arg15[%c0_40, %c0_41] : memref<128x1xf32, #tpu.memory_space<vmem>>, vector<128x1xf32>
    %57 = vector.broadcast %56 : vector<128x1xf32> to vector<128x128xf32>
    %58 = arith.addf %55, %57 : vector<128x128xf32>
    %cst_42 = arith.constant 0.000000e+00 : f32
    %59 = vector.broadcast %cst_42 : f32 to vector<128x128xf32>
    %60 = arith.maximumf %58, %59 : vector<128x128xf32>
    %c0_43 = arith.constant 0 : index
    %c0_44 = arith.constant 0 : index
    %61 = vector.load %arg16[%c0_43, %c0_44] : memref<128x128xbf16, #tpu.memory_space<vmem>>, vector<128x128xbf16>
    %62 = arith.truncf %60 : vector<128x128xf32> to vector<128x128xbf16>
    %cst_45 = arith.constant dense<0.000000e+00> : vector<128x128xf32>
    %63 = tpu.matmul %61, %62, %cst_45 {dimension_numbers = #tpu.dot_dimension_numbers<[1], [0], [0], [1], [0, 0, 1, 1], [], []>} : vector<128x128xbf16>, vector<128x128xbf16>, vector<128x128xf32> -> vector<128x128xf32>
    %c0_46 = arith.constant 0 : index
    %c0_47 = arith.constant 0 : index
    %64 = vector.load %arg17[%c0_46, %c0_47] : memref<128x1xf32, #tpu.memory_space<vmem>>, vector<128x1xf32>
    %65 = vector.broadcast %64 : vector<128x1xf32> to vector<128x128xf32>
    %66 = arith.addf %63, %65 : vector<128x128xf32>
    %cst_48 = arith.constant 0.000000e+00 : f32
    %67 = vector.broadcast %cst_48 : f32 to vector<128x128xf32>
    %68 = arith.maximumf %66, %67 : vector<128x128xf32>
    %c0_49 = arith.constant 0 : index
    %c0_50 = arith.constant 0 : index
    %69 = vector.load %arg18[%c0_49, %c0_50] : memref<128x128xbf16, #tpu.memory_space<vmem>>, vector<128x128xbf16>
    %70 = arith.truncf %68 : vector<128x128xf32> to vector<128x128xbf16>
    %cst_51 = arith.constant dense<0.000000e+00> : vector<128x128xf32>
    %71 = tpu.matmul %69, %70, %cst_51 {dimension_numbers = #tpu.dot_dimension_numbers<[1], [0], [0], [1], [0, 0, 1, 1], [], []>} : vector<128x128xbf16>, vector<128x128xbf16>, vector<128x128xf32> -> vector<128x128xf32>
    %c0_52 = arith.constant 0 : index
    %c0_53 = arith.constant 0 : index
    %72 = vector.load %arg19[%c0_52, %c0_53] : memref<128x1xf32, #tpu.memory_space<vmem>>, vector<128x1xf32>
    %73 = vector.broadcast %72 : vector<128x1xf32> to vector<128x128xf32>
    %74 = arith.addf %71, %73 : vector<128x128xf32>
    %cst_54 = arith.constant 0.000000e+00 : f32
    %75 = vector.broadcast %cst_54 : f32 to vector<128x128xf32>
    %76 = arith.maximumf %74, %75 : vector<128x128xf32>
    %77 = arith.addf %76, %60 : vector<128x128xf32>
    %cst_55 = arith.constant 0.000000e+00 : f32
    %78 = vector.broadcast %cst_55 : f32 to vector<128x128xf32>
    %79 = arith.maximumf %77, %78 : vector<128x128xf32>
    %c0_56 = arith.constant 0 : index
    %c0_57 = arith.constant 0 : index
    %80 = vector.load %arg20[%c0_56, %c0_57] : memref<64x128xbf16, #tpu.memory_space<vmem>>, vector<64x128xbf16>
    %81 = arith.truncf %79 : vector<128x128xf32> to vector<128x128xbf16>
    %cst_58 = arith.constant dense<0.000000e+00> : vector<64x128xf32>
    %82 = tpu.matmul %80, %81, %cst_58 {dimension_numbers = #tpu.dot_dimension_numbers<[1], [0], [0], [1], [0, 0, 1, 1], [], []>} : vector<64x128xbf16>, vector<128x128xbf16>, vector<64x128xf32> -> vector<64x128xf32>
    %c0_59 = arith.constant 0 : index
    %c0_60 = arith.constant 0 : index
    %83 = vector.load %arg21[%c0_59, %c0_60] : memref<64x1xf32, #tpu.memory_space<vmem>>, vector<64x1xf32>
    %84 = vector.broadcast %83 : vector<64x1xf32> to vector<64x128xf32>
    %85 = arith.addf %82, %84 : vector<64x128xf32>
    %cst_61 = arith.constant 0.000000e+00 : f32
    %86 = vector.broadcast %cst_61 : f32 to vector<64x128xf32>
    %87 = arith.maximumf %85, %86 : vector<64x128xf32>
    %c0_62 = arith.constant 0 : index
    %c0_63 = arith.constant 0 : index
    %88 = vector.load %arg22[%c0_62, %c0_63] : memref<64x64xbf16, #tpu.memory_space<vmem>>, vector<64x64xbf16>
    %89 = arith.truncf %87 : vector<64x128xf32> to vector<64x128xbf16>
    %cst_64 = arith.constant dense<0.000000e+00> : vector<64x128xf32>
    %90 = tpu.matmul %88, %89, %cst_64 {dimension_numbers = #tpu.dot_dimension_numbers<[1], [0], [0], [1], [0, 0, 1, 1], [], []>} : vector<64x64xbf16>, vector<64x128xbf16>, vector<64x128xf32> -> vector<64x128xf32>
    %c0_65 = arith.constant 0 : index
    %c0_66 = arith.constant 0 : index
    %91 = vector.load %arg23[%c0_65, %c0_66] : memref<64x1xf32, #tpu.memory_space<vmem>>, vector<64x1xf32>
    %92 = vector.broadcast %91 : vector<64x1xf32> to vector<64x128xf32>
    %93 = arith.addf %90, %92 : vector<64x128xf32>
    %cst_67 = arith.constant 0.000000e+00 : f32
    %94 = vector.broadcast %cst_67 : f32 to vector<64x128xf32>
    %95 = arith.maximumf %93, %94 : vector<64x128xf32>
    %c0_68 = arith.constant 0 : index
    %c0_69 = arith.constant 0 : index
    %96 = vector.load %arg24[%c0_68, %c0_69] : memref<64x128xbf16, #tpu.memory_space<vmem>>, vector<64x128xbf16>
    %97 = arith.truncf %79 : vector<128x128xf32> to vector<128x128xbf16>
    %cst_70 = arith.constant dense<0.000000e+00> : vector<64x128xf32>
    %98 = tpu.matmul %96, %97, %cst_70 {dimension_numbers = #tpu.dot_dimension_numbers<[1], [0], [0], [1], [0, 0, 1, 1], [], []>} : vector<64x128xbf16>, vector<128x128xbf16>, vector<64x128xf32> -> vector<64x128xf32>
    %c0_71 = arith.constant 0 : index
    %c0_72 = arith.constant 0 : index
    %99 = vector.load %arg25[%c0_71, %c0_72] : memref<64x1xf32, #tpu.memory_space<vmem>>, vector<64x1xf32>
    %100 = vector.broadcast %99 : vector<64x1xf32> to vector<64x128xf32>
    %101 = arith.addf %98, %100 : vector<64x128xf32>
    %102 = arith.addf %95, %101 : vector<64x128xf32>
    %c0_73 = arith.constant 0 : index
    %c0_74 = arith.constant 0 : index
    %103 = vector.load %arg26[%c0_73, %c0_74] : memref<64x128xf32, #tpu.memory_space<vmem>>, vector<64x128xf32>
    tpu.vector_store %arg26[%c0_73, %c0_74], %102 {strides = array<i32>} : memref<64x128xf32, #tpu.memory_space<vmem>>, vector<64x128xf32>,
    return
  }
  func.func @transform_0(%arg0: i32) -> (i32, i32) {
    %c0_i32 = arith.constant 0 : i32
    %c0_i32_0 = arith.constant 0 : i32
    return %c0_i32, %arg0 : i32, i32
  }
  func.func @transform_1(%arg0: i32) -> (i32, i32) {
    %c0_i32 = arith.constant 0 : i32
    %c0_i32_0 = arith.constant 0 : i32
    %c0_i32_1 = arith.constant 0 : i32
    return %c0_i32, %c0_i32_0 : i32, i32
  }
  func.func @transform_2(%arg0: i32) -> (i32, i32) {
    %c0_i32 = arith.constant 0 : i32
    %c0_i32_0 = arith.constant 0 : i32
    %c0_i32_1 = arith.constant 0 : i32
    return %c0_i32, %c0_i32_0 : i32, i32
  }
  func.func @transform_3(%arg0: i32) -> (i32, i32) {
    %c0_i32 = arith.constant 0 : i32
    %c0_i32_0 = arith.constant 0 : i32
    %c0_i32_1 = arith.constant 0 : i32
    return %c0_i32, %c0_i32_0 : i32, i32
  }
  func.func @transform_4(%arg0: i32) -> (i32, i32) {
    %c0_i32 = arith.constant 0 : i32
    %c0_i32_0 = arith.constant 0 : i32
    %c0_i32_1 = arith.constant 0 : i32
    return %c0_i32, %c0_i32_0 : i32, i32
  }
  func.func @transform_5(%arg0: i32) -> (i32, i32) {
    %c0_i32 = arith.constant 0 : i32
    %c0_i32_0 = arith.constant 0 : i32
    %c0_i32_1 = arith.constant 0 : i32
    return %c0_i32, %c0_i32_0 : i32, i32
  }
  func.func @transform_6(%arg0: i32) -> (i32, i32) {
    %c0_i32 = arith.constant 0 : i32
    %c0_i32_0 = arith.constant 0 : i32
    %c0_i32_1 = arith.constant 0 : i32
    return %c0_i32, %c0_i32_0 : i32, i32
  }
  func.func @transform_7(%arg0: i32) -> (i32, i32) {
    %c0_i32 = arith.constant 0 : i32
    %c0_i32_0 = arith.constant 0 : i32
    %c0_i32_1 = arith.constant 0 : i32
    return %c0_i32, %c0_i32_0 : i32, i32
  }
  func.func @transform_8(%arg0: i32) -> (i32, i32) {
    %c0_i32 = arith.constant 0 : i32
    %c0_i32_0 = arith.constant 0 : i32
    %c0_i32_1 = arith.constant 0 : i32
    return %c0_i32, %c0_i32_0 : i32, i32
  }
  func.func @transform_9(%arg0: i32) -> (i32, i32) {
    %c0_i32 = arith.constant 0 : i32
    %c0_i32_0 = arith.constant 0 : i32
    %c0_i32_1 = arith.constant 0 : i32
    return %c0_i32, %c0_i32_0 : i32, i32
  }
  func.func @transform_10(%arg0: i32) -> (i32, i32) {
    %c0_i32 = arith.constant 0 : i32
    %c0_i32_0 = arith.constant 0 : i32
    %c0_i32_1 = arith.constant 0 : i32
    return %c0_i32, %c0_i32_0 : i32, i32
  }
  func.func @transform_11(%arg0: i32) -> (i32, i32) {
    %c0_i32 = arith.constant 0 : i32
    %c0_i32_0 = arith.constant 0 : i32
    %c0_i32_1 = arith.constant 0 : i32
    return %c0_i32, %c0_i32_0 : i32, i32
  }
  func.func @transform_12(%arg0: i32) -> (i32, i32) {
    %c0_i32 = arith.constant 0 : i32
    %c0_i32_0 = arith.constant 0 : i32
    %c0_i32_1 = arith.constant 0 : i32
    return %c0_i32, %c0_i32_0 : i32, i32
  }
  func.func @transform_13(%arg0: i32) -> (i32, i32) {
    %c0_i32 = arith.constant 0 : i32
    %c0_i32_0 = arith.constant 0 : i32
    %c0_i32_1 = arith.constant 0 : i32
    return %c0_i32, %c0_i32_0 : i32, i32
  }
  func.func @transform_14(%arg0: i32) -> (i32, i32) {
    %c0_i32 = arith.constant 0 : i32
    %c0_i32_0 = arith.constant 0 : i32
    %c0_i32_1 = arith.constant 0 : i32
    return %c0_i32, %c0_i32_0 : i32, i32
  }
  func.func @transform_15(%arg0: i32) -> (i32, i32) {
    %c0_i32 = arith.constant 0 : i32
    %c0_i32_0 = arith.constant 0 : i32
    %c0_i32_1 = arith.constant 0 : i32
    return %c0_i32, %c0_i32_0 : i32, i32
  }
  func.func @transform_16(%arg0: i32) -> (i32, i32) {
    %c0_i32 = arith.constant 0 : i32
    %c0_i32_0 = arith.constant 0 : i32
    %c0_i32_1 = arith.constant 0 : i32
    return %c0_i32, %c0_i32_0 : i32, i32
  }
  func.func @transform_17(%arg0: i32) -> (i32, i32) {
    %c0_i32 = arith.constant 0 : i32
    %c0_i32_0 = arith.constant 0 : i32
    %c0_i32_1 = arith.constant 0 : i32
    return %c0_i32, %c0_i32_0 : i32, i32
  }
  func.func @transform_18(%arg0: i32) -> (i32, i32) {
    %c0_i32 = arith.constant 0 : i32
    %c0_i32_0 = arith.constant 0 : i32
    %c0_i32_1 = arith.constant 0 : i32
    return %c0_i32, %c0_i32_0 : i32, i32
  }
  func.func @transform_19(%arg0: i32) -> (i32, i32) {
    %c0_i32 = arith.constant 0 : i32
    %c0_i32_0 = arith.constant 0 : i32
    %c0_i32_1 = arith.constant 0 : i32
    return %c0_i32, %c0_i32_0 : i32, i32
  }
  func.func @transform_20(%arg0: i32) -> (i32, i32) {
    %c0_i32 = arith.constant 0 : i32
    %c0_i32_0 = arith.constant 0 : i32
    %c0_i32_1 = arith.constant 0 : i32
    return %c0_i32, %c0_i32_0 : i32, i32
  }
  func.func @transform_21(%arg0: i32) -> (i32, i32) {
    %c0_i32 = arith.constant 0 : i32
    %c0_i32_0 = arith.constant 0 : i32
    %c0_i32_1 = arith.constant 0 : i32
    return %c0_i32, %c0_i32_0 : i32, i32
  }
  func.func @transform_22(%arg0: i32) -> (i32, i32) {
    %c0_i32 = arith.constant 0 : i32
    %c0_i32_0 = arith.constant 0 : i32
    %c0_i32_1 = arith.constant 0 : i32
    return %c0_i32, %c0_i32_0 : i32, i32
  }
  func.func @transform_23(%arg0: i32) -> (i32, i32) {
    %c0_i32 = arith.constant 0 : i32
    %c0_i32_0 = arith.constant 0 : i32
    %c0_i32_1 = arith.constant 0 : i32
    return %c0_i32, %c0_i32_0 : i32, i32
  }
  func.func @transform_24(%arg0: i32) -> (i32, i32) {
    %c0_i32 = arith.constant 0 : i32
    %c0_i32_0 = arith.constant 0 : i32
    %c0_i32_1 = arith.constant 0 : i32
    return %c0_i32, %c0_i32_0 : i32, i32
  }
  func.func @transform_25(%arg0: i32) -> (i32, i32) {
    %c0_i32 = arith.constant 0 : i32
    %c0_i32_0 = arith.constant 0 : i32
    return %c0_i32, %arg0 : i32, i32
  }
}

</mosaic_0001>

<bundles_post_ra>
// kernel: _lambda_.1
= control target key start
LH: loop header
LB: loop body
LE: loop exit
PB: predicated region body
PF: predicated region fallthrough
CT: control target
= control target key end

     0   :  { %s5403_s0 = inlined_call_operand.vmem [shape: f32[64,128], index: 0, kind: input, shape index: {}]   ;;  %s5404_s1 = inlined_call_operand.hbm [shape: bf16[128,64], index: 1, kind: input, shape index: {}]   ;;  %s5405_s2 = inlined_call_operand.hbm [shape: f32[128,1], index: 2, kind: input, shape index: {}]   ;;  %s5406_s3 = inlined_call_operand.hbm [shape: bf16[128,128], index: 3, kind: input, shape index: {}]   ;;  %s5407_s4 = inlined_call_operand.hbm [shape: f32[128,1], index: 4, kind: input, shape index: {}]   ;;  %s5408_s5 = inlined_call_operand.hbm [shape: bf16[128,64], index: 5, kind: input, shape index: {}]   ;;  %s5409_s6 = inlined_call_operand.hbm [shape: f32[128,1], index: 6, kind: input, shape index: {}]   ;;  %s5410_s7 = inlined_call_operand.hbm [shape: bf16[128,128], index: 7, kind: input, shape index: {}]   ;;  %s5411_s8 = inlined_call_operand.hbm [shape: f32[128,1], index: 8, kind: input, shape index: {}]   ;;  %s5412_s9 = inlined_call_operand.hbm [shape: bf16[128,128], index: 9, kind: input, shape index: {}]   ;;  %s5413_s10 = inlined_call_operand.hbm [shape: f32[128,1], index: 10, kind: input, shape index: {}]   ;;  %s5414_s11 = inlined_call_operand.hbm [shape: bf16[32,128], index: 11, kind: input, shape index: {}]   ;;  %s5415_s12 = inlined_call_operand.hbm [shape: f32[32,1], index: 12, kind: input, shape index: {}]   ;;  %s5416_s13 = inlined_call_operand.hbm [shape: bf16[128,32], index: 13, kind: input, shape index: {}]   ;;  %s5417_s14 = inlined_call_operand.hbm [shape: f32[128,1], index: 14, kind: input, shape index: {}]   ;;  %s5418_s15 = inlined_call_operand.hbm [shape: bf16[128,128], index: 15, kind: input, shape index: {}]   ;;  %s5419_s16 = inlined_call_operand.hbm [shape: f32[128,1], index: 16, kind: input, shape index: {}]   ;;  %s5420_s17 = inlined_call_operand.hbm [shape: bf16[128,128], index: 17, kind: input, shape index: {}]   ;;  %s5421_s18 = inlined_call_operand.vmem [shape: f32[128,1], index: 18, kind: input, shape index: {}]   ;;  %s5422_s19 = inlined_call_operand.hbm [shape: bf16[64,128], index: 19, kind: input, shape index: {}]   ;;  %s5423_s20 = inlined_call_operand.hbm [shape: f32[64,1], index: 20, kind: input, shape index: {}]   ;;  %s5424_s21 = inlined_call_operand.hbm [shape: bf16[64,64], index: 21, kind: input, shape index: {}]   ;;  %s5425_s22 = inlined_call_operand.hbm [shape: f32[64,1], index: 22, kind: input, shape index: {}]   ;;  %s5426_s23 = inlined_call_operand.vmem [shape: bf16[64,128], index: 23, kind: input, shape index: {}]   ;;  %s5427_s24 = inlined_call_operand.vmem [shape: f32[64,1], index: 24, kind: input, shape index: {}]   ;;  %s5428_s25 = inlined_call_operand.vmem [shape: f32[64,128], index: 25, kind: output, shape index: {}]  }
   0x1   :  { %5445 = sst [smem:[#allocation64_spill]] %s5403_s0 }
   0x2   :  { %5446 = sst [smem:[#allocation65_spill]] %s5404_s1 }
   0x3   :  { %5447 = sst [smem:[#allocation66_spill]] %s5405_s2 }
   0x4   :  { %5448 = sst [smem:[#allocation67_spill]] %s5406_s3 }
   0x5   :  { %5449 = sst [smem:[#allocation68_spill]] %s5407_s4 }
   0x6   :  { %5450 = sst [smem:[#allocation69_spill]] %s5408_s5 }
   0x7   :  { %5451 = sst [smem:[#allocation70_spill]] %s5409_s6 }
   0x8   :  { %5452 = sst [smem:[#allocation71_spill]] %s5410_s7 }
   0x9   :  { %5453 = sst [smem:[#allocation72_spill]] %s5411_s8 }
   0xa   :  { %5454 = sst [smem:[#allocation73_spill]] %s5412_s9 }
   0xb   :  { %30 = vsyncpa [#allocation3], 0 }
   0xc   :  { %31 = vsyncpa [#allocation5], 0 }
   0xd   :  { %32 = vsyncpa [#allocation8], 0 }
   0xe   :  { %33 = vsyncpa [#allocation11], 0 }
   0xf   :  { %34 = vsyncpa [#allocation14], 0 }
  0x10   :  { %35 = vsyncpa [#allocation17], 0 }
  0x11   :  { %36 = vsyncpa [#allocation20], 0 }
  0x12   :  { %37 = vsyncpa [#allocation23], 0 }
  0x13   :  { %38 = vsyncpa [#allocation26], 0 }
  0x14   :  { %39 = vsyncpa [#allocation29], 0 }
  0x15   :  { %40 = vsyncpa [#allocation32], 0  ;;  %s4458_s29 = smov [#allocation4]  }
  0x16   :  { %s60_s2 = sshll.u32 %s4458_s29, 4  ;;  %s61_s2 = int_to_ptr.vmem [resolvable:$true] %s60_s2 }
  0x17   :  { %s4024_s6 = scalar_lea.vmem %s61_s2, 2048  ;;  %p4029_p1 = scmp.lt.s32.totalorder %s61_s2, %s61_s2 }
  0x18   :  { %p4025_p0 = scmp.ne.s32.totalorder %s61_s2, %s4024_s6  ;;  %p4030_p2 = scmp.lt.s32.totalorder %s4024_s6, %s4024_s6 }
  0x1a   :  { %p4031_p3 = por %p4030_p2, %p4029_p1 }
  0x1c   :  { %p4032_p4 = pnand %p4031_p3, %p4025_p0 }
  0x1e   :  { %4035 = shalt.err (!%p4032_p4)
}
  0x1f   :  { %s4459_s30 = smov 128   ;;  %s4460_s7 = smov 8  }
  0x20   :  { %s5455_s1 = sld [smem:[#allocation66_spill]]  ;;  %s4461_s8 = smov [#allocation7]  }
  0x21   :  { %s84_s27 = sshll.u32 %s4461_s8, 4  ;;  %s4462_s4 = smov [#allocation10]   ;;  %s85_s27 = int_to_ptr.vmem [resolvable:$true] %s84_s27 }
  0x22   :  { %s108_s28 = sshll.u32 %s4462_s4, 4  ;;  %s4044_s9 = scalar_lea.vmem %s85_s27, 2048  ;;  %s109_s28 = int_to_ptr.vmem [resolvable:$true] %s108_s28 }
  0x23   :  { %p4045_p5 = scmp.ne.s32.totalorder %s85_s27, %s4044_s9  ;;  %p4049_p6 = scmp.lt.s32.totalorder %s85_s27, %s85_s27 }
  0x24   :  { %p4050_p7 = scmp.lt.s32.totalorder %s4044_s9, %s4044_s9 }
  0x26   :  { %66 = dma.hbm_to_vmem [thread:$0]  %s5455_s1, 2048, %s61_s2, [#allocation5], %s4459_s30, %s4459_s30, %s4460_s7  }
  0x27   :  { %p4051_p8 = por %p4050_p7, %p4049_p6 }
  0x29   :  { %p4052_p9 = pnand %p4051_p8, %p4045_p5 }
  0x2b   :  { %4055 = shalt.err (!%p4052_p9)
}
  0x2c   :  { %s5456_s29 = sld [smem:[#allocation68_spill]]  ;;  %s4064_s2 = scalar_lea.vmem %s109_s28, 2048 }
  0x2d   :  { %p4065_p10 = scmp.ne.s32.totalorder %s109_s28, %s4064_s2  ;;  %p4069_p11 = scmp.lt.s32.totalorder %s109_s28, %s109_s28 }
  0x2e   :  { %p4070_p12 = scmp.lt.s32.totalorder %s4064_s2, %s4064_s2 }
  0x30   :  { %p4071_p13 = por %p4070_p12, %p4069_p11 }
  0x32   :  { %90 = dma.hbm_to_vmem [thread:$0]  %s5456_s29, 2048, %s85_s27, [#allocation8], %s4459_s30, %s4459_s30, %s4460_s7  }
  0x33   :  { %p4072_p0 = pnand %p4071_p13, %p4065_p10 }
  0x35   :  { %4075 = shalt.err (!%p4072_p0)
}
  0x36   :  { %s5457_s26 = sld [smem:[#allocation70_spill]]  ;;  %s4463_s1 = smov [#allocation13]  }
  0x37   :  { %s132_s8 = sshll.u32 %s4463_s1, 4  ;;  %s4464_s4 = smov [#allocation16]   ;;  %s133_s8 = int_to_ptr.vmem [resolvable:$true] %s132_s8 }
  0x38   :  { %s156_s27 = sshll.u32 %s4464_s4, 4  ;;  %s4084_s9 = scalar_lea.vmem %s133_s8, 2048  ;;  %s157_s27 = int_to_ptr.vmem [resolvable:$true] %s156_s27 }
  0x39   :  { %p4085_p1 = scmp.ne.s32.totalorder %s133_s8, %s4084_s9  ;;  %p4089_p2 = scmp.lt.s32.totalorder %s133_s8, %s133_s8 }
  0x3a   :  { %p4090_p3 = scmp.lt.s32.totalorder %s4084_s9, %s4084_s9 }
  0x3c   :  { %114 = dma.hbm_to_vmem [thread:$0]  %s5457_s26, 2048, %s109_s28, [#allocation11], %s4459_s30, %s4459_s30, %s4460_s7  }
  0x3d   :  { %p4091_p4 = por %p4090_p3, %p4089_p2 }
  0x3f   :  { %p4092_p5 = pnand %p4091_p4, %p4085_p1 }
  0x41   :  { %4095 = shalt.err (!%p4092_p5)
}
  0x42   :  { %s5458_s29 = sld [smem:[#allocation72_spill]]  ;;  %s4104_s28 = scalar_lea.vmem %s157_s27, 2048 }
  0x43   :  { %p4105_p6 = scmp.ne.s32.totalorder %s157_s27, %s4104_s28  ;;  %p4109_p7 = scmp.lt.s32.totalorder %s157_s27, %s157_s27 }
  0x44   :  { %p4110_p8 = scmp.lt.s32.totalorder %s4104_s28, %s4104_s28 }
  0x46   :  { %p4111_p9 = por %p4110_p8, %p4109_p7 }
  0x48   :  { %138 = dma.hbm_to_vmem [thread:$0]  %s5458_s29, 2048, %s133_s8, [#allocation14], %s4459_s30, %s4459_s30, %s4460_s7  }
  0x49   :  { %p4112_p10 = pnand %p4111_p9, %p4105_p6 }
  0x4b   :  { %4115 = shalt.err (!%p4112_p10)
}
  0x4c   :  { %162 = dma.hbm_to_vmem [thread:$0]  %s5413_s10, 2048, %s157_s27, [#allocation17], %s4459_s30, %s4459_s30, %s4460_s7  }
  0x4d   :  { %s4465_s3 = smov [#allocation19]   ;;  %s4466_s1 = smov [#allocation22]  }
  0x4e   :  { %s180_s26 = sshll.u32 %s4465_s3, 4  ;;  %s204_s8 = sshll.u32 %s4466_s1, 4  ;;  %s181_s26 = int_to_ptr.vmem [resolvable:$true] %s180_s26  ;;  %s205_s8 = int_to_ptr.vmem [resolvable:$true] %s204_s8 }
  0x4f   :  { %s4124_s4 = scalar_lea.vmem %s181_s26, 512  ;;  %p4129_p12 = scmp.lt.s32.totalorder %s181_s26, %s181_s26 }
  0x50   :  { %p4125_p11 = scmp.ne.s32.totalorder %s181_s26, %s4124_s4  ;;  %p4130_p13 = scmp.lt.s32.totalorder %s4124_s4, %s4124_s4 }
  0x52   :  { %p4131_p0 = por %p4130_p13, %p4129_p12 }
  0x54   :  { %p4132_p1 = pnand %p4131_p0, %p4125_p11 }
  0x56   :  { %4135 = shalt.err (!%p4132_p1)
}
  0x57   :  { %186 = dma.hbm_to_vmem [thread:$0]  %s5415_s12, 512, %s181_s26, [#allocation20], %s4459_s30, %s4459_s30, %s4460_s7  }
  0x58   :  { %s4144_s10 = scalar_lea.vmem %s205_s8, 2048  ;;  %p4149_p3 = scmp.lt.s32.totalorder %s205_s8, %s205_s8 }
  0x59   :  { %p4145_p2 = scmp.ne.s32.totalorder %s205_s8, %s4144_s10  ;;  %p4150_p4 = scmp.lt.s32.totalorder %s4144_s10, %s4144_s10 }
  0x5b   :  { %p4151_p5 = por %p4150_p4, %p4149_p3 }
  0x5d   :  { %p4152_p6 = pnand %p4151_p5, %p4145_p2 }
  0x5f   :  { %4155 = shalt.err (!%p4152_p6)
}
  0x60   :  { %210 = dma.hbm_to_vmem [thread:$0]  %s5417_s14, 2048, %s205_s8, [#allocation23], %s4459_s30, %s4459_s30, %s4460_s7  }
  0x61   :  { %s4467_s29 = smov [#allocation25]  }
  0x62   :  { %s228_s28 = sshll.u32 %s4467_s29, 4  ;;  %s229_s28 = int_to_ptr.vmem [resolvable:$true] %s228_s28 }
  0x63   :  { %s4164_s2 = scalar_lea.vmem %s229_s28, 2048  ;;  %p4169_p8 = scmp.lt.s32.totalorder %s229_s28, %s229_s28 }
  0x64   :  { %p4165_p7 = scmp.ne.s32.totalorder %s229_s28, %s4164_s2  ;;  %p4170_p9 = scmp.lt.s32.totalorder %s4164_s2, %s4164_s2 }
  0x66   :  { %p4171_p10 = por %p4170_p9, %p4169_p8 }
  0x68   :  { %p4172_p11 = pnand %p4171_p10, %p4165_p7 }
  0x6a   :  { %4175 = shalt.err (!%p4172_p11)
}
  0x6b   :  { %234 = dma.hbm_to_vmem [thread:$0]  %s5419_s16, 2048, %s229_s28, [#allocation26], %s4459_s30, %s4459_s30, %s4460_s7  }
  0x6c   :  { %s4468_s3 = smov [#allocation28]   ;;  %s4469_s14 = smov [#allocation31]  }
  0x6d   :  { %s254_s26 = sshll.u32 %s4468_s3, 4  ;;  %s278_s1 = sshll.u32 %s4469_s14, 4  ;;  %s255_s26 = int_to_ptr.vmem [resolvable:$true] %s254_s26  ;;  %s279_s1 = int_to_ptr.vmem [resolvable:$true] %s278_s1 }
  0x6e   :  { %s4184_s8 = scalar_lea.vmem %s255_s26, 512  ;;  %p4189_p13 = scmp.lt.s32.totalorder %s255_s26, %s255_s26 }
  0x6f   :  { %p4185_p12 = scmp.ne.s32.totalorder %s255_s26, %s4184_s8  ;;  %p4190_p0 = scmp.lt.s32.totalorder %s4184_s8, %s4184_s8 }
  0x71   :  { %p4191_p1 = por %p4190_p0, %p4189_p13 }
  0x73   :  { %p4192_p2 = pnand %p4191_p1, %p4185_p12 }
  0x75   :  { %4195 = shalt.err (!%p4192_p2)
}
  0x76   :  { %s4470_s4 = smov 64   ;;  %s4471_s9 = smov 4  }
  0x77   :  { %260 = dma.hbm_to_vmem [thread:$0]  %s5422_s19, 512, %s255_s26, [#allocation29], %s4470_s4, %s4470_s4, %s4471_s9  }
  0x78   :  { %s4204_s10 = scalar_lea.vmem %s279_s1, 512  ;;  %p4209_p4 = scmp.lt.s32.totalorder %s279_s1, %s279_s1 }
  0x79   :  { %p4205_p3 = scmp.ne.s32.totalorder %s279_s1, %s4204_s10  ;;  %p4210_p5 = scmp.lt.s32.totalorder %s4204_s10, %s4204_s10 }
  0x7b   :  { %p4211_p6 = por %p4210_p5, %p4209_p4 }
  0x7d   :  { %p4212_p7 = pnand %p4211_p6, %p4205_p3 }
  0x7f   :  { %4215 = shalt.err (!%p4212_p7)
}
  0x80   :  { %284 = dma.hbm_to_vmem [thread:$0]  %s5424_s21, 512, %s279_s1, [#allocation32], %s4470_s4, %s4470_s4, %s4471_s9  }
  0x81   :  { %s4472_s29 = smov [#allocation2]   ;;  %s4473_s2 = smov [#allocation6]  }
  0x82   :  { %s48_s28 = sshll.u32 %s4472_s29, 4  ;;  %s72_s12 = sshll.u32 %s4473_s2, 4  ;;  %s49_s28 = int_to_ptr.vmem [resolvable:$true] %s48_s28  ;;  %s73_s12 = int_to_ptr.vmem [resolvable:$true] %s72_s12 }
  0x83   :  { %s4224_s19 = scalar_lea.vmem %s49_s28, 1024  ;;  %p4229_p9 = scmp.lt.s32.totalorder %s49_s28, %s49_s28 }
  0x84   :  { %p4225_p8 = scmp.ne.s32.totalorder %s49_s28, %s4224_s19  ;;  %p4230_p10 = scmp.lt.s32.totalorder %s4224_s19, %s4224_s19 }
  0x86   :  { %p4231_p11 = por %p4230_p10, %p4229_p9 }
  0x88   :  { %p4232_p12 = pnand %p4231_p11, %p4225_p8 }
  0x8a   :  { %4235 = shalt.err (!%p4232_p12)
}
  0x8b   :  { %s5459_s26 = sld [smem:[#allocation65_spill]]  ;;  %s4244_s21 = scalar_lea.vmem %s73_s12, 1024 }
  0x8c   :  { %p4245_p13 = scmp.ne.s32.totalorder %s73_s12, %s4244_s21  ;;  %p4249_p0 = scmp.lt.s32.totalorder %s73_s12, %s73_s12 }
  0x8d   :  { %p4250_p1 = scmp.lt.s32.totalorder %s4244_s21, %s4244_s21 }
  0x8f   :  { %p4251_p2 = por %p4250_p1, %p4249_p0 }
  0x91   :  { %54 = dma.hbm_to_vmem [thread:$0]  %s5459_s26, 1024, %s49_s28, [#allocation3], %s4470_s4, %s4470_s4, %s4471_s9  }
  0x92   :  { %p4252_p3 = pnand %p4251_p2, %p4245_p13 }
  0x94   :  { %4255 = shalt.err (!%p4252_p3)
}
  0x95   :  { %s5460_s8 = sld [smem:[#allocation67_spill]]  ;;  %s4474_s5 = smov [#allocation9]  }
  0x96   :  { %s96_s16 = sshll.u32 %s4474_s5, 4  ;;  %s4475_s10 = smov [#allocation12]   ;;  %s97_s16 = int_to_ptr.vmem [resolvable:$true] %s96_s16 }
  0x97   :  { %s120_s27 = sshll.u32 %s4475_s10, 4  ;;  %s4264_s0 = scalar_lea.vmem %s97_s16, 1024  ;;  %s121_s27 = int_to_ptr.vmem [resolvable:$true] %s120_s27 }
  0x98   :  { %p4265_p4 = scmp.ne.s32.totalorder %s97_s16, %s4264_s0  ;;  %p4269_p5 = scmp.lt.s32.totalorder %s97_s16, %s97_s16 }
  0x99   :  { %p4270_p6 = scmp.lt.s32.totalorder %s4264_s0, %s4264_s0 }
  0x9b   :  { %78 = dma.hbm_to_vmem [thread:$0]  %s5460_s8, 1024, %s73_s12, [#allocation5], %s4470_s4, %s4470_s4, %s4471_s9  }
  0x9c   :  { %p4271_p7 = por %p4270_p6, %p4269_p5 }
  0x9e   :  { %p4272_p8 = pnand %p4271_p7, %p4265_p4 }
  0xa0   :  { %4275 = shalt.err (!%p4272_p8)
}
  0xa1   :  { %s5461_s2 = sld [smem:[#allocation69_spill]]  ;;  %s4284_s12 = scalar_lea.vmem %s121_s27, 1024 }
  0xa2   :  { %p4285_p9 = scmp.ne.s32.totalorder %s121_s27, %s4284_s12  ;;  %p4289_p10 = scmp.lt.s32.totalorder %s121_s27, %s121_s27 }
  0xa3   :  { %p4290_p11 = scmp.lt.s32.totalorder %s4284_s12, %s4284_s12 }
  0xa5   :  { %p4291_p12 = por %p4290_p11, %p4289_p10 }
  0xa7   :  { %102 = dma.hbm_to_vmem [thread:$0]  %s5461_s2, 1024, %s97_s16, [#allocation8], %s4470_s4, %s4470_s4, %s4471_s9  }
  0xa8   :  { %p4292_p13 = pnand %p4291_p12, %p4285_p9 }
  0xaa   :  { %4295 = shalt.err (!%p4292_p13)
}
  0xab   :  { %s5462_s3 = sld [smem:[#allocation71_spill]]  ;;  %s4476_s26 = smov [#allocation15]  }
  0xac   :  { %s144_s21 = sshll.u32 %s4476_s26, 4  ;;  %s4477_s14 = smov [#allocation18]   ;;  %s145_s21 = int_to_ptr.vmem [resolvable:$true] %s144_s21 }
  0xad   :  { %s168_s1 = sshll.u32 %s4477_s14, 4  ;;  %s4304_s8 = scalar_lea.vmem %s145_s21, 1024  ;;  %s169_s1 = int_to_ptr.vmem [resolvable:$true] %s168_s1 }
  0xae   :  { %p4305_p0 = scmp.ne.s32.totalorder %s145_s21, %s4304_s8  ;;  %p4309_p1 = scmp.lt.s32.totalorder %s145_s21, %s145_s21 }
  0xaf   :  { %p4310_p2 = scmp.lt.s32.totalorder %s4304_s8, %s4304_s8 }
  0xb1   :  { %126 = dma.hbm_to_vmem [thread:$0]  %s5462_s3, 1024, %s121_s27, [#allocation11], %s4470_s4, %s4470_s4, %s4471_s9  }
  0xb2   :  { %p4311_p3 = por %p4310_p2, %p4309_p1 }
  0xb4   :  { %p4312_p4 = pnand %p4311_p3, %p4305_p0 }
  0xb6   :  { %4315 = shalt.err (!%p4312_p4)
}
  0xb7   :  { %s5463_s10 = sld [smem:[#allocation73_spill]]  ;;  %s4324_s27 = scalar_lea.vmem %s169_s1, 256 }
  0xb8   :  { %p4325_p5 = scmp.ne.s32.totalorder %s169_s1, %s4324_s27  ;;  %p4329_p6 = scmp.lt.s32.totalorder %s169_s1, %s169_s1 }
  0xb9   :  { %p4330_p7 = scmp.lt.s32.totalorder %s4324_s27, %s4324_s27 }
  0xbb   :  { %p4331_p8 = por %p4330_p7, %p4329_p6 }
  0xbd   :  { %150 = dma.hbm_to_vmem [thread:$0]  %s5463_s10, 1024, %s145_s21, [#allocation14], %s4470_s4, %s4470_s4, %s4471_s9  }
  0xbe   :  { %p4332_p9 = pnand %p4331_p8, %p4325_p5 }
  0xc0   :  { %4335 = shalt.err (!%p4332_p9)
}
  0xc1   :  { %174 = dma.hbm_to_vmem [thread:$0]  %s5414_s11, 256, %s169_s1, [#allocation17], %s4470_s4, %s4470_s4, %s4471_s9  }
  0xc2   :  { %s4478_s28 = smov [#allocation21]   ;;  %s4479_s12 = smov [#allocation24]  }
  0xc3   :  { %s192_s2 = sshll.u32 %s4478_s28, 4  ;;  %s216_s19 = sshll.u32 %s4479_s12, 4  ;;  %s193_s2 = int_to_ptr.vmem [resolvable:$true] %s192_s2  ;;  %s217_s19 = int_to_ptr.vmem [resolvable:$true] %s216_s19 }
  0xc4   :  { %s4344_s6 = scalar_lea.vmem %s193_s2, 1024  ;;  %p4349_p11 = scmp.lt.s32.totalorder %s193_s2, %s193_s2 }
  0xc5   :  { %p4345_p10 = scmp.ne.s32.totalorder %s193_s2, %s4344_s6  ;;  %p4350_p12 = scmp.lt.s32.totalorder %s4344_s6, %s4344_s6 }
  0xc7   :  { %p4351_p13 = por %p4350_p12, %p4349_p11 }
  0xc9   :  { %p4352_p0 = pnand %p4351_p13, %p4345_p10 }
  0xcb   :  { %4355 = shalt.err (!%p4352_p0)
}
  0xcc   :  { %198 = dma.hbm_to_vmem [thread:$0]  %s5416_s13, 1024, %s193_s2, [#allocation20], %s4470_s4, %s4470_s4, %s4471_s9  }
  0xcd   :  { %s4364_s11 = scalar_lea.vmem %s217_s19, 1024  ;;  %p4369_p2 = scmp.lt.s32.totalorder %s217_s19, %s217_s19 }
  0xce   :  { %p4365_p1 = scmp.ne.s32.totalorder %s217_s19, %s4364_s11  ;;  %p4370_p3 = scmp.lt.s32.totalorder %s4364_s11, %s4364_s11 }
  0xd0   :  { %p4371_p4 = por %p4370_p3, %p4369_p2 }
  0xd2   :  { %p4372_p5 = pnand %p4371_p4, %p4365_p1 }
  0xd4   :  { %4375 = shalt.err (!%p4372_p5)
}
  0xd5   :  { %222 = dma.hbm_to_vmem [thread:$0]  %s5418_s15, 1024, %s217_s19, [#allocation23], %s4470_s4, %s4470_s4, %s4471_s9  }
  0xd6   :  { %s4480_s1 = smov [#allocation27]   ;;  %s4481_s5 = smov [#allocation30]  }
  0xd7   :  { %s240_s8 = sshll.u32 %s4480_s1, 4  ;;  %s266_s16 = sshll.u32 %s4481_s5, 4  ;;  %s241_s8 = int_to_ptr.vmem [resolvable:$true] %s240_s8  ;;  %s267_s16 = int_to_ptr.vmem [resolvable:$true] %s266_s16 }
  0xd8   :  { %s4384_s13 = scalar_lea.vmem %s241_s8, 1024  ;;  %p4389_p7 = scmp.lt.s32.totalorder %s241_s8, %s241_s8 }
  0xd9   :  { %p4385_p6 = scmp.ne.s32.totalorder %s241_s8, %s4384_s13  ;;  %p4390_p8 = scmp.lt.s32.totalorder %s4384_s13, %s4384_s13 }
  0xdb   :  { %p4391_p9 = por %p4390_p8, %p4389_p7 }
  0xdd   :  { %p4392_p10 = pnand %p4391_p9, %p4385_p6 }
  0xdf   :  { %4395 = shalt.err (!%p4392_p10)
}
  0xe0   :  { %246 = dma.hbm_to_vmem [thread:$0]  %s5420_s17, 1024, %s241_s8, [#allocation26], %s4470_s4, %s4470_s4, %s4471_s9  }
  0xe1   :  { %s4404_s15 = scalar_lea.vmem %s267_s16, 1024  ;;  %p4409_p12 = scmp.lt.s32.totalorder %s267_s16, %s267_s16 }
  0xe2   :  { %p4405_p11 = scmp.ne.s32.totalorder %s267_s16, %s4404_s15  ;;  %p4410_p13 = scmp.lt.s32.totalorder %s4404_s15, %s4404_s15 }
  0xe4   :  { %p4411_p0 = por %p4410_p13, %p4409_p12 }
  0xe6   :  { %p4412_p1 = pnand %p4411_p0, %p4405_p11 }
  0xe8   :  { %4415 = shalt.err (!%p4412_p1)
}
  0xe9   :  { %272 = dma.hbm_to_vmem [thread:$0]  %s5423_s20, 1024, %s267_s16, [#allocation29], %s4459_s30, %s4459_s30, %s4460_s7  }
  0xea   :  { %s4482_s28 = smov [#allocation33]  }
  0xeb   :  { %s290_s2 = sshll.u32 %s4482_s28, 4  ;;  %s291_s2 = int_to_ptr.vmem [resolvable:$true] %s290_s2 }
  0xec   :  { %s4424_s12 = scalar_lea.vmem %s291_s2, 1024  ;;  %p4429_p3 = scmp.lt.s32.totalorder %s291_s2, %s291_s2 }
  0xed   :  { %p4425_p2 = scmp.ne.s32.totalorder %s291_s2, %s4424_s12  ;;  %p4430_p4 = scmp.lt.s32.totalorder %s4424_s12, %s4424_s12 }
  0xef   :  { %p4431_p5 = por %p4430_p4, %p4429_p3 }
  0xf1   :  { %p4432_p6 = pnand %p4431_p5, %p4425_p2 }
  0xf3   :  { %4435 = shalt.err (!%p4432_p6)
}
  0xf4   :  { %296 = dma.hbm_to_vmem [thread:$0]  %s5425_s22, 1024, %s291_s2, [#allocation32], %s4459_s30, %s4459_s30, %s4460_s7  }
  0xf5   :  { %4436 = dma.done.wait [#allocation3], 1024  }
  0xf6   :  { %4437 = vsyncadd [#allocation3], 4294966272 }
  0xf7   :  { %4438 = dma.done.wait [#allocation5], 3072  }
  0xf8   :  { %4439 = vsyncadd [#allocation5], 4294964224 }
  0xf9   :  { %4440 = dma.done.wait [#allocation8], 3072  }
  0xfa   :  { %4441 = vsyncadd [#allocation8], 4294964224 }
  0xfb   :  { %4442 = dma.done.wait [#allocation11], 3072  }
  0xfc   :  { %4443 = vsyncadd [#allocation11], 4294964224 }
  0xfd   :  { %4444 = dma.done.wait [#allocation14], 3072  }
  0xfe   :  { %4445 = vsyncadd [#allocation14], 4294964224 }
  0xff   :  { %4446 = dma.done.wait [#allocation17], 2304  }
 0x100   :  { %4447 = vsyncadd [#allocation17], 4294964992 }
 0x101   :  { %4448 = dma.done.wait [#allocation20], 1536  }
 0x102   :  { %4449 = vsyncadd [#allocation20], 4294965760 }
 0x103   :  { %4450 = dma.done.wait [#allocation23], 3072  }
 0x104   :  { %4451 = vsyncadd [#allocation23], 4294964224 }
 0x105   :  { %4452 = dma.done.wait [#allocation26], 3072  }
 0x106   :  { %4453 = vsyncadd [#allocation26], 4294964224 }
 0x107   :  { %4454 = dma.done.wait [#allocation29], 1536  }
 0x108   :  { %4455 = vsyncadd [#allocation29], 4294965760 }
 0x109   :  { %4456 = dma.done.wait [#allocation32], 1536  }
 0x10a   :  { %4457 = vsyncadd [#allocation32], 4294965760  ;;  %v4483_v0 = vmov 0   ;;  %v407_v1 = vld [vmem:[#allocation4 + $0x70] sm:$0xff]  ;;  %v405_v2 = vld [vmem:[#allocation4 + $0x60] sm:$0xff]  ;;  %s5464_s30 = sld [smem:[#allocation64_spill]] }
 0x10b   :  { %3937 = vset.pattern.permute.xlu1 %v4483_v0  ;;  %3936 = vset.pattern.permute.xlu0 %v4483_v0  ;;  %v408_v6 = vld [vmem:[#allocation4 + $0x78] sm:$0xff]  ;;  %v406_v9 = vld [vmem:[#allocation4 + $0x68] sm:$0xff]  ;;  %v403_v14 = vld [vmem:[#allocation4 + $0x50] sm:$0xff]  ;;  %vm529_vm0 = vcmask 523264   ;;  %vm2102_vm1 = vcmask 261120  }
 0x10c   :  { %481 = vperm.xlu0 %3936, %v407_v1   ;;  %471 = vperm.xlu1 %3937, %v405_v2   ;;  %v404_v13 = vld [vmem:[#allocation4 + $0x58] sm:$0xff]  ;;  %v3938_v17 = vld [vmem:[#allocation2] sm:$0xff]   ;;  %v402_v21 = vld [vmem:[#allocation4 + $0x48] sm:$0xff] }
 0x10d   :  { %3606 = vmatprep.mubr.msk.bf16.mxu0 %vm529_vm0, %v3938_v17  ;;  %v401_v19 = vld [vmem:[#allocation4 + $0x40] sm:$0xff]  ;;  %v399_v22 = vld [vmem:[#allocation4 + $0x30] sm:$0xff]  ;;  %v400_v23 = vld [vmem:[#allocation4 + $0x38] sm:$0xff] }
 0x10e   :  { %v3939_v24 = vld [vmem:[#allocation2 + $0x8] sm:$0xff]   ;;  %v3940_v25 = vld [vmem:[#allocation2 + $0x10] sm:$0xff]   ;;  %v397_v26 = vld [vmem:[#allocation4 + $0x20] sm:$0xff] }
 0x10f   :  { %v398_v27 = vld [vmem:[#allocation4 + $0x28] sm:$0xff]  ;;  %v395_v28 = vld [vmem:[#allocation4 + $0x10] sm:$0xff]  ;;  %v396_v29 = vld [vmem:[#allocation4 + $0x18] sm:$0xff] }
 0x110   :  { %v371_v3 = vld [vmem:[%s5464_s30 + $0x30] sm:$0xff]  ;;  %v372_v4 = vld [vmem:[%s5464_s30 + $0x38] sm:$0xff]  ;;  %v369_v7 = vld [vmem:[%s5464_s30 + $0x20] sm:$0xff]  ;;  %486 = vperm.xlu0 %3936, %v408_v6   ;;  %476 = vperm.xlu1 %3937, %v406_v9  }
 0x111   :  { %v392_v5 = vpack.c.bf16 %v372_v4, %v371_v3  ;;  %v370_v8 = vld [vmem:[%s5464_s30 + $0x28] sm:$0xff]  ;;  %v367_v11 = vld [vmem:[%s5464_s30 + $0x10] sm:$0xff]  ;;  %v368_v12 = vld [vmem:[%s5464_s30 + $0x18] sm:$0xff] }
 0x112   :  { %v391_v10 = vpack.c.bf16 %v370_v8, %v369_v7  ;;  %v365_v15 = vld [vmem:[%s5464_s30] sm:$0xff]  ;;  %v390_v16 = vpack.c.bf16 %v368_v12, %v367_v11  ;;  %v366_v18 = vld [vmem:[%s5464_s30 + $0x8] sm:$0xff]  ;;  %v3941_v30 = vld [vmem:[#allocation2 + $0x18] sm:$0xff]  }
 0x113   :  { %3598 = vmatprep.subr.bf16.mxu0 %v392_v5  ;;  %v389_v20 = vpack.c.bf16 %v366_v18, %v365_v15  ;;  %v3942_v31 = vld [vmem:[#allocation2 + $0x20] sm:$0xff]   ;;  %v394_v33 = vld [vmem:[#allocation4 + $0x8] sm:$0xff]  ;;  %v705_v34 = vld [vmem:[#allocation7 + $0x70] sm:$0xff] }
 0x114   :  { %3599 = vmatpush3.bf16.msra.mxu0 %v392_v5  ;;  %461 = vperm.xlu0 %3936, %v403_v14   ;;  %v393_v32 = vld [vmem:[#allocation4] sm:$0xff]  ;;  %v706_v35 = vld [vmem:[#allocation7 + $0x78] sm:$0xff]  ;;  %v3943_v36 = vld [vmem:[#allocation2 + $0x28] sm:$0xff]  }
 0x115   :  { %3600 = vmatprep.subr.bf16.mxu0 %v391_v10  ;;  %466 = vperm.xlu1 %3937, %v404_v13   ;;  %v3944_v37 = vld [vmem:[#allocation2 + $0x30] sm:$0xff]   ;;  %v979_v39 = vld [vmem:[#allocation10 + $0x78] sm:$0xff]  ;;  %v703_v40 = vld [vmem:[#allocation7 + $0x60] sm:$0xff] }
 0x116   :  { %v978_v38 = vld [vmem:[#allocation10 + $0x70] sm:$0xff]  ;;  %v704_v41 = vld [vmem:[#allocation7 + $0x68] sm:$0xff]  ;;  %v3945_v42 = vld [vmem:[#allocation2 + $0x38] sm:$0xff]  }
 0x117   :  { %v3946_v43 = vld [vmem:[#allocation9] sm:$0xff]   ;;  %v977_v45 = vld [vmem:[#allocation10 + $0x68] sm:$0xff]  ;;  %v701_v46 = vld [vmem:[#allocation7 + $0x50] sm:$0xff] }
 0x118   :  { %3601 = vmatpush3.bf16.msra.mxu0 %v391_v10  ;;  %451 = vperm.xlu0 %3936, %v401_v19   ;;  %v976_v44 = vld [vmem:[#allocation10 + $0x60] sm:$0xff]  ;;  %v702_v47 = vld [vmem:[#allocation7 + $0x58] sm:$0xff]  ;;  %v3947_v48 = vld [vmem:[#allocation9 + $0x8] sm:$0xff]  }
 0x119   :  { %3602 = vmatprep.subr.bf16.mxu0 %v390_v16  ;;  %456 = vperm.xlu1 %3937, %v402_v21   ;;  %v975_v49 = vld [vmem:[#allocation10 + $0x58] sm:$0xff]  ;;  %v974_v50 = vld [vmem:[#allocation10 + $0x50] sm:$0xff]  ;;  %v700_v52 = vld [vmem:[#allocation7 + $0x48] sm:$0xff] }
 0x11a   :  { %v3948_v51 = vld [vmem:[#allocation9 + $0x10] sm:$0xff]   ;;  %v699_v53 = vld [vmem:[#allocation7 + $0x40] sm:$0xff]  ;;  %v3949_v54 = vld [vmem:[#allocation9 + $0x18] sm:$0xff]  }
 0x11b   :  { %v973_v55 = vld [vmem:[#allocation10 + $0x48] sm:$0xff]  ;;  %v972_v56 = vld [vmem:[#allocation10 + $0x40] sm:$0xff]  ;;  %v698_v58 = vld [vmem:[#allocation7 + $0x38] sm:$0xff] }
 0x11c   :  { %3603 = vmatpush3.bf16.msra.mxu0 %v390_v16  ;;  %441 = vperm.xlu0 %3936, %v399_v22   ;;  %v3950_v57 = vld [vmem:[#allocation9 + $0x20] sm:$0xff]   ;;  %v697_v59 = vld [vmem:[#allocation7 + $0x30] sm:$0xff]  ;;  %v3951_v60 = vld [vmem:[#allocation9 + $0x28] sm:$0xff]  }
 0x11d   :  { %3604 = vmatprep.subr.bf16.mxu0 %v389_v20  ;;  %446 = vperm.xlu1 %3937, %v400_v23   ;;  %v971_v61 = vld [vmem:[#allocation10 + $0x38] sm:$0xff]  ;;  %v970_v62 = vld [vmem:[#allocation10 + $0x30] sm:$0xff]  ;;  %v696_v0 = vld [vmem:[#allocation7 + $0x28] sm:$0xff] }
 0x11e   :  { %v3952_v63 = vld [vmem:[#allocation9 + $0x30] sm:$0xff]   ;;  %v695_v1 = vld [vmem:[#allocation7 + $0x20] sm:$0xff]  ;;  %v3953_v2 = vld [vmem:[#allocation9 + $0x38] sm:$0xff]  }
 0x11f   :  { %v969_v3 = vld [vmem:[#allocation10 + $0x28] sm:$0xff]  ;;  %v968_v4 = vld [vmem:[#allocation10 + $0x20] sm:$0xff]  ;;  %v693_v6 = vld [vmem:[#allocation7 + $0x10] sm:$0xff] }
 0x120   :  { %3605 = vmatpush3.bf16.msra.mxu0 %v389_v20  ;;  %431 = vperm.xlu0 %3936, %v397_v26   ;;  %v967_v7 = vld [vmem:[#allocation10 + $0x18] sm:$0xff]  ;;  %v966_v8 = vld [vmem:[#allocation10 + $0x10] sm:$0xff]  ;;  %v692_v9 = vld [vmem:[#allocation7 + $0x8] sm:$0xff] }
 0x121   :  { %3654 = vmatprep.subr.bf16.mxu0 %v392_v5  ;;  %436 = vperm.xlu1 %3937, %v398_v27   ;;  %v965_v11 = vld [vmem:[#allocation10 + $0x8] sm:$0xff]  ;;  %v964_v12 = vld [vmem:[#allocation10] sm:$0xff]  ;;  %v1292_v13 = vld [vmem:[#allocation13 + $0x78] sm:$0xff] }
 0x122   :  { %v1291_v14 = vld [vmem:[#allocation13 + $0x70] sm:$0xff]  ;;  %v1289_v15 = vld [vmem:[#allocation13 + $0x60] sm:$0xff]  ;;  %v1288_v18 = vld [vmem:[#allocation13 + $0x58] sm:$0xff] }
 0x123   :  { %3607 = vmatmul.mubr.msk.bf16.vlgmr.msra.gmra.mxu0 %vm529_vm0, %v3939_v24  ;;  %v1287_v17 = vld [vmem:[#allocation13 + $0x50] sm:$0xff]  ;;  %v1285_v19 = vld [vmem:[#allocation13 + $0x40] sm:$0xff]  ;;  %v1284_v22 = vld [vmem:[#allocation13 + $0x38] sm:$0xff] }
 0x124   :  { %3610 = vmatprep.mubr.msk.bf16.mxu0 %vm529_vm0, %v3940_v25  ;;  %3655 = vmatpush3.bf16.msra.mxu0 %v392_v5  ;;  %v694_v5 = vld [vmem:[#allocation7 + $0x18] sm:$0xff]  ;;  %v1283_v21 = vld [vmem:[#allocation13 + $0x30] sm:$0xff]  ;;  %v1281_v23 = vld [vmem:[#allocation13 + $0x20] sm:$0xff] }
 0x125   :  { %3656 = vmatprep.subr.bf16.mxu0 %v391_v10  ;;  %421 = vperm.xlu0 %3936, %v395_v28   ;;  %v1282_v24 = vld [vmem:[#allocation13 + $0x28] sm:$0xff]  ;;  %v1279_v25 = vld [vmem:[#allocation13 + $0x10] sm:$0xff]  ;;  %v1280_v26 = vld [vmem:[#allocation13 + $0x18] sm:$0xff] }
 0x126   :  { %426 = vperm.xlu1 %3937, %v396_v29   ;;  %v1277_v27 = vld [vmem:[#allocation13] sm:$0xff]  ;;  %v1278_v28 = vld [vmem:[#allocation13 + $0x8] sm:$0xff]  ;;  %v1572_v29 = vld [vmem:[#allocation16 + $0x70] sm:$0xff] }
 0x128   :  { %3657 = vmatpush3.bf16.msra.mxu0 %v391_v10  ;;  %v691_v10 = vld [vmem:[#allocation7] sm:$0xff] }
 0x129   :  { %3658 = vmatprep.subr.bf16.mxu0 %v390_v16  ;;  %411 = vperm.xlu0 %3936, %v393_v32   ;;  %v1571_v32 = vld [vmem:[#allocation16 + $0x68] sm:$0xff] }
 0x12a   :  { %416 = vperm.xlu1 %3937, %v394_v33   ;;  %v1568_v33 = vld [vmem:[#allocation16 + $0x50] sm:$0xff] }
 0x12b   :  { %3611 = vmatmul.mubr.msk.bf16.gmra.mxu0 %vm529_vm0, %v3941_v30  ;;  %v1573_v30 = vld [vmem:[#allocation16 + $0x78] sm:$0xff] }
 0x12c   :  { %3614 = vmatprep.mubr.msk.bf16.mxu0 %vm529_vm0, %v3942_v31  ;;  %3659 = vmatpush3.bf16.msra.mxu0 %v390_v16  ;;  %v1290_v16 = vld [vmem:[#allocation13 + $0x68] sm:$0xff]  ;;  %v1570_v31 = vld [vmem:[#allocation16 + $0x60] sm:$0xff] }
 0x12d   :  { %3660 = vmatprep.subr.bf16.mxu0 %v389_v20  ;;  %779 = vperm.xlu0 %3936, %v705_v34   ;;  %v1569_v34 = vld [vmem:[#allocation16 + $0x58] sm:$0xff] }
 0x12e   :  { %784 = vperm.xlu1 %3937, %v706_v35   ;;  %v1566_v35 = vld [vmem:[#allocation16 + $0x40] sm:$0xff] }
 0x130   :  { %3661 = vmatpush3.bf16.msra.mxu0 %v389_v20  ;;  %v1286_v20 = vld [vmem:[#allocation13 + $0x48] sm:$0xff] }
 0x131   :  { %1052 = vperm.xlu0 %3936, %v978_v38  }
 0x132   :  { %1057 = vperm.xlu1 %3937, %v979_v39   ;;  %v1564_v39 = vld [vmem:[#allocation16 + $0x30] sm:$0xff] }
 0x133   :  { %3615 = vmatmul.mubr.msk.bf16.gmra.mxu0 %vm529_vm0, %v3943_v36  ;;  %v1567_v36 = vld [vmem:[#allocation16 + $0x48] sm:$0xff] }
 0x134   :  { %3618 = vmatprep.mubr.msk.bf16.mxu0 %vm529_vm0, %v3944_v37 }
 0x135   :  { %769 = vperm.xlu0 %3936, %v703_v40   ;;  %v1565_v40 = vld [vmem:[#allocation16 + $0x38] sm:$0xff] }
 0x136   :  { %774 = vperm.xlu1 %3937, %v704_v41   ;;  %v1562_v41 = vld [vmem:[#allocation16 + $0x20] sm:$0xff] }
 0x139   :  { %1042 = vperm.xlu0 %3936, %v976_v44  }
 0x13a   :  { %1047 = vperm.xlu1 %3937, %v977_v45   ;;  %v3954_v45 = vld [vmem:[#allocation6] sm:$0xff]  }
 0x13b   :  { %3619 = vmatmul.mubr.msk.bf16.gmra.mxu0 %vm529_vm0, %v3945_v42  ;;  %3638 = vmatprep.mubr.bf16.mxu1 %v3954_v45 }
 0x13c   :  { %3662 = vmatprep.mubr.msk.bf16.mxu0 %vm529_vm0, %v3946_v43  ;;  %v1563_v43 = vld [vmem:[#allocation16 + $0x28] sm:$0xff] }
 0x13d   :  { %759 = vperm.xlu0 %3936, %v701_v46   ;;  %v1560_v46 = vld [vmem:[#allocation16 + $0x10] sm:$0xff] }
 0x13e   :  { %764 = vperm.xlu1 %3937, %v702_v47   ;;  %v1561_v47 = vld [vmem:[#allocation16 + $0x18] sm:$0xff] }
 0x141   :  { %1032 = vperm.xlu0 %3936, %v974_v50   ;;  %v1558_v50 = vld [vmem:[#allocation16] sm:$0xff] }
 0x142   :  { %1037 = vperm.xlu1 %3937, %v975_v49  }
 0x143   :  { %3663 = vmatmul.mubr.msk.bf16.vlgmr.msra.gmra.mxu0 %vm529_vm0, %v3947_v48 }
 0x144   :  { %3666 = vmatprep.mubr.msk.bf16.mxu0 %vm529_vm0, %v3948_v51  ;;  %v1559_v51 = vld [vmem:[#allocation16 + $0x8] sm:$0xff] }
 0x145   :  { %749 = vperm.xlu0 %3936, %v699_v53  }
 0x146   :  { %754 = vperm.xlu1 %3937, %v700_v52   ;;  %v1861_v52 = vld [vmem:[#allocation19 + $0x10] sm:$0xff] }
 0x149   :  { %1022 = vperm.xlu0 %3936, %v972_v56   ;;  %v1859_v56 = vld [vmem:[#allocation19] sm:$0xff] }
 0x14a   :  { %1027 = vperm.xlu1 %3937, %v973_v55  }
 0x14b   :  { %3667 = vmatmul.mubr.msk.bf16.gmra.mxu0 %vm529_vm0, %v3949_v54  ;;  %v1862_v54 = vld [vmem:[#allocation19 + $0x18] sm:$0xff] }
 0x14c   :  { %3670 = vmatprep.mubr.msk.bf16.mxu0 %vm529_vm0, %v3950_v57  ;;  %v1860_v57 = vld [vmem:[#allocation19 + $0x8] sm:$0xff] }
 0x14d   :  { %739 = vperm.xlu0 %3936, %v697_v59  }
 0x14e   :  { %744 = vperm.xlu1 %3937, %v698_v58  }
 0x151   :  { %1012 = vperm.xlu0 %3936, %v970_v62   ;;  %v1978_v62 = vld [vmem:[#allocation22 + $0x60] sm:$0xff] }
 0x152   :  { %1017 = vperm.xlu1 %3937, %v971_v61   ;;  %v1981_v61 = vld [vmem:[#allocation22 + $0x78] sm:$0xff] }
 0x153   :  { %3671 = vmatmul.mubr.msk.bf16.gmra.mxu0 %vm529_vm0, %v3951_v60  ;;  %v1980_v60 = vld [vmem:[#allocation22 + $0x70] sm:$0xff] }
 0x154   :  { %3674 = vmatprep.mubr.msk.bf16.mxu0 %vm529_vm0, %v3952_v63 }
 0x155   :  { %729 = vperm.xlu0 %3936, %v695_v1  }
 0x156   :  { %734 = vperm.xlu1 %3937, %v696_v0   ;;  %v1979_v0 = vld [vmem:[#allocation22 + $0x68] sm:$0xff] }
 0x159   :  { %1002 = vperm.xlu0 %3936, %v968_v4  }
 0x15a   :  { %1007 = vperm.xlu1 %3937, %v969_v3   ;;  %v1977_v3 = vld [vmem:[#allocation22 + $0x58] sm:$0xff] }
 0x15b   :  { %3675 = vmatmul.mubr.msk.bf16.gmra.mxu0 %vm529_vm0, %v3953_v2  ;;  %v1976_v2 = vld [vmem:[#allocation22 + $0x50] sm:$0xff] }
 0x15d   :  { %719 = vperm.xlu0 %3936, %v693_v6   ;;  %v1974_v6 = vld [vmem:[#allocation22 + $0x40] sm:$0xff] }
 0x15e   :  { %724 = vperm.xlu1 %3937, %v694_v5  }
 0x161   :  { %992 = vperm.xlu0 %3936, %v966_v8   ;;  %v1972_v8 = vld [vmem:[#allocation22 + $0x30] sm:$0xff] }
 0x162   :  { %997 = vperm.xlu1 %3937, %v967_v7   ;;  %v1975_v7 = vld [vmem:[#allocation22 + $0x48] sm:$0xff] }
 0x165   :  { %709 = vperm.xlu0 %3936, %v691_v10   ;;  %v1973_v10 = vld [vmem:[#allocation22 + $0x38] sm:$0xff] }
 0x166   :  { %714 = vperm.xlu1 %3937, %v692_v9  }
 0x169   :  { %982 = vperm.xlu0 %3936, %v964_v12   ;;  %v1970_v12 = vld [vmem:[#allocation22 + $0x20] sm:$0xff] }
 0x16a   :  { %987 = vperm.xlu1 %3937, %v965_v11  }
 0x16d   :  { %1365 = vperm.xlu0 %3936, %v1291_v14  }
 0x16e   :  { %1370 = vperm.xlu1 %3937, %v1292_v13   ;;  %v1971_v13 = vld [vmem:[#allocation22 + $0x28] sm:$0xff] }
 0x171   :  { %1355 = vperm.xlu0 %3936, %v1289_v15  }
 0x172   :  { %1360 = vperm.xlu1 %3937, %v1290_v16   ;;  %v1968_v16 = vld [vmem:[#allocation22 + $0x10] sm:$0xff] }
 0x175   :  { %1345 = vperm.xlu0 %3936, %v1287_v17   ;;  %v1969_v17 = vld [vmem:[#allocation22 + $0x18] sm:$0xff] }
 0x176   :  { %1350 = vperm.xlu1 %3937, %v1288_v18   ;;  %v1966_v18 = vld [vmem:[#allocation22] sm:$0xff] }
 0x179   :  { %1335 = vperm.xlu0 %3936, %v1285_v19  }
 0x17a   :  { %1340 = vperm.xlu1 %3937, %v1286_v20   ;;  %v1967_v20 = vld [vmem:[#allocation22 + $0x8] sm:$0xff] }
 0x17d   :  { %1325 = vperm.xlu0 %3936, %v1283_v21  }
 0x17e   :  { %1330 = vperm.xlu1 %3937, %v1284_v22   ;;  %v2278_v22 = vld [vmem:[#allocation25 + $0x70] sm:$0xff] }
 0x181   :  { %1315 = vperm.xlu0 %3936, %v1281_v23   ;;  %v2279_v23 = vld [vmem:[#allocation25 + $0x78] sm:$0xff] }
 0x182   :  { %1320 = vperm.xlu1 %3937, %v1282_v24  }
 0x185   :  { %1305 = vperm.xlu0 %3936, %v1279_v25  }
 0x186   :  { %1310 = vperm.xlu1 %3937, %v1280_v26   ;;  %v2276_v26 = vld [vmem:[#allocation25 + $0x60] sm:$0xff] }
 0x187   :  { %v4780_v37 = vpop.permute.xlu0 %481  ;;  %v4782_v38 = vpop.permute.xlu1 %471 }
 0x189   :  { %1295 = vperm.xlu0 %3936, %v1277_v27   ;;  %v2277_v27 = vld [vmem:[#allocation25 + $0x68] sm:$0xff] }
 0x18a   :  { %1300 = vperm.xlu1 %3937, %v1278_v28   ;;  %v2274_v28 = vld [vmem:[#allocation25 + $0x50] sm:$0xff] }
 0x18b   :  { %v4784_v42 = vpop.permute.xlu0 %486  ;;  %v4786_v44 = vpop.permute.xlu1 %476 }
 0x18d   :  { %1646 = vperm.xlu0 %3936, %v1572_v29  }
 0x18e   :  { %1651 = vperm.xlu1 %3937, %v1573_v30   ;;  %v2275_v30 = vld [vmem:[#allocation25 + $0x58] sm:$0xff] }
 0x18f   :  { %v4788_v48 = vpop.permute.xlu0 %461 }
 0x190   :  { %v4790_v49 = vpop.permute.xlu1 %466 }
 0x191   :  { %1636 = vperm.xlu0 %3936, %v1570_v31  }
 0x192   :  { %1641 = vperm.xlu1 %3937, %v1571_v32   ;;  %v2272_v32 = vld [vmem:[#allocation25 + $0x40] sm:$0xff] }
 0x193   :  { %v4792_v53 = vpop.permute.xlu0 %451 }
 0x194   :  { %v4794_v55 = vpop.permute.xlu1 %456 }
 0x195   :  { %1626 = vperm.xlu0 %3936, %v1568_v33   ;;  %v2273_v33 = vld [vmem:[#allocation25 + $0x48] sm:$0xff] }
 0x196   :  { %1631 = vperm.xlu1 %3937, %v1569_v34  }
 0x197   :  { %v4796_v58 = vpop.permute.xlu0 %441 }
 0x198   :  { %v4798_v59 = vpop.permute.xlu1 %446 }
 0x199   :  { %1616 = vperm.xlu0 %3936, %v1566_v35  }
 0x19a   :  { %1621 = vperm.xlu1 %3937, %v1567_v36  }
 0x19b   :  { %v4800_v63 = vpop.permute.xlu0 %431 }
 0x19c   :  { %v4802_v1 = vpop.permute.xlu1 %436 }
 0x19d   :  { %1606 = vperm.xlu0 %3936, %v1564_v39  }
 0x19e   :  { %1611 = vperm.xlu1 %3937, %v1565_v40   ;;  %v2270_v40 = vld [vmem:[#allocation25 + $0x30] sm:$0xff] }
 0x1a0   :  { %v4804_v4 = vpop.permute.xlu0 %421 }
 0x1a1   :  { %1596 = vperm.xlu0 %3936, %v1562_v41   ;;  %v4806_v5 = vpop.permute.xlu1 %426  ;;  %v2271_v41 = vld [vmem:[#allocation25 + $0x38] sm:$0xff] }
 0x1a2   :  { %1601 = vperm.xlu1 %3937, %v1563_v43  }
 0x1a4   :  { %v4808_v9 = vpop.permute.xlu0 %411 }
 0x1a5   :  { %1586 = vperm.xlu0 %3936, %v1560_v46   ;;  %v4810_v11 = vpop.permute.xlu1 %416  ;;  %v2268_v46 = vld [vmem:[#allocation25 + $0x20] sm:$0xff] }
 0x1a6   :  { %1591 = vperm.xlu1 %3937, %v1561_v47  }
 0x1a8   :  { %v4812_v14 = vpop.permute.xlu0 %779 }
 0x1a9   :  { %1576 = vperm.xlu0 %3936, %v1558_v50   ;;  %v4814_v15 = vpop.permute.xlu1 %784  ;;  %v2269_v50 = vld [vmem:[#allocation25 + $0x28] sm:$0xff] }
 0x1aa   :  { %1581 = vperm.xlu1 %3937, %v1559_v51  }
 0x1ac   :  { %v4816_v19 = vpop.permute.xlu0 %1052 }
 0x1ad   :  { %1875 = vperm.xlu0 %3936, %v1861_v52   ;;  %v4818_v21 = vpop.permute.xlu1 %1057 }
 0x1ae   :  { %1880 = vperm.xlu1 %3937, %v1862_v54  }
 0x1b0   :  { %v4820_v24 = vpop.permute.xlu0 %769 }
 0x1b1   :  { %1865 = vperm.xlu0 %3936, %v1859_v56   ;;  %v4822_v25 = vpop.permute.xlu1 %774  ;;  %v2266_v56 = vld [vmem:[#allocation25 + $0x10] sm:$0xff] }
 0x1b2   :  { %1870 = vperm.xlu1 %3937, %v1860_v57   ;;  %v2267_v57 = vld [vmem:[#allocation25 + $0x18] sm:$0xff] }
 0x1b4   :  { %v4824_v29 = vpop.permute.xlu0 %1042 }
 0x1b5   :  { %2054 = vperm.xlu0 %3936, %v1980_v60   ;;  %v4826_v31 = vpop.permute.xlu1 %1047 }
 0x1b6   :  { %2059 = vperm.xlu1 %3937, %v1981_v61  }
 0x1b8   :  { %v4830_v35 = vpop.permute.xlu0 %759 }
 0x1b9   :  { %2044 = vperm.xlu0 %3936, %v1978_v62   ;;  %v4832_v36 = vpop.permute.xlu1 %764 }
 0x1ba   :  { %2049 = vperm.xlu1 %3937, %v1979_v0  }
 0x1bc   :  { %v4840_v47 = vpop.permute.xlu0 %1032 }
 0x1bd   :  { %2034 = vperm.xlu0 %3936, %v1976_v2   ;;  %v4842_v51 = vpop.permute.xlu1 %1037  ;;  %v2264_v2 = vld [vmem:[#allocation25] sm:$0xff] }
 0x1be   :  { %2039 = vperm.xlu1 %3937, %v1977_v3   ;;  %v2265_v3 = vld [vmem:[#allocation25 + $0x8] sm:$0xff] }
 0x1c0   :  { %v4850_v61 = vpop.permute.xlu0 %749 }
 0x1c1   :  { %2024 = vperm.xlu0 %3936, %v1974_v6   ;;  %v4852_v62 = vpop.permute.xlu1 %754 }
 0x1c2   :  { %2029 = vperm.xlu1 %3937, %v1975_v7  }
 0x1c5   :  { %2014 = vperm.xlu0 %3936, %v1972_v8   ;;  %v2559_v8 = vld [vmem:[%s5421_s18 + $0x70] sm:$0xff] }
 0x1c6   :  { %2019 = vperm.xlu1 %3937, %v1973_v10   ;;  %v4859_v10 = vpop.permute.xlu0 %1022 }
 0x1c9   :  { %2004 = vperm.xlu0 %3936, %v1970_v12   ;;  %v2560_v12 = vld [vmem:[%s5421_s18 + $0x78] sm:$0xff] }
 0x1ca   :  { %2009 = vperm.xlu1 %3937, %v1971_v13   ;;  %v4864_v13 = vpop.permute.xlu1 %1027 }
 0x1cd   :  { %1994 = vperm.xlu0 %3936, %v1968_v16  }
 0x1ce   :  { %1999 = vperm.xlu1 %3937, %v1969_v17  }
 0x1d1   :  { %1984 = vperm.xlu0 %3936, %v1966_v18   ;;  %v2557_v18 = vld [vmem:[%s5421_s18 + $0x60] sm:$0xff] }
 0x1d2   :  { %1989 = vperm.xlu1 %3937, %v1967_v20   ;;  %v2558_v20 = vld [vmem:[%s5421_s18 + $0x68] sm:$0xff] }
 0x1d5   :  { %2352 = vperm.xlu0 %3936, %v2278_v22  }
 0x1d6   :  { %2357 = vperm.xlu1 %3937, %v2279_v23   ;;  %v4872_v23 = vpop.permute.xlu0 %739 }
 0x1d9   :  { %2342 = vperm.xlu0 %3936, %v2276_v26   ;;  %v4874_v26 = vpop.permute.xlu1 %744 }
 0x1da   :  { %2347 = vperm.xlu1 %3937, %v2277_v27  }
 0x1dd   :  { %2332 = vperm.xlu0 %3936, %v2274_v28   ;;  %v2555_v28 = vld [vmem:[%s5421_s18 + $0x50] sm:$0xff] }
 0x1de   :  { %2337 = vperm.xlu1 %3937, %v2275_v30  }
 0x1e1   :  { %2322 = vperm.xlu0 %3936, %v2272_v32   ;;  %v2556_v32 = vld [vmem:[%s5421_s18 + $0x58] sm:$0xff] }
 0x1e2   :  { %2327 = vperm.xlu1 %3937, %v2273_v33  }
 0x1e3   :  { %v4828_v34 = vpop.f32.mrf.mxu0 }
 0x1e5   :  { %v4834_v39 = vpop.f32.mrf.mxu0  ;;  %2312 = vperm.xlu0 %3936, %v2270_v40  }
 0x1e6   :  { %2317 = vperm.xlu1 %3937, %v2271_v41  }
 0x1e7   :  { %v4836_v43 = vpop.f32.mrf.mxu0 }
 0x1e9   :  { %v4838_v45 = vpop.f32.mrf.mxu0  ;;  %2302 = vperm.xlu0 %3936, %v2268_v46  }
 0x1ea   :  { %2307 = vperm.xlu1 %3937, %v2269_v50   ;;  %v2553_v50 = vld [vmem:[%s5421_s18 + $0x40] sm:$0xff] }
 0x1eb   :  { %v4844_v52 = vpop.f32.mrf.mxu0 }
 0x1ed   :  { %v4846_v54 = vpop.f32.mrf.mxu0  ;;  %2292 = vperm.xlu0 %3936, %v2266_v56   ;;  %v4888_v56 = vpop.permute.xlu0 %1012 }
 0x1ee   :  { %2297 = vperm.xlu1 %3937, %v2267_v57  }
 0x1ef   :  { %v4848_v60 = vpop.f32.mrf.mxu0 }
 0x1f1   :  { %v4854_v0 = vpop.f32.mrf.mxu0  ;;  %2282 = vperm.xlu0 %3936, %v2264_v2  }
 0x1f2   :  { %2287 = vperm.xlu1 %3937, %v2265_v3  }
 0x1f3   :  { %v3616_v6 = vpop.f32.mrf.mxu0 }
 0x1f5   :  { %v620_v7 = vpop.f32.mrf.mxu0  ;;  %2633 = vperm.xlu0 %3936, %v2559_v8   ;;  %v629_v8 = vadd.f32 %v3616_v6, %v4788_v48  ;;  %v4905_v48 = vpop.permute.xlu0 %729 }
 0x1f6   :  { %2638 = vperm.xlu1 %3937, %v2560_v12  }
 0x1f7   :  { %v3617_v16 = vpop.f32.mrf.mxu0  ;;  %v661_v6 = vmax.f32 %v629_v8, 0.0 }
 0x1f9   :  { %v623_v17 = vpop.f32.mrf.mxu0  ;;  %2623 = vperm.xlu0 %3936, %v2557_v18  }
 0x1fa   :  { %2628 = vperm.xlu1 %3937, %v2558_v20  }
 0x1fb   :  { %v3620_v22 = vpop.f32.mrf.mxu0 }
 0x1fc   :  { %v645_v30 = vadd.f32 %v3620_v22, %v4780_v37  ;;  %v632_v37 = vadd.f32 %v3617_v16, %v4790_v49  ;;  %v2551_v49 = vld [vmem:[%s5421_s18 + $0x30] sm:$0xff] }
 0x1fd   :  { %v636_v27 = vpop.f32.mrf.mxu0  ;;  %2613 = vperm.xlu0 %3936, %v2555_v28   ;;  %v621_v28 = vadd.f32 %v620_v7, %v4792_v53  ;;  %v613_v53 = vadd.f32 %v4844_v52, %v4796_v58 }
 0x1fe   :  { %v637_v40 = vadd.f32 %v636_v27, %v4782_v38  ;;  %2618 = vperm.xlu1 %3937, %v2556_v32   ;;  %v665_v57 = vmax.f32 %v645_v30, 0.0  ;;  %v2554_v38 = vld [vmem:[%s5421_s18 + $0x48] sm:$0xff]  ;;  %v662_v16 = vmax.f32 %v632_v37, 0.0  ;;  %v2552_v27 = vld [vmem:[%s5421_s18 + $0x38] sm:$0xff] }
 0x1ff   :  { %v3621_v33 = vpop.f32.mrf.mxu0  ;;  %v659_v7 = vmax.f32 %v621_v28, 0.0  ;;  %v2548_v37 = vld [vmem:[%s5421_s18 + $0x18] sm:$0xff]  ;;  %v657_v52 = vmax.f32 %v613_v53, 0.0  ;;  %v3956_v53 = vld [vmem:[#allocation6 + $0x10] sm:$0xff]  }
 0x200   :  { %v648_v41 = vadd.f32 %v3621_v33, %v4784_v42  ;;  %v4895_v42 = vpop.permute.xlu1 %1017  ;;  %v663_v12 = vmax.f32 %v637_v40, 0.0  ;;  %v688_v32 = vpack.c.bf16 %v662_v16, %v661_v6  ;;  %v2550_v40 = vld [vmem:[%s5421_s18 + $0x28] sm:$0xff]  ;;  %v2855_v6 = vld [vmem:[#allocation30 + $0x28] sm:$0xff] }
 0x201   :  { %v639_v46 = vpop.f32.mrf.mxu0  ;;  %2603 = vperm.xlu0 %3936, %v2553_v50  }
 0x202   :  { %v666_v2 = vmax.f32 %v648_v41, 0.0  ;;  %v640_v3 = vadd.f32 %v639_v46, %v4786_v44  ;;  %2608 = vperm.xlu1 %3937, %v2554_v38   ;;  %v624_v44 = vadd.f32 %v623_v17, %v4794_v55  ;;  %v2549_v55 = vld [vmem:[%s5421_s18 + $0x20] sm:$0xff]  ;;  %v616_v17 = vadd.f32 %v4848_v60, %v4798_v59  ;;  %v2547_v41 = vld [vmem:[%s5421_s18 + $0x10] sm:$0xff]  ;;  %v4923_v46 = vpop.permute.xlu0 %1002  ;;  %v2546_v38 = vld [vmem:[%s5421_s18 + $0x8] sm:$0xff] }
 0x203   :  { %v608_v60 = vadd.f32 %v4854_v0, %v4802_v1  ;;  %v600_v1 = vadd.f32 %v4836_v43, %v4806_v5  ;;  %v592_v43 = vadd.f32 %v4838_v45, %v4810_v11  ;;  %v2852_v45 = vld [vmem:[#allocation30 + $0x10] sm:$0xff] }
 0x204   :  { %v664_v18 = vmax.f32 %v640_v3, 0.0  ;;  %v690_v20 = vpack.c.bf16 %v666_v2, %v665_v57  ;;  %v4908_v30 = vpop.permute.xlu1 %734  ;;  %v660_v33 = vmax.f32 %v624_v44, 0.0  ;;  %v658_v59 = vmax.f32 %v616_v17, 0.0  ;;  %v2545_v2 = vld [vmem:[%s5421_s18] sm:$0xff]  ;;  %v2853_v17 = vld [vmem:[#allocation30 + $0x18] sm:$0xff] }
 0x205   :  { %2593 = vperm.xlu0 %3936, %v2551_v49   ;;  %v605_v57 = vadd.f32 %v4846_v54, %v4800_v63  ;;  %v656_v3 = vmax.f32 %v608_v60, 0.0  ;;  %v597_v63 = vadd.f32 %v4828_v34, %v4804_v4  ;;  %v654_v5 = vmax.f32 %v600_v1, 0.0  ;;  %v2857_v49 = vld [vmem:[#allocation30 + $0x38] sm:$0xff]  ;;  %v2854_v4 = vld [vmem:[#allocation30 + $0x20] sm:$0xff] }
 0x206   :  { %v689_v22 = vpack.c.bf16 %v664_v18, %v663_v12  ;;  %3622 = vmatprep.subr.bf16.mxu1 %v690_v20  ;;  %2598 = vperm.xlu1 %3937, %v2552_v27   ;;  %v687_v50 = vpack.c.bf16 %v660_v33, %v659_v7  ;;  %v686_v0 = vpack.c.bf16 %v658_v59, %v657_v52  ;;  %v4942_v8 = vpop.permute.xlu0 %719  ;;  %v2856_v18 = vld [vmem:[#allocation30 + $0x30] sm:$0xff]  ;;  %v652_v27 = vmax.f32 %v592_v43, 0.0  ;;  %v2851_v33 = vld [vmem:[#allocation30 + $0x8] sm:$0xff]  ;;  %v3007_v7 = vld [vmem:[#allocation33] sm:$0xff] }
 0x207   :  { %3623 = vmatpush3.bf16.msra.mxu1 %v690_v20  ;;  %v655_v54 = vmax.f32 %v605_v57, 0.0  ;;  %v653_v16 = vmax.f32 %v597_v63, 0.0  ;;  %v589_v44 = vadd.f32 %v4834_v39, %v4808_v9  ;;  %v3008_v59 = vld [vmem:[#allocation33 + $0x8] sm:$0xff]  ;;  %v3958_v57 = vld [vmem:[#allocation6 + $0x20] sm:$0xff]   ;;  %v3960_v43 = vld [vmem:[#allocation6 + $0x30] sm:$0xff]  }
 0x208   :  { %3624 = vmatprep.subr.bf16.mxu1 %v689_v22  ;;  %v4930_v58 = vpop.permute.xlu1 %1007  ;;  %v3957_v52 = vld [vmem:[#allocation6 + $0x18] sm:$0xff]  }
 0x209   :  { %2583 = vperm.xlu0 %3936, %v2549_v55   ;;  %v685_v20 = vpack.c.bf16 %v656_v3, %v655_v54  ;;  %v651_v11 = vmax.f32 %v589_v44, 0.0  ;;  %v3012_v3 = vld [vmem:[#allocation33 + $0x28] sm:$0xff]  ;;  %v3014_v54 = vld [vmem:[#allocation33 + $0x38] sm:$0xff] }
 0x20a   :  { %2588 = vperm.xlu1 %3937, %v2550_v40   ;;  %v4952_v34 = vpop.permute.xlu0 %992  ;;  %v3955_v40 = vld [vmem:[#allocation6 + $0x8] sm:$0xff]  }
 0x20b   :  { %3625 = vmatpush3.bf16.msra.mxu1 %v689_v22  ;;  %5465 = vst [vmem:[#allocation45_spill] sm:$0xff] %v4952_v34  ;;  %v684_v22 = vpack.c.bf16 %v654_v5, %v653_v16  ;;  %v683_v55 = vpack.c.bf16 %v652_v27, %v651_v11  ;;  %v3961_v27 = vld [vmem:[#allocation6 + $0x38] sm:$0xff]  }
 0x20c   :  { %3626 = vmatprep.subr.bf16.mxu1 %v688_v32  ;;  %v4946_v12 = vpop.permute.xlu1 %724 }
 0x20d   :  { %2573 = vperm.xlu0 %3936, %v2547_v41  }
 0x20e   :  { %2578 = vperm.xlu1 %3937, %v2548_v37   ;;  %v4956_v9 = vpop.permute.xlu0 %709  ;;  %v3010_v37 = vld [vmem:[#allocation33 + $0x18] sm:$0xff] }
 0x20f   :  { %3627 = vmatpush3.bf16.msra.mxu1 %v688_v32  ;;  %5466 = vst [vmem:[#allocation46_spill] sm:$0xff] %v4956_v9  ;;  %v2850_v32 = vld [vmem:[#allocation30] sm:$0xff] }
 0x210   :  { %3628 = vmatprep.subr.bf16.mxu1 %v687_v50  ;;  %v4954_v28 = vpop.permute.xlu1 %997 }
 0x211   :  { %2563 = vperm.xlu0 %3936, %v2545_v2  }
 0x212   :  { %2568 = vperm.xlu1 %3937, %v2546_v38   ;;  %v4960_v41 = vpop.permute.xlu0 %982  ;;  %v3013_v38 = vld [vmem:[#allocation33 + $0x30] sm:$0xff] }
 0x213   :  { %3629 = vmatpush3.bf16.msra.mxu1 %v687_v50  ;;  %5467 = vst [vmem:[#allocation47_spill] sm:$0xff] %v4960_v41  ;;  %v3009_v50 = vld [vmem:[#allocation33 + $0x10] sm:$0xff] }
 0x214   :  { %3630 = vmatprep.subr.bf16.mxu1 %v686_v0  ;;  %v4958_v39 = vpop.permute.xlu1 %714 }
 0x215   :  { %2890 = vperm.xlu0 %3936, %v2856_v18   ;;  %v3959_v18 = vld [vmem:[#allocation6 + $0x28] sm:$0xff]  }
 0x216   :  { %2895 = vperm.xlu1 %3937, %v2857_v49   ;;  %v4964_v2 = vpop.permute.xlu0 %1365  ;;  %v3169_v49 = vld [vmem:[%s5427_s24 + $0x8] sm:$0xff] }
 0x217   :  { %3631 = vmatpush3.bf16.msra.mxu1 %v686_v0  ;;  %5469 = vst [vmem:[#allocation49_spill] sm:$0xff] %v4964_v2  ;;  %v3011_v0 = vld [vmem:[#allocation33 + $0x20] sm:$0xff] }
 0x218   :  { %3632 = vmatprep.subr.bf16.mxu1 %v685_v20  ;;  %v4962_v60 = vpop.permute.xlu1 %987 }
 0x219   :  { %2880 = vperm.xlu0 %3936, %v2854_v4   ;;  %5468 = vst [vmem:[#allocation48_spill] sm:$0xff] %v4962_v60  ;;  %v3170_v4 = vld [vmem:[%s5427_s24 + $0x10] sm:$0xff] }
 0x21a   :  { %2885 = vperm.xlu1 %3937, %v2855_v6   ;;  %v4968_v63 = vpop.permute.xlu0 %1355  ;;  %v3172_v6 = vld [vmem:[%s5427_s24 + $0x20] sm:$0xff] }
 0x21b   :  { %3633 = vmatpush3.bf16.msra.mxu1 %v685_v20  ;;  %5471 = vst [vmem:[#allocation51_spill] sm:$0xff] %v4968_v63  ;;  %v3168_v20 = vld [vmem:[%s5427_s24] sm:$0xff] }
 0x21c   :  { %3634 = vmatprep.subr.bf16.mxu1 %v684_v22  ;;  %v4966_v1 = vpop.permute.xlu1 %1370 }
 0x21d   :  { %2870 = vperm.xlu0 %3936, %v2852_v45   ;;  %5470 = vst [vmem:[#allocation50_spill] sm:$0xff] %v4966_v1  ;;  %v3173_v45 = vld [vmem:[%s5427_s24 + $0x28] sm:$0xff] }
 0x21e   :  { %2875 = vperm.xlu1 %3937, %v2853_v17   ;;  %v4978_v16 = vpop.permute.xlu0 %1345  ;;  %v3174_v17 = vld [vmem:[%s5427_s24 + $0x30] sm:$0xff] }
 0x21f   :  { %3635 = vmatpush3.bf16.msra.mxu1 %v684_v22  ;;  %5473 = vst [vmem:[#allocation53_spill] sm:$0xff] %v4978_v16  ;;  %v3171_v22 = vld [vmem:[%s5427_s24 + $0x18] sm:$0xff] }
 0x220   :  { %3636 = vmatprep.subr.bf16.mxu1 %v683_v55  ;;  %v4970_v5 = vpop.permute.xlu1 %1360 }
 0x221   :  { %2860 = vperm.xlu0 %3936, %v2850_v32   ;;  %5472 = vst [vmem:[#allocation52_spill] sm:$0xff] %v4970_v5  ;;  %v3175_v32 = vld [vmem:[%s5427_s24 + $0x38] sm:$0xff] }
 0x222   :  { %2865 = vperm.xlu1 %3937, %v2851_v33   ;;  %v4991_v11 = vpop.permute.xlu0 %1335 }
 0x223   :  { %3637 = vmatpush3.bf16.msra.mxu1 %v683_v55  ;;  %5475 = vst [vmem:[#allocation55_spill] sm:$0xff] %v4991_v11 }
 0x224   :  { %v4980_v44 = vpop.permute.xlu1 %1350 }
 0x225   :  { %3017 = vperm.xlu0 %3936, %v3007_v7   ;;  %5474 = vst [vmem:[#allocation54_spill] sm:$0xff] %v4980_v44  ;;  %v5008_v7 = vpop.f32.mrf.mxu0 }
 0x226   :  { %3639 = vmatmul.mubr.bf16.vlgmr.msra.gmra.mxu1 %v3955_v40  ;;  %3022 = vperm.xlu1 %3937, %v3008_v59   ;;  %v5004_v33 = vpop.permute.xlu0 %1325  ;;  %5479 = vst [vmem:[#allocation59_spill] sm:$0xff] %v5008_v7 }
 0x227   :  { %3642 = vmatprep.mubr.bf16.mxu1 %v3956_v53  ;;  %5477 = vst [vmem:[#allocation57_spill] sm:$0xff] %v5004_v33  ;;  %v3962_v53 = vld [vmem:[#allocation12] sm:$0xff]   ;;  %v5010_v59 = vpop.f32.mrf.mxu0 }
 0x228   :  { %v4996_v55 = vpop.permute.xlu1 %1340  ;;  %5480 = vst [vmem:[#allocation60_spill] sm:$0xff] %v5010_v59 }
 0x229   :  { %3027 = vperm.xlu0 %3936, %v3009_v50   ;;  %5476 = vst [vmem:[#allocation56_spill] sm:$0xff] %v4996_v55  ;;  %v5012_v50 = vpop.f32.mrf.mxu0 }
 0x22a   :  { %3032 = vperm.xlu1 %3937, %v3010_v37   ;;  %5481 = vst [vmem:[#allocation61_spill] sm:$0xff] %v5012_v50 }
 0x22b   :  { %v5014_v37 = vpop.f32.mrf.mxu0 }
 0x22c   :  { %v5006_v40 = vpop.permute.xlu1 %1330  ;;  %5482 = vst [vmem:[#allocation62_spill] sm:$0xff] %v5014_v37 }
 0x22d   :  { %3037 = vperm.xlu0 %3936, %v3011_v0   ;;  %5478 = vst [vmem:[#allocation58_spill] sm:$0xff] %v5006_v40 }
 0x22e   :  { %3643 = vmatmul.mubr.bf16.gmra.mxu1 %v3957_v52  ;;  %3042 = vperm.xlu1 %3937, %v3012_v3   ;;  %v5016_v52 = vpop.f32.mrf.mxu0 }
 0x22f   :  { %3646 = vmatprep.mubr.bf16.mxu1 %v3958_v57 }
 0x230   :  { %v5018_v57 = vpop.f32.mrf.mxu0 }
 0x231   :  { %3047 = vperm.xlu0 %3936, %v3013_v38  }
 0x232   :  { %3052 = vperm.xlu1 %3937, %v3014_v54   ;;  %v5020_v0 = vpop.f32.mrf.mxu0 }
 0x234   :  { %v5022_v3 = vpop.f32.mrf.mxu0 }
 0x235   :  { %3178 = vperm.xlu0 %3936, %v3168_v20  }
 0x236   :  { %3647 = vmatmul.mubr.bf16.gmra.mxu1 %v3959_v18  ;;  %3183 = vperm.xlu1 %3937, %v3169_v49   ;;  %v3672_v54 = vpop.f32.mrf.mxu0 }
 0x237   :  { %3650 = vmatprep.mubr.bf16.mxu1 %v3960_v43 }
 0x238   :  { %v1190_v20 = vpop.f32.mrf.mxu0 }
 0x239   :  { %3188 = vperm.xlu0 %3936, %v3170_v4  }
 0x23a   :  { %3193 = vperm.xlu1 %3937, %v3171_v22   ;;  %v3673_v22 = vpop.f32.mrf.mxu0 }
 0x23d   :  { %3198 = vperm.xlu0 %3936, %v3172_v6  }
 0x23e   :  { %3651 = vmatmul.mubr.bf16.gmra.mxu1 %v3961_v27  ;;  %3203 = vperm.xlu1 %3937, %v3173_v45   ;;  %v1193_v45 = vpop.f32.mrf.mxu0 }
 0x23f   :  { %3694 = vmatprep.mubr.bf16.mxu1 %v3962_v53 }
 0x240   :  { %v3676_v53 = vpop.f32.mrf.mxu0 }
 0x241   :  { %3208 = vperm.xlu0 %3936, %v3174_v17   ;;  %v1215_v60 = vadd.f32 %v3676_v53, %v4816_v19  ;;  %v5485_v53 = vld [vmem:[#allocation46_spill] sm:$0xff] }
 0x242   :  { %3213 = vperm.xlu1 %3937, %v3175_v32   ;;  %v1206_v11 = vpop.f32.mrf.mxu0 }
 0x243   :  { %v1207_v9 = vadd.f32 %v1206_v11, %v4824_v29  ;;  %v1191_v11 = vadd.f32 %v1190_v20, %v4859_v10 }
 0x244   :  { %v3677_v5 = vpop.f32.mrf.mxu0 }
 0x245   :  { %v1218_v50 = vadd.f32 %v3677_v5, %v4818_v21 }
 0x246   :  { %v1209_v7 = vpop.f32.mrf.mxu0 }
 0x247   :  { %v1210_v19 = vadd.f32 %v1209_v7, %v4826_v31 }
 0x2e6   :  { %v5024_v38 = vpop.f32.mrf.mxu1 }
 0x2e8   :  { %v5026_v18 = vpop.f32.mrf.mxu1 }
 0x2e9   :  { %5483 = vst [vmem:[#allocation63_spill] sm:$0xff] %v5026_v18 }
 0x2ea   :  { %v5028_v43 = vpop.f32.mrf.mxu1 }
 0x2eb   :  { %v881_v20 = vadd.f32 %v5028_v43, %v4946_v12 }
 0x2ec   :  { %v5030_v49 = vpop.f32.mrf.mxu1 }
 0x2ee   :  { %v3644_v4 = vpop.f32.mrf.mxu1 }
 0x2f0   :  { %v885_v27 = vpop.f32.mrf.mxu1 }
 0x2f1   :  { %v886_v10 = vadd.f32 %v885_v27, %v4905_v48  ;;  %v1175_v27 = vadd.f32 %v5018_v57, %v4923_v46  ;;  %v5486_v46 = vld [vmem:[#allocation63_spill] sm:$0xff] }
 0x2f2   :  { %v3645_v6 = vpop.f32.mrf.mxu1  ;;  %v870_v57 = vadd.f32 %v5486_v46, %v5485_v53 }
 0x2f3   :  { %v936_v12 = vmax.f32 %v886_v10, 0.0 }
 0x2f4   :  { %v888_v17 = vpop.f32.mrf.mxu1 }
 0x2f6   :  { %v3648_v32 = vpop.f32.mrf.mxu1 }
 0x2f7   :  { %v910_v41 = vadd.f32 %v3648_v32, %v4830_v35 }
 0x2f8   :  { %v901_v33 = vpop.f32.mrf.mxu1 }
 0x2fa   :  { %v3649_v40 = vpop.f32.mrf.mxu1 }
 0x2fb   :  { %v913_v1 = vadd.f32 %v3649_v40, %v4832_v36  ;;  %v942_v40 = vmax.f32 %v910_v41, 0.0 }
 0x2fc   :  { %v904_v55 = vpop.f32.mrf.mxu1 }
 0x2fd   :  { %v905_v36 = vadd.f32 %v904_v55, %v4852_v62  ;;  %v897_v62 = vadd.f32 %v3645_v6, %v4874_v26  ;;  %v935_v6 = vmax.f32 %v881_v20, 0.0  ;;  %v3964_v20 = vld [vmem:[#allocation12 + $0x10] sm:$0xff]  }
 0x2fe   :  { %v3652_v16 = vpop.f32.mrf.mxu1 }
 0x2ff   :  { %v926_v44 = vadd.f32 %v3652_v16, %v4812_v14  ;;  %v943_v14 = vmax.f32 %v913_v1, 0.0  ;;  %v1199_v1 = vadd.f32 %v3672_v54, %v4840_v47  ;;  %v939_v55 = vmax.f32 %v897_v62, 0.0 }
 0x300   :  { %v917_v63 = vpop.f32.mrf.mxu1 }
 0x301   :  { %v946_v2 = vmax.f32 %v926_v44, 0.0  ;;  %v918_v59 = vadd.f32 %v917_v63, %v4820_v24  ;;  %v1202_v63 = vadd.f32 %v3673_v22, %v4842_v51 }
 0x302   :  { %v3653_v37 = vpop.f32.mrf.mxu1 }
 0x303   :  { %v944_v34 = vmax.f32 %v918_v59, 0.0  ;;  %v929_v18 = vadd.f32 %v3653_v37, %v4814_v15  ;;  %v5041_v44 = vadd.f32 %v1215_v60, %v946_v2  ;;  %v902_v15 = vadd.f32 %v901_v33, %v4850_v61 }
 0x304   :  { %v920_v16 = vpop.f32.mrf.mxu1  ;;  %v5053_v60 = vadd.f32 %v1202_v63, %v943_v14  ;;  %v941_v2 = vmax.f32 %v905_v36, 0.0  ;;  %v1194_v61 = vadd.f32 %v1193_v45, %v4864_v13  ;;  %v889_v33 = vadd.f32 %v888_v17, %v4908_v30 }
 0x305   :  { %v947_v24 = vmax.f32 %v929_v18, 0.0  ;;  %v921_v35 = vadd.f32 %v920_v16, %v4822_v25  ;;  %v5047_v59 = vadd.f32 %v1207_v9, %v944_v34  ;;  %v1251_v25 = vmax.f32 %v5041_v44, 0.0  ;;  %v5488_v16 = vld [vmem:[#allocation59_spill] sm:$0xff] }
 0x306   :  { %v894_v34 = vadd.f32 %v3644_v4, %v4872_v23  ;;  %v5061_v9 = vadd.f32 %v1199_v1, %v942_v40  ;;  %v940_v41 = vmax.f32 %v902_v15, 0.0  ;;  %v1248_v13 = vmax.f32 %v5053_v60, 0.0  ;;  %v5490_v40 = vld [vmem:[#allocation62_spill] sm:$0xff] }
 0x307   :  { %v5049_v29 = vadd.f32 %v1218_v50, %v947_v24  ;;  %v945_v21 = vmax.f32 %v921_v35, 0.0  ;;  %v1249_v47 = vmax.f32 %v5047_v59, 0.0  ;;  %v5072_v23 = vadd.f32 %v1194_v61, %v941_v2  ;;  %v5491_v2 = vld [vmem:[#allocation47_spill] sm:$0xff]  ;;  %v5492_v61 = vld [vmem:[#allocation60_spill] sm:$0xff] }
 0x308   :  { %v1186_v50 = vadd.f32 %v5020_v0, %v4895_v42  ;;  %v938_v37 = vmax.f32 %v894_v34, 0.0  ;;  %v1247_v54 = vmax.f32 %v5061_v9, 0.0  ;;  %v5082_v30 = vadd.f32 %v1191_v11, %v940_v41 }
 0x309   :  { %v1252_v51 = vmax.f32 %v5049_v29, 0.0  ;;  %v5057_v31 = vadd.f32 %v1210_v19, %v945_v21  ;;  %v1183_v18 = vadd.f32 %v5016_v52, %v4888_v56  ;;  %v937_v22 = vmax.f32 %v889_v33, 0.0  ;;  %v5489_v19 = vld [vmem:[#allocation48_spill] sm:$0xff] }
 0x30a   :  { %v5088_v4 = vadd.f32 %v1186_v50, %v939_v55  ;;  %v1246_v42 = vmax.f32 %v5072_v23, 0.0  ;;  %v1274_v48 = vpack.c.bf16 %v1248_v13, %v1247_v54  ;;  %v1178_v0 = vadd.f32 %v5022_v3, %v4930_v58  ;;  %v5484_v3 = vld [vmem:[#allocation61_spill] sm:$0xff] }
 0x30b   :  { %v1250_v26 = vmax.f32 %v5057_v31, 0.0  ;;  %v1276_v5 = vpack.c.bf16 %v1252_v51, %v1251_v25  ;;  %v878_v56 = vadd.f32 %v5024_v38, %v4942_v8  ;;  %v5099_v52 = vadd.f32 %v1183_v18, %v938_v37  ;;  %v3963_v18 = vld [vmem:[#allocation12 + $0x8] sm:$0xff]  }
 0x30c   :  { %v1245_v43 = vmax.f32 %v5082_v30, 0.0  ;;  %v873_v45 = vadd.f32 %v5030_v49, %v4958_v39  ;;  %v1244_v17 = vmax.f32 %v5088_v4, 0.0  ;;  %v5107_v58 = vadd.f32 %v1178_v0, %v937_v22  ;;  %v5487_v49 = vld [vmem:[#allocation45_spill] sm:$0xff]  ;;  %v3965_v22 = vld [vmem:[#allocation12 + $0x18] sm:$0xff]   ;;  %v3967_v0 = vld [vmem:[#allocation12 + $0x28] sm:$0xff]  }
 0x30d   :  { %3678 = vmatprep.subr.bf16.mxu1 %v1276_v5  ;;  %v1275_v7 = vpack.c.bf16 %v1250_v26, %v1249_v47  ;;  %v1170_v38 = vadd.f32 %v5484_v3, %v4954_v28  ;;  %v934_v32 = vmax.f32 %v878_v56, 0.0  ;;  %v5436_v14 = vmax.f32 %v5099_v52, 0.0  ;;  %v3968_v56 = vld [vmem:[#allocation12 + $0x30] sm:$0xff]  }
 0x30e   :  { %3679 = vmatpush3.bf16.msra.mxu1 %v1276_v5  ;;  %v1273_v8 = vpack.c.bf16 %v1246_v42, %v1245_v43  ;;  %v5118_v39 = vadd.f32 %v1175_v27, %v936_v12  ;;  %v1167_v36 = vadd.f32 %v5488_v16, %v5487_v49  ;;  %v933_v35 = vmax.f32 %v873_v45, 0.0  ;;  %v3969_v12 = vld [vmem:[#allocation12 + $0x38] sm:$0xff]   ;;  %v3970_v27 = vld [vmem:[#allocation15] sm:$0xff]  }
 0x30f   :  { %3680 = vmatprep.subr.bf16.mxu1 %v1275_v7  ;;  %v5122_v24 = vadd.f32 %v1170_v38, %v935_v6  ;;  %v5435_v63 = vmax.f32 %v5107_v58, 0.0  ;;  %v1272_v28 = vpack.c.bf16 %v1244_v17, %v5436_v14  ;;  %v1162_v15 = vadd.f32 %v5490_v40, %v5489_v19  ;;  %3726 = vmatprep.mubr.bf16.mxu0 %v3970_v27  ;;  %v5493_v19 = vld [vmem:[#allocation49_spill] sm:$0xff] }
 0x310   :  { %v5131_v21 = vadd.f32 %v1167_v36, %v934_v32  ;;  %v932_v1 = vmax.f32 %v870_v57, 0.0  ;;  %v5434_v62 = vmax.f32 %v5118_v39, 0.0  ;;  %v1159_v34 = vadd.f32 %v5492_v61, %v5491_v2  ;;  %v5495_v61 = vld [vmem:[#allocation50_spill] sm:$0xff] }
 0x311   :  { %v5433_v41 = vmax.f32 %v5122_v24, 0.0  ;;  %v5137_v5 = vadd.f32 %v1162_v15, %v933_v35  ;;  %v5504_v4 = vmax.f32 %v5107_v58, 0.0 }
 0x312   :  { %3681 = vmatpush3.bf16.msra.mxu1 %v1275_v7  ;;  %v1271_v11 = vpack.c.bf16 %v5435_v63, %v5434_v62  ;;  %v5432_v55 = vmax.f32 %v5131_v21, 0.0  ;;  %v5144_v33 = vadd.f32 %v1159_v34, %v932_v1  ;;  %v5494_v1 = vld [vmem:[#allocation51_spill] sm:$0xff]  ;;  %v5507_v58 = vmax.f32 %v5131_v21, 0.0 }
 0x313   :  { %3682 = vmatprep.subr.bf16.mxu1 %v1274_v48  ;;  %v5431_v7 = vmax.f32 %v5137_v5, 0.0 }
 0x314   :  { %v1270_v50 = vpack.c.bf16 %v5433_v41, %v5432_v55  ;;  %v5430_v37 = vmax.f32 %v5144_v33, 0.0  ;;  %v5499_v55 = vld [vmem:[#allocation56_spill] sm:$0xff] }
 0x316   :  { %3683 = vmatpush3.bf16.msra.mxu1 %v1274_v48  ;;  %v1269_v10 = vpack.c.bf16 %v5431_v7, %v5430_v37  ;;  %v3966_v48 = vld [vmem:[#allocation12 + $0x20] sm:$0xff]  }
 0x317   :  { %3684 = vmatprep.subr.bf16.mxu1 %v1273_v8 }
 0x31a   :  { %3685 = vmatpush3.bf16.msra.mxu1 %v1273_v8 }
 0x31b   :  { %3686 = vmatprep.subr.bf16.mxu1 %v1272_v28 }
 0x31e   :  { %3687 = vmatpush3.bf16.msra.mxu1 %v1272_v28 }
 0x31f   :  { %3688 = vmatprep.subr.bf16.mxu1 %v1271_v11 }
 0x322   :  { %3689 = vmatpush3.bf16.msra.mxu1 %v1271_v11 }
 0x323   :  { %3690 = vmatprep.subr.bf16.mxu1 %v1270_v50 }
 0x326   :  { %3691 = vmatpush3.bf16.msra.mxu1 %v1270_v50  ;;  %v5496_v50 = vld [vmem:[#allocation54_spill] sm:$0xff] }
 0x327   :  { %3692 = vmatprep.subr.bf16.mxu1 %v1269_v10 }
 0x32a   :  { %3693 = vmatpush3.bf16.msra.mxu1 %v1269_v10 }
 0x32d   :  { %3695 = vmatmul.mubr.bf16.vlgmr.msra.gmra.mxu1 %v3963_v18 }
 0x32e   :  { %3698 = vmatprep.mubr.bf16.mxu1 %v3964_v20 }
 0x335   :  { %3699 = vmatmul.mubr.bf16.gmra.mxu1 %v3965_v22  ;;  %v5497_v22 = vld [vmem:[#allocation52_spill] sm:$0xff] }
 0x336   :  { %3702 = vmatprep.mubr.bf16.mxu1 %v3966_v48 }
 0x33d   :  { %3703 = vmatmul.mubr.bf16.gmra.mxu1 %v3967_v0  ;;  %v5498_v0 = vld [vmem:[#allocation53_spill] sm:$0xff] }
 0x33e   :  { %3706 = vmatprep.mubr.bf16.mxu1 %v3968_v56 }
 0x345   :  { %3707 = vmatmul.mubr.bf16.gmra.mxu1 %v3969_v12 }
 0x3ed   :  { %v3696_v6 = vpop.f32.mrf.mxu1 }
 0x3ef   :  { %v5156_v45 = vpop.f32.mrf.mxu1 }
 0x3f1   :  { %v3697_v8 = vpop.f32.mrf.mxu1 }
 0x3f3   :  { %v1458_v3 = vpop.f32.mrf.mxu1 }
 0x3f5   :  { %v3700_v38 = vpop.f32.mrf.mxu1 }
 0x3f7   :  { %v1471_v32 = vpop.f32.mrf.mxu1 }
 0x3f9   :  { %v3701_v53 = vpop.f32.mrf.mxu1 }
 0x3fb   :  { %v1474_v46 = vpop.f32.mrf.mxu1 }
 0x3fd   :  { %v3704_v57 = vpop.f32.mrf.mxu1 }
 0x3fe   :  { %v1496_v56 = vadd.f32 %v3704_v57, %v5498_v0  ;;  %v5502_v57 = vld [vmem:[#allocation57_spill] sm:$0xff] }
 0x3ff   :  { %v1487_v49 = vpop.f32.mrf.mxu1 }
 0x401   :  { %v3705_v16 = vpop.f32.mrf.mxu1 }
 0x402   :  { %v1499_v10 = vadd.f32 %v3705_v16, %v5496_v50  ;;  %v1321_v16 = vpop.permute.xlu1 %1320  ;;  %v1316_v50 = vpop.permute.xlu0 %1315 }
 0x403   :  { %v1490_v36 = vpop.f32.mrf.mxu1 }
 0x404   :  { %v1529_v7 = vmax.f32 %v1499_v10, 0.0 }
 0x405   :  { %v3708_v35 = vpop.f32.mrf.mxu1 }
 0x406   :  { %v1512_v40 = vadd.f32 %v3708_v35, %v5493_v19  ;;  %v1491_v35 = vadd.f32 %v1490_v36, %v5499_v55  ;;  %v1475_v55 = vadd.f32 %v1474_v46, %v1321_v16  ;;  %v1311_v36 = vpop.permute.xlu1 %1310  ;;  %v3972_v16 = vld [vmem:[#allocation15 + $0x10] sm:$0xff]  }
 0x407   :  { %v1503_v28 = vpop.f32.mrf.mxu1 }
 0x408   :  { %v1504_v2 = vadd.f32 %v1503_v28, %v5494_v1  ;;  %v1532_v18 = vmax.f32 %v1512_v40, 0.0  ;;  %v1528_v28 = vmax.f32 %v1496_v56, 0.0  ;;  %v5501_v40 = vld [vmem:[#allocation58_spill] sm:$0xff] }
 0x409   :  { %v3709_v15 = vpop.f32.mrf.mxu1 }
 0x40a   :  { %v1515_v34 = vadd.f32 %v3709_v15, %v5495_v61  ;;  %v1530_v12 = vmax.f32 %v1504_v2, 0.0  ;;  %v5500_v15 = vld [vmem:[#allocation55_spill] sm:$0xff]  ;;  %v1483_v61 = vadd.f32 %v3701_v53, %v5501_v40  ;;  %v1480_v2 = vadd.f32 %v3700_v38, %v5502_v57 }
 0x40b   :  { %v1506_v11 = vpop.f32.mrf.mxu1  ;;  %v1488_v1 = vadd.f32 %v1487_v49, %v5500_v15  ;;  %v1306_v49 = vpop.permute.xlu0 %1305  ;;  %v1523_v53 = vmax.f32 %v1475_v55, 0.0  ;;  %v3974_v40 = vld [vmem:[#allocation15 + $0x20] sm:$0xff]  }
 0x40c   :  { %v1533_v20 = vmax.f32 %v1515_v34, 0.0  ;;  %v1507_v48 = vadd.f32 %v1506_v11, %v5497_v22  ;;  %v1555_v34 = vpack.c.bf16 %v1529_v7, %v1528_v28  ;;  %v1527_v11 = vmax.f32 %v1491_v35, 0.0 }
 0x40d   :  { %v1525_v10 = vmax.f32 %v1483_v61, 0.0  ;;  %v1472_v22 = vadd.f32 %v1471_v32, %v1316_v50  ;;  %v1464_v7 = vadd.f32 %v3696_v6, %v1306_v49  ;;  %v3971_v6 = vld [vmem:[#allocation15 + $0x8] sm:$0xff]  }
 0x40e   :  { %v1557_v27 = vpack.c.bf16 %v1533_v20, %v1532_v18  ;;  %v1531_v37 = vmax.f32 %v1507_v48, 0.0  ;;  %v1526_v18 = vmax.f32 %v1488_v1, 0.0  ;;  %v1524_v20 = vmax.f32 %v1480_v2, 0.0  ;;  %v3975_v61 = vld [vmem:[#allocation15 + $0x28] sm:$0xff]  }
 0x40f   :  { %v1467_v48 = vadd.f32 %v3697_v8, %v1311_v36  ;;  %v1522_v56 = vmax.f32 %v1472_v22, 0.0  ;;  %v1520_v46 = vmax.f32 %v1464_v7, 0.0 }
 0x410   :  { %v1556_v19 = vpack.c.bf16 %v1531_v37, %v1530_v12  ;;  %3710 = vmatprep.subr.bf16.mxu0 %v1557_v27  ;;  %v1554_v37 = vpack.c.bf16 %v1527_v11, %v1526_v18  ;;  %v1553_v0 = vpack.c.bf16 %v1525_v10, %v1524_v20  ;;  %v1301_v12 = vpop.permute.xlu1 %1300  ;;  %v3978_v11 = vld [vmem:[#allocation18] sm:$0xff]  }
 0x411   :  { %3711 = vmatpush3.bf16.msra.mxu0 %v1557_v27  ;;  %v1521_v38 = vmax.f32 %v1467_v48, 0.0  ;;  %v1459_v27 = vadd.f32 %v1458_v3, %v1301_v12  ;;  %v1552_v35 = vpack.c.bf16 %v1523_v53, %v1522_v56  ;;  %v3973_v3 = vld [vmem:[#allocation15 + $0x18] sm:$0xff]   ;;  %3758 = vmatprep.mubr.bf16.mxu1 %v3978_v11 }
 0x412   :  { %3712 = vmatprep.subr.bf16.mxu0 %v1556_v19 }
 0x413   :  { %v1551_v32 = vpack.c.bf16 %v1521_v38, %v1520_v46  ;;  %v1519_v15 = vmax.f32 %v1459_v27, 0.0 }
 0x414   :  { %v1652_v2 = vpop.permute.xlu1 %1651 }
 0x415   :  { %3713 = vmatpush3.bf16.msra.mxu0 %v1556_v19  ;;  %v1296_v19 = vpop.permute.xlu0 %1295 }
 0x416   :  { %3714 = vmatprep.subr.bf16.mxu0 %v1555_v34  ;;  %v1456_v28 = vadd.f32 %v5156_v45, %v1296_v19  ;;  %v3976_v45 = vld [vmem:[#allocation15 + $0x30] sm:$0xff]  }
 0x418   :  { %v1518_v8 = vmax.f32 %v1456_v28, 0.0  ;;  %v1642_v36 = vpop.permute.xlu1 %1641 }
 0x419   :  { %3715 = vmatpush3.bf16.msra.mxu0 %v1555_v34  ;;  %v3977_v34 = vld [vmem:[#allocation15 + $0x38] sm:$0xff]   ;;  %v1647_v10 = vpop.permute.xlu0 %1646 }
 0x41a   :  { %3716 = vmatprep.subr.bf16.mxu0 %v1554_v37  ;;  %v1550_v1 = vpack.c.bf16 %v1519_v15, %v1518_v8 }
 0x41d   :  { %3717 = vmatpush3.bf16.msra.mxu0 %v1554_v37  ;;  %v1637_v22 = vpop.permute.xlu0 %1636 }
 0x41e   :  { %3718 = vmatprep.subr.bf16.mxu0 %v1553_v0 }
 0x421   :  { %3719 = vmatpush3.bf16.msra.mxu0 %v1553_v0  ;;  %v1632_v0 = vpop.permute.xlu1 %1631  ;;  %v1627_v7 = vpop.permute.xlu0 %1626 }
 0x422   :  { %3720 = vmatprep.subr.bf16.mxu0 %v1552_v35 }
 0x425   :  { %3721 = vmatpush3.bf16.msra.mxu0 %v1552_v35  ;;  %v1622_v38 = vpop.permute.xlu1 %1621  ;;  %v1617_v35 = vpop.permute.xlu0 %1616 }
 0x426   :  { %3722 = vmatprep.subr.bf16.mxu0 %v1551_v32 }
 0x429   :  { %3723 = vmatpush3.bf16.msra.mxu0 %v1551_v32 }
 0x42a   :  { %3724 = vmatprep.subr.bf16.mxu0 %v1550_v1 }
 0x42d   :  { %3725 = vmatpush3.bf16.msra.mxu0 %v1550_v1  ;;  %v1612_v1 = vpop.permute.xlu1 %1611 }
 0x430   :  { %3727 = vmatmul.mubr.bf16.vlgmr.msra.gmra.mxu0 %v3971_v6 }
 0x431   :  { %3730 = vmatprep.mubr.bf16.mxu0 %v3972_v16 }
 0x438   :  { %3731 = vmatmul.mubr.bf16.gmra.mxu0 %v3973_v3 }
 0x439   :  { %3734 = vmatprep.mubr.bf16.mxu0 %v3974_v40 }
 0x440   :  { %3735 = vmatmul.mubr.bf16.gmra.mxu0 %v3975_v61  ;;  %v1607_v61 = vpop.permute.xlu0 %1606 }
 0x441   :  { %3738 = vmatprep.mubr.bf16.mxu0 %v3976_v45 }
 0x448   :  { %3739 = vmatmul.mubr.bf16.gmra.mxu0 %v3977_v34 }
 0x4f0   :  { %v5169_v50 = vpop.f32.mrf.mxu0 }
 0x4f2   :  { %v5171_v57 = vpop.f32.mrf.mxu0 }
 0x4f4   :  { %v5173_v18 = vpop.f32.mrf.mxu0 }
 0x4f6   :  { %v5175_v55 = vpop.f32.mrf.mxu0 }
 0x4f8   :  { %v3732_v37 = vpop.f32.mrf.mxu0 }
 0x4fa   :  { %v1752_v20 = vpop.f32.mrf.mxu0 }
 0x4fc   :  { %v3733_v49 = vpop.f32.mrf.mxu0 }
 0x4fe   :  { %v1755_v48 = vpop.f32.mrf.mxu0 }
 0x500   :  { %v3736_v53 = vpop.f32.mrf.mxu0 }
 0x501   :  { %v1777_v6 = vadd.f32 %v3736_v53, %v1627_v7  ;;  %v1602_v7 = vpop.permute.xlu1 %1601 }
 0x502   :  { %v1768_v56 = vpop.f32.mrf.mxu0 }
 0x503   :  { %v1809_v14 = vmax.f32 %v1777_v6, 0.0 }
 0x504   :  { %v3737_v12 = vpop.f32.mrf.mxu0 }
 0x505   :  { %v1780_v28 = vadd.f32 %v3737_v12, %v1632_v0  ;;  %v1825_v59 = vadd.f32 %v1809_v14, %v1247_v54 }
 0x506   :  { %v1771_v27 = vpop.f32.mrf.mxu0 }
 0x507   :  { %v1810_v45 = vmax.f32 %v1780_v28, 0.0  ;;  %v1772_v11 = vadd.f32 %v1771_v27, %v1622_v38  ;;  %v5503_v28 = vmax.f32 %v5099_v52, 0.0  ;;  %v5505_v52 = vmax.f32 %v5118_v39, 0.0 }
 0x508   :  { %v3740_v19 = vpop.f32.mrf.mxu0 }
 0x509   :  { %v1793_v46 = vadd.f32 %v3740_v19, %v1647_v10  ;;  %v1769_v10 = vadd.f32 %v1768_v56, %v1617_v35  ;;  %v1826_v12 = vadd.f32 %v1810_v45, %v1248_v13  ;;  %v1808_v38 = vmax.f32 %v1772_v11, 0.0 }
 0x50a   :  { %v1784_v32 = vpop.f32.mrf.mxu0  ;;  %v1761_v56 = vadd.f32 %v3732_v37, %v1607_v61  ;;  %v1841_v37 = vmax.f32 %v1825_v59, 0.0  ;;  %v5506_v61 = vmax.f32 %v5122_v24, 0.0  ;;  %v5509_v24 = vmax.f32 %v5144_v33, 0.0 }
 0x50b   :  { %v1813_v15 = vmax.f32 %v1793_v46, 0.0  ;;  %v1785_v8 = vadd.f32 %v1784_v32, %v1637_v22  ;;  %v1842_v35 = vmax.f32 %v1826_v12, 0.0  ;;  %v1824_v60 = vadd.f32 %v1808_v38, %v1246_v42 }
 0x50c   :  { %v3741_v16 = vpop.f32.mrf.mxu0  ;;  %v1805_v31 = vmax.f32 %v1761_v56, 0.0 }
 0x50d   :  { %v1811_v3 = vmax.f32 %v1785_v8, 0.0  ;;  %v1796_v40 = vadd.f32 %v3741_v16, %v1652_v2  ;;  %v1829_v41 = vadd.f32 %v1813_v15, %v1251_v25  ;;  %v1764_v2 = vadd.f32 %v3733_v49, %v1612_v1 }
 0x50e   :  { %v1787_v34 = vpop.f32.mrf.mxu0  ;;  %v1756_v49 = vadd.f32 %v1755_v48, %v1602_v7  ;;  %v1840_v23 = vmax.f32 %v1824_v60, 0.0  ;;  %v1856_v42 = vpack.c.bf16 %v1842_v35, %v1841_v37 }
 0x50f   :  { %v1814_v62 = vmax.f32 %v1796_v40, 0.0  ;;  %v1788_v63 = vadd.f32 %v1787_v34, %v1642_v36  ;;  %v1827_v0 = vadd.f32 %v1811_v3, %v1249_v47  ;;  %v1845_v27 = vmax.f32 %v1829_v41, 0.0  ;;  %v1597_v36 = vpop.permute.xlu0 %1596  ;;  %v1592_v41 = vpop.permute.xlu1 %1591 }
 0x510   :  { %v1807_v47 = vmax.f32 %v1769_v10, 0.0  ;;  %v1748_v14 = vadd.f32 %v5173_v18, %v1592_v41  ;;  %v1804_v19 = vmax.f32 %v1756_v49, 0.0 }
 0x511   :  { %v1830_v22 = vadd.f32 %v1814_v62, %v1252_v51  ;;  %v1812_v53 = vmax.f32 %v1788_v63, 0.0  ;;  %v1843_v29 = vmax.f32 %v1827_v0, 0.0  ;;  %v1806_v62 = vmax.f32 %v1764_v2, 0.0 }
 0x512   :  { %v1823_v9 = vadd.f32 %v1807_v47, %v1245_v43  ;;  %v1802_v43 = vmax.f32 %v1748_v14, 0.0  ;;  %v3982_v14 = vld [vmem:[#allocation21 + $0x10] sm:$0xff]  }
 0x513   :  { %v1846_v44 = vmax.f32 %v1830_v22, 0.0  ;;  %v1828_v25 = vadd.f32 %v1812_v53, %v1250_v26  ;;  %v1753_v26 = vadd.f32 %v1752_v20, %v1597_v36  ;;  %v1587_v54 = vpop.permute.xlu0 %1586  ;;  %v1822_v48 = vadd.f32 %v1806_v62, %v1244_v17  ;;  %v1582_v30 = vpop.permute.xlu1 %1581 }
 0x514   :  { %v1745_v46 = vadd.f32 %v5169_v50, %v1587_v54  ;;  %v1821_v20 = vadd.f32 %v1805_v31, %v5503_v28  ;;  %v1839_v15 = vmax.f32 %v1823_v9, 0.0  ;;  %v1740_v8 = vadd.f32 %v5175_v55, %v1582_v30  ;;  %v3981_v54 = vld [vmem:[#allocation21 + $0x8] sm:$0xff]   ;;  %v3988_v28 = vld [vmem:[#allocation24] sm:$0xff]  }
 0x515   :  { %v1844_v51 = vmax.f32 %v1828_v25, 0.0  ;;  %v1858_v63 = vpack.c.bf16 %v1846_v44, %v1845_v27  ;;  %v1803_v32 = vmax.f32 %v1753_v26, 0.0  ;;  %v1838_v18 = vmax.f32 %v1822_v48, 0.0  ;;  %v3979_v25 = vld [vmem:[#allocation18 + $0x8] sm:$0xff]   ;;  %3798 = vmatprep.mubr.bf16.mxu0 %v3988_v28 }
 0x516   :  { %v1820_v17 = vadd.f32 %v1804_v19, %v5504_v4  ;;  %v1855_v1 = vpack.c.bf16 %v1840_v23, %v1839_v15  ;;  %v1801_v16 = vmax.f32 %v1745_v46, 0.0  ;;  %v1837_v3 = vmax.f32 %v1821_v20, 0.0  ;;  %v3983_v48 = vld [vmem:[#allocation21 + $0x18] sm:$0xff]   ;;  %v3984_v19 = vld [vmem:[#allocation21 + $0x20] sm:$0xff]   ;;  %v3985_v23 = vld [vmem:[#allocation21 + $0x28] sm:$0xff]  }
 0x517   :  { %3742 = vmatprep.subr.bf16.mxu1 %v1858_v63  ;;  %v1857_v13 = vpack.c.bf16 %v1844_v51, %v1843_v29  ;;  %v1577_v6 = vpop.permute.xlu0 %1576  ;;  %v1819_v40 = vadd.f32 %v1803_v32, %v5505_v52  ;;  %v1818_v45 = vadd.f32 %v1802_v43, %v5506_v61  ;;  %v1800_v34 = vmax.f32 %v1740_v8, 0.0  ;;  %v1881_v56 = vpop.permute.xlu1 %1880  ;;  %v3987_v46 = vld [vmem:[#allocation21 + $0x38] sm:$0xff]  }
 0x518   :  { %3743 = vmatpush3.bf16.msra.mxu1 %v1858_v63  ;;  %v1737_v50 = vadd.f32 %v5171_v57, %v1577_v6  ;;  %v1836_v55 = vmax.f32 %v1820_v17, 0.0  ;;  %v1854_v11 = vpack.c.bf16 %v1838_v18, %v1837_v3  ;;  %v1817_v10 = vadd.f32 %v1801_v16, %v5507_v58 }
 0x519   :  { %3744 = vmatprep.subr.bf16.mxu1 %v1857_v13  ;;  %v1835_v22 = vmax.f32 %v1819_v40, 0.0  ;;  %v1834_v53 = vmax.f32 %v1818_v45, 0.0  ;;  %v5508_v57 = vmax.f32 %v5137_v5, 0.0  ;;  %v3980_v5 = vld [vmem:[#allocation21] sm:$0xff]  }
 0x51a   :  { %v1799_v0 = vmax.f32 %v1737_v50, 0.0  ;;  %v1833_v2 = vmax.f32 %v1817_v10, 0.0 }
 0x51b   :  { %v1816_v7 = vadd.f32 %v1800_v34, %v5508_v57  ;;  %v1853_v39 = vpack.c.bf16 %v1836_v55, %v1835_v22  ;;  %v1876_v36 = vpop.permute.xlu0 %1875  ;;  %v1871_v49 = vpop.permute.xlu1 %1870 }
 0x51c   :  { %3745 = vmatpush3.bf16.msra.mxu1 %v1857_v13  ;;  %v1815_v12 = vadd.f32 %v1799_v0, %v5509_v24  ;;  %v1852_v27 = vpack.c.bf16 %v1834_v53, %v1833_v2 }
 0x51d   :  { %3746 = vmatprep.subr.bf16.mxu1 %v1856_v42  ;;  %v1832_v38 = vmax.f32 %v1816_v7, 0.0 }
 0x51e   :  { %v1831_v44 = vmax.f32 %v1815_v12, 0.0 }
 0x51f   :  { %v1866_v29 = vpop.permute.xlu0 %1865  ;;  %v2060_v43 = vpop.permute.xlu1 %2059 }
 0x520   :  { %3747 = vmatpush3.bf16.msra.mxu1 %v1856_v42  ;;  %v1851_v21 = vpack.c.bf16 %v1832_v38, %v1831_v44  ;;  %v3986_v42 = vld [vmem:[#allocation21 + $0x30] sm:$0xff]  }
 0x521   :  { %3748 = vmatprep.subr.bf16.mxu1 %v1855_v1 }
 0x523   :  { %v2055_v18 = vpop.permute.xlu0 %2054 }
 0x524   :  { %3749 = vmatpush3.bf16.msra.mxu1 %v1855_v1  ;;  %v2050_v1 = vpop.permute.xlu1 %2049 }
 0x525   :  { %3750 = vmatprep.subr.bf16.mxu1 %v1854_v11 }
 0x527   :  { %v2045_v16 = vpop.permute.xlu0 %2044 }
 0x528   :  { %3751 = vmatpush3.bf16.msra.mxu1 %v1854_v11  ;;  %v2040_v52 = vpop.permute.xlu1 %2039 }
 0x529   :  { %3752 = vmatprep.subr.bf16.mxu1 %v1853_v39 }
 0x52b   :  { %v2035_v61 = vpop.permute.xlu0 %2034 }
 0x52c   :  { %3753 = vmatpush3.bf16.msra.mxu1 %v1853_v39  ;;  %v2030_v55 = vpop.permute.xlu1 %2029 }
 0x52d   :  { %3754 = vmatprep.subr.bf16.mxu1 %v1852_v27 }
 0x52f   :  { %v2025_v10 = vpop.permute.xlu0 %2024 }
 0x530   :  { %3755 = vmatpush3.bf16.msra.mxu1 %v1852_v27  ;;  %v2020_v12 = vpop.permute.xlu1 %2019 }
 0x531   :  { %3756 = vmatprep.subr.bf16.mxu1 %v1851_v21 }
 0x534   :  { %3757 = vmatpush3.bf16.msra.mxu1 %v1851_v21 }
 0x537   :  { %3759 = vmatmul.mubr.bf16.vlgmr.msra.gmra.mxu1 %v3979_v25  ;;  %v2015_v25 = vpop.permute.xlu0 %2014 }
 0x538   :  { %3766 = vmatprep.mubr.msk.bf16.mxu1 %vm2102_vm1, %v3980_v5 }
 0x5f7   :  { %v3760_v33 = vpop.f32.mrf.mxu1 }
 0x5f8   :  { %v1938_v47 = vadd.f32 %v3760_v33, %v1876_v36 }
 0x5f9   :  { %v1929_v59 = vpop.f32.mrf.mxu1 }
 0x5fa   :  { %v1930_v63 = vadd.f32 %v1929_v59, %v1866_v29  ;;  %v1946_v60 = vmax.f32 %v1938_v47, 0.0  ;;  %v2010_v47 = vpop.permute.xlu1 %2009 }
 0x5fb   :  { %v3761_v51 = vpop.f32.mrf.mxu1 }
 0x5fc   :  { %v1941_v62 = vadd.f32 %v3761_v51, %v1881_v56  ;;  %v1944_v31 = vmax.f32 %v1930_v63, 0.0 }
 0x5fd   :  { %v1932_v35 = vpop.f32.mrf.mxu1 }
 0x5fe   :  { %v1947_v13 = vmax.f32 %v1941_v62, 0.0  ;;  %v1933_v41 = vadd.f32 %v1932_v35, %v1871_v49  ;;  %v2005_v62 = vpop.permute.xlu0 %2004 }
 0x600   :  { %v1965_v26 = vpack.c.bf16 %v1947_v13, %v1946_v60  ;;  %v1945_v37 = vmax.f32 %v1933_v41, 0.0 }
 0x602   :  { %v1964_v9 = vpack.c.bf16 %v1945_v37, %v1944_v31  ;;  %3762 = vmatprep.subr.bf16.mxu1 %v1965_v26  ;;  %v2000_v31 = vpop.permute.xlu1 %1999 }
 0x603   :  { %3763 = vmatpush3.bf16.msra.mxu1 %v1965_v26 }
 0x604   :  { %3764 = vmatprep.subr.bf16.mxu1 %v1964_v9 }
 0x607   :  { %3765 = vmatpush3.bf16.msra.mxu1 %v1964_v9  ;;  %v1995_v9 = vpop.permute.xlu0 %1994 }
 0x60a   :  { %3767 = vmatmul.mubr.msk.bf16.vlgmr.msra.gmra.mxu1 %vm2102_vm1, %v3981_v54 }
 0x60b   :  { %3770 = vmatprep.mubr.msk.bf16.mxu1 %vm2102_vm1, %v3982_v14 }
 0x612   :  { %3771 = vmatmul.mubr.msk.bf16.gmra.mxu1 %vm2102_vm1, %v3983_v48 }
 0x613   :  { %3774 = vmatprep.mubr.msk.bf16.mxu1 %vm2102_vm1, %v3984_v19 }
 0x61a   :  { %3775 = vmatmul.mubr.msk.bf16.gmra.mxu1 %vm2102_vm1, %v3985_v23 }
 0x61b   :  { %3778 = vmatprep.mubr.msk.bf16.mxu1 %vm2102_vm1, %v3986_v42  ;;  %v1990_v42 = vpop.permute.xlu1 %1989 }
 0x622   :  { %3779 = vmatmul.mubr.msk.bf16.gmra.mxu1 %vm2102_vm1, %v3987_v46 }
 0x6ca   :  { %v5221_v20 = vpop.f32.mrf.mxu1 }
 0x6cb   :  { %v5285_v19 = vadd.f32 %v5221_v20, %v1995_v9 }
 0x6cc   :  { %v5223_v32 = vpop.f32.mrf.mxu1 }
 0x6ce   :  { %v3769_v15 = vpop.f32.mrf.mxu1 }
 0x6cf   :  { %v5277_v54 = vadd.f32 %v3769_v15, %v2000_v31 }
 0x6d0   :  { %v5225_v30 = vpop.f32.mrf.mxu1 }
 0x6d1   :  { %v5440_v46 = vmax.f32 %v5277_v54, 0.0  ;;  %v5290_v28 = vadd.f32 %v5225_v30, %v1990_v42 }
 0x6d2   :  { %v3772_v8 = vpop.f32.mrf.mxu1 }
 0x6d3   :  { %v5264_v49 = vadd.f32 %v3772_v8, %v2015_v25  ;;  %v5439_v8 = vmax.f32 %v5285_v19, 0.0  ;;  %v5438_v30 = vmax.f32 %v5290_v28, 0.0 }
 0x6d4   :  { %v2177_v4 = vpop.f32.mrf.mxu1 }
 0x6d5   :  { %v5443_v26 = vmax.f32 %v5264_v49, 0.0  ;;  %v5275_v37 = vadd.f32 %v2177_v4, %v2005_v62 }
 0x6d6   :  { %v3773_v17 = vpop.f32.mrf.mxu1 }
 0x6d7   :  { %v5257_v29 = vadd.f32 %v3773_v17, %v2020_v12  ;;  %v5441_v23 = vmax.f32 %v5275_v37, 0.0 }
 0x6d8   :  { %v2180_v6 = vpop.f32.mrf.mxu1 }
 0x6d9   :  { %v5444_v60 = vmax.f32 %v5257_v29, 0.0  ;;  %v5268_v13 = vadd.f32 %v2180_v6, %v2010_v47  ;;  %v3991_v6 = vld [vmem:[#allocation24 + $0x18] sm:$0xff]  }
 0x6da   :  { %v3776_v50 = vpop.f32.mrf.mxu1 }
 0x6db   :  { %v5239_v38 = vadd.f32 %v3776_v50, %v2035_v61  ;;  %v2259_v14 = vpack.c.bf16 %v5444_v60, %v5443_v26  ;;  %v5442_v48 = vmax.f32 %v5268_v13, 0.0  ;;  %v3993_v50 = vld [vmem:[#allocation24 + $0x28] sm:$0xff]  }
 0x6dc   :  { %v2193_v3 = vpop.f32.mrf.mxu1 }
 0x6dd   :  { %v2234_v33 = vmax.f32 %v5239_v38, 0.0  ;;  %v5255_v59 = vadd.f32 %v2193_v3, %v2025_v10  ;;  %v2258_v15 = vpack.c.bf16 %v5442_v48, %v5441_v23  ;;  %v3994_v3 = vld [vmem:[#allocation24 + $0x30] sm:$0xff]  }
 0x6de   :  { %v3777_v40 = vpop.f32.mrf.mxu1 }
 0x6df   :  { %v5233_v7 = vadd.f32 %v3777_v40, %v2040_v52  ;;  %v2232_v35 = vmax.f32 %v5255_v59, 0.0  ;;  %v3995_v52 = vld [vmem:[#allocation24 + $0x38] sm:$0xff]   ;;  %v3996_v40 = vld [vmem:[#allocation27] sm:$0xff]  }
 0x6e0   :  { %v2196_v45 = vpop.f32.mrf.mxu1  ;;  %3830 = vmatprep.mubr.bf16.mxu1 %v3996_v40 }
 0x6e1   :  { %v2235_v5 = vmax.f32 %v5233_v7, 0.0  ;;  %v5248_v36 = vadd.f32 %v2196_v45, %v2030_v55 }
 0x6e2   :  { %v3780_v34 = vpop.f32.mrf.mxu1 }
 0x6e3   :  { %v5227_v58 = vadd.f32 %v3780_v34, %v2055_v18  ;;  %v2261_v51 = vpack.c.bf16 %v2235_v5, %v2234_v33  ;;  %v2233_v63 = vmax.f32 %v5248_v36, 0.0  ;;  %v2257_v18 = vpack.c.bf16 %v5440_v46, %v5439_v8 }
 0x6e4   :  { %v2209_v11 = vpop.f32.mrf.mxu1  ;;  %v5510_v36 = vmax.f32 %v5257_v29, 0.0 }
 0x6e5   :  { %v5229_v22 = vadd.f32 %v2209_v11, %v2045_v16  ;;  %v2238_v39 = vmax.f32 %v5227_v58, 0.0  ;;  %v2260_v41 = vpack.c.bf16 %v2233_v63, %v2232_v35  ;;  %v3992_v16 = vld [vmem:[#allocation24 + $0x20] sm:$0xff]   ;;  %v2358_v11 = vpop.permute.xlu1 %2357 }
 0x6e6   :  { %v3781_v0 = vpop.f32.mrf.mxu1 }
 0x6e7   :  { %v5231_v53 = vadd.f32 %v3781_v0, %v2060_v43  ;;  %v2236_v27 = vmax.f32 %v5229_v22, 0.0  ;;  %v1985_v43 = vpop.permute.xlu0 %1984 }
 0x6e8   :  { %v2212_v57 = vpop.f32.mrf.mxu1  ;;  %v5298_v20 = vadd.f32 %v5223_v32, %v1985_v43  ;;  %v3989_v32 = vld [vmem:[#allocation24 + $0x8] sm:$0xff]  }
 0x6e9   :  { %v2239_v2 = vmax.f32 %v5231_v53, 0.0  ;;  %v5237_v24 = vadd.f32 %v2212_v57, %v2050_v1  ;;  %v3990_v1 = vld [vmem:[#allocation24 + $0x10] sm:$0xff]  }
 0x6ea   :  { %v5437_v4 = vmax.f32 %v5298_v20, 0.0 }
 0x6eb   :  { %v2263_v44 = vpack.c.bf16 %v2239_v2, %v2238_v39  ;;  %v2237_v21 = vmax.f32 %v5237_v24, 0.0  ;;  %v2353_v0 = vpop.permute.xlu0 %2352 }
 0x6ec   :  { %v2256_v17 = vpack.c.bf16 %v5438_v30, %v5437_v4 }
 0x6ed   :  { %v2262_v56 = vpack.c.bf16 %v2237_v21, %v2236_v27  ;;  %3782 = vmatprep.subr.bf16.mxu0 %v2263_v44 }
 0x6ee   :  { %3783 = vmatpush3.bf16.msra.mxu0 %v2263_v44  ;;  %v2348_v44 = vpop.permute.xlu1 %2347 }
 0x6ef   :  { %3784 = vmatprep.subr.bf16.mxu0 %v2262_v56 }
 0x6f2   :  { %3785 = vmatpush3.bf16.msra.mxu0 %v2262_v56  ;;  %v2343_v56 = vpop.permute.xlu0 %2342  ;;  %v2338_v62 = vpop.permute.xlu1 %2337 }
 0x6f3   :  { %3786 = vmatprep.subr.bf16.mxu0 %v2261_v51 }
 0x6f6   :  { %3787 = vmatpush3.bf16.msra.mxu0 %v2261_v51  ;;  %v2333_v31 = vpop.permute.xlu0 %2332  ;;  %v2328_v42 = vpop.permute.xlu1 %2327 }
 0x6f7   :  { %3788 = vmatprep.subr.bf16.mxu0 %v2260_v41 }
 0x6fa   :  { %3789 = vmatpush3.bf16.msra.mxu0 %v2260_v41  ;;  %v2318_v40 = vpop.permute.xlu1 %2317 }
 0x6fb   :  { %3790 = vmatprep.subr.bf16.mxu0 %v2259_v14 }
 0x6fe   :  { %3791 = vmatpush3.bf16.msra.mxu0 %v2259_v14 }
 0x6ff   :  { %3792 = vmatprep.subr.bf16.mxu0 %v2258_v15 }
 0x702   :  { %3793 = vmatpush3.bf16.msra.mxu0 %v2258_v15 }
 0x703   :  { %3794 = vmatprep.subr.bf16.mxu0 %v2257_v18 }
 0x706   :  { %3795 = vmatpush3.bf16.msra.mxu0 %v2257_v18  ;;  %v2323_v18 = vpop.permute.xlu0 %2322 }
 0x707   :  { %3796 = vmatprep.subr.bf16.mxu0 %v2256_v17 }
 0x70a   :  { %3797 = vmatpush3.bf16.msra.mxu0 %v2256_v17  ;;  %v2313_v23 = vpop.permute.xlu0 %2312 }
 0x70d   :  { %3799 = vmatmul.mubr.bf16.vlgmr.msra.gmra.mxu0 %v3989_v32 }
 0x70e   :  { %3802 = vmatprep.mubr.bf16.mxu0 %v3990_v1 }
 0x715   :  { %3803 = vmatmul.mubr.bf16.gmra.mxu0 %v3991_v6 }
 0x716   :  { %3806 = vmatprep.mubr.bf16.mxu0 %v3992_v16 }
 0x71d   :  { %3807 = vmatmul.mubr.bf16.gmra.mxu0 %v3993_v50 }
 0x71e   :  { %3810 = vmatprep.mubr.bf16.mxu0 %v3994_v3 }
 0x725   :  { %3811 = vmatmul.mubr.bf16.gmra.mxu0 %v3995_v52 }
 0x7cd   :  { %v5310_v61 = vpop.f32.mrf.mxu0 }
 0x7cf   :  { %v5312_v45 = vpop.f32.mrf.mxu0 }
 0x7d1   :  { %v3801_v34 = vpop.f32.mrf.mxu0 }
 0x7d3   :  { %v5314_v55 = vpop.f32.mrf.mxu0 }
 0x7d5   :  { %v3804_v10 = vpop.f32.mrf.mxu0 }
 0x7d7   :  { %v2458_v57 = vpop.f32.mrf.mxu0 }
 0x7d9   :  { %v3805_v12 = vpop.f32.mrf.mxu0 }
 0x7db   :  { %v2461_v25 = vpop.f32.mrf.mxu0 }
 0x7dd   :  { %v3808_v47 = vpop.f32.mrf.mxu0 }
 0x7de   :  { %v2483_v4 = vadd.f32 %v3808_v47, %v2333_v31 }
 0x7df   :  { %v2474_v51 = vpop.f32.mrf.mxu0 }
 0x7e1   :  { %v3809_v41 = vpop.f32.mrf.mxu0 }
 0x7e2   :  { %v2486_v16 = vadd.f32 %v3809_v41, %v2338_v62 }
 0x7e3   :  { %v2477_v9 = vpop.f32.mrf.mxu0 }
 0x7e4   :  { %v2516_v48 = vmax.f32 %v2486_v16, 0.0  ;;  %v2478_v26 = vadd.f32 %v2477_v9, %v2328_v42  ;;  %v3998_v16 = vld [vmem:[#allocation27 + $0x10] sm:$0xff]  }
 0x7e5   :  { %v3812_v14 = vpop.f32.mrf.mxu0 }
 0x7e6   :  { %v2499_v43 = vadd.f32 %v3812_v14, %v2353_v0  ;;  %v2515_v0 = vmax.f32 %v2483_v4, 0.0  ;;  %v2475_v14 = vadd.f32 %v2474_v51, %v2323_v18  ;;  %v2514_v41 = vmax.f32 %v2478_v26, 0.0 }
 0x7e7   :  { %v2490_v15 = vpop.f32.mrf.mxu0 }
 0x7e8   :  { %v2491_v32 = vadd.f32 %v2490_v15, %v2343_v56  ;;  %v2519_v50 = vmax.f32 %v2499_v43, 0.0  ;;  %v2470_v56 = vadd.f32 %v3805_v12, %v2318_v40  ;;  %v2542_v62 = vpack.c.bf16 %v2516_v48, %v2515_v0  ;;  %v2303_v15 = vpop.permute.xlu0 %2302  ;;  %v4004_v40 = vld [vmem:[#allocation28] sm:$0xff]   ;;  %v4005_v0 = vld [vmem:[%s5426_s23] sm:$0xff]  }
 0x7e9   :  { %v3813_v17 = vpop.f32.mrf.mxu0  ;;  %v2513_v47 = vmax.f32 %v2475_v14, 0.0  ;;  %3862 = vmatprep.mubr.bf16.mxu0 %v4004_v40 }
 0x7ea   :  { %v2502_v1 = vadd.f32 %v3813_v17, %v2358_v11  ;;  %v2517_v30 = vmax.f32 %v2491_v32, 0.0  ;;  %v2308_v11 = vpop.permute.xlu1 %2307  ;;  %v2512_v31 = vmax.f32 %v2470_v56, 0.0 }
 0x7eb   :  { %v2493_v6 = vpop.f32.mrf.mxu0  ;;  %v2462_v43 = vadd.f32 %v2461_v25, %v2308_v11  ;;  %v2541_v17 = vpack.c.bf16 %v2514_v41, %v2513_v47 }
 0x7ec   :  { %v2520_v3 = vmax.f32 %v2502_v1, 0.0  ;;  %v2494_v52 = vadd.f32 %v2493_v6, %v2348_v44  ;;  %v2467_v44 = vadd.f32 %v3804_v10, %v2313_v23 }
 0x7ed   :  { %v2510_v9 = vmax.f32 %v2462_v43, 0.0 }
 0x7ee   :  { %v2544_v8 = vpack.c.bf16 %v2520_v3, %v2519_v50  ;;  %v2518_v46 = vmax.f32 %v2494_v52, 0.0  ;;  %v2298_v32 = vpop.permute.xlu1 %2297  ;;  %v4000_v50 = vld [vmem:[#allocation27 + $0x20] sm:$0xff]   ;;  %v4001_v3 = vld [vmem:[#allocation27 + $0x28] sm:$0xff]   ;;  %v4003_v52 = vld [vmem:[#allocation27 + $0x38] sm:$0xff]  }
 0x7ef   :  { %v2454_v4 = vadd.f32 %v3801_v34, %v2298_v32 }
 0x7f0   :  { %v2543_v60 = vpack.c.bf16 %v2518_v46, %v2517_v30  ;;  %3814 = vmatprep.subr.bf16.mxu1 %v2544_v8  ;;  %v2511_v46 = vmax.f32 %v2467_v44, 0.0  ;;  %v2459_v30 = vadd.f32 %v2458_v57, %v2303_v15 }
 0x7f1   :  { %3815 = vmatpush3.bf16.msra.mxu1 %v2544_v8  ;;  %v2293_v8 = vpop.permute.xlu0 %2292  ;;  %v2508_v23 = vmax.f32 %v2454_v4, 0.0 }
 0x7f2   :  { %3816 = vmatprep.subr.bf16.mxu1 %v2543_v60  ;;  %v2540_v51 = vpack.c.bf16 %v2512_v31, %v2511_v46  ;;  %v2451_v26 = vadd.f32 %v5310_v61, %v2293_v8  ;;  %v2509_v48 = vmax.f32 %v2459_v30, 0.0  ;;  %v3997_v61 = vld [vmem:[#allocation27 + $0x8] sm:$0xff]  }
 0x7f4   :  { %v2539_v12 = vpack.c.bf16 %v2510_v9, %v2509_v48  ;;  %v2507_v42 = vmax.f32 %v2451_v26, 0.0 }
 0x7f5   :  { %3817 = vmatpush3.bf16.msra.mxu1 %v2543_v60  ;;  %v2288_v60 = vpop.permute.xlu1 %2287  ;;  %v2283_v25 = vpop.permute.xlu0 %2282 }
 0x7f6   :  { %3818 = vmatprep.subr.bf16.mxu1 %v2542_v62  ;;  %v2446_v10 = vadd.f32 %v5314_v55, %v2288_v60  ;;  %v2443_v57 = vadd.f32 %v5312_v45, %v2283_v25  ;;  %v2538_v18 = vpack.c.bf16 %v2508_v23, %v2507_v42  ;;  %v3999_v55 = vld [vmem:[#allocation27 + $0x18] sm:$0xff]   ;;  %v4002_v45 = vld [vmem:[#allocation27 + $0x30] sm:$0xff]  }
 0x7f8   :  { %v2506_v34 = vmax.f32 %v2446_v10, 0.0  ;;  %v2505_v1 = vmax.f32 %v2443_v57, 0.0 }
 0x7f9   :  { %3819 = vmatpush3.bf16.msra.mxu1 %v2542_v62  ;;  %v2639_v56 = vpop.permute.xlu1 %2638  ;;  %v2634_v41 = vpop.permute.xlu0 %2633 }
 0x7fa   :  { %3820 = vmatprep.subr.bf16.mxu1 %v2541_v17  ;;  %v2537_v6 = vpack.c.bf16 %v2506_v34, %v2505_v1 }
 0x7fd   :  { %3821 = vmatpush3.bf16.msra.mxu1 %v2541_v17  ;;  %v2629_v47 = vpop.permute.xlu1 %2628  ;;  %v2624_v43 = vpop.permute.xlu0 %2623 }
 0x7fe   :  { %3822 = vmatprep.subr.bf16.mxu1 %v2540_v51 }
 0x801   :  { %3823 = vmatpush3.bf16.msra.mxu1 %v2540_v51  ;;  %v2619_v46 = vpop.permute.xlu1 %2618  ;;  %v2614_v8 = vpop.permute.xlu0 %2613 }
 0x802   :  { %3824 = vmatprep.subr.bf16.mxu1 %v2539_v12 }
 0x805   :  { %3825 = vmatpush3.bf16.msra.mxu1 %v2539_v12  ;;  %v2609_v9 = vpop.permute.xlu1 %2608  ;;  %v2604_v48 = vpop.permute.xlu0 %2603 }
 0x806   :  { %3826 = vmatprep.subr.bf16.mxu1 %v2538_v18 }
 0x809   :  { %3827 = vmatpush3.bf16.msra.mxu1 %v2538_v18  ;;  %v2599_v57 = vpop.permute.xlu1 %2598 }
 0x80a   :  { %3828 = vmatprep.subr.bf16.mxu1 %v2537_v6 }
 0x80d   :  { %3829 = vmatpush3.bf16.msra.mxu1 %v2537_v6 }
 0x810   :  { %3831 = vmatmul.mubr.bf16.vlgmr.msra.gmra.mxu1 %v3997_v61  ;;  %v2594_v61 = vpop.permute.xlu0 %2593 }
 0x811   :  { %3834 = vmatprep.mubr.bf16.mxu1 %v3998_v16 }
 0x818   :  { %3835 = vmatmul.mubr.bf16.gmra.mxu1 %v3999_v55 }
 0x819   :  { %3838 = vmatprep.mubr.bf16.mxu1 %v4000_v50 }
 0x820   :  { %3839 = vmatmul.mubr.bf16.gmra.mxu1 %v4001_v3 }
 0x821   :  { %3842 = vmatprep.mubr.bf16.mxu1 %v4002_v45 }
 0x828   :  { %3843 = vmatmul.mubr.bf16.gmra.mxu1 %v4003_v52 }
 0x829   :  { %3902 = vmatprep.mubr.bf16.mxu1 %v4005_v0 }
 0x8d0   :  { %v5322_v14 = vpop.f32.mrf.mxu1 }
 0x8d2   :  { %v5324_v11 = vpop.f32.mrf.mxu1 }
 0x8d4   :  { %v5326_v62 = vpop.f32.mrf.mxu1 }
 0x8d6   :  { %v5328_v15 = vpop.f32.mrf.mxu1 }
 0x8d8   :  { %v3836_v44 = vpop.f32.mrf.mxu1 }
 0x8da   :  { %v2739_v31 = vpop.f32.mrf.mxu1 }
 0x8dc   :  { %v3837_v17 = vpop.f32.mrf.mxu1 }
 0x8de   :  { %v2742_v32 = vpop.f32.mrf.mxu1 }
 0x8e0   :  { %v3840_v30 = vpop.f32.mrf.mxu1 }
 0x8e1   :  { %v2764_v18 = vadd.f32 %v3840_v30, %v2614_v8  ;;  %v2589_v30 = vpop.permute.xlu1 %2588 }
 0x8e2   :  { %v2755_v4 = vpop.f32.mrf.mxu1 }
 0x8e3   :  { %v2796_v40 = vmax.f32 %v2764_v18, 0.0  ;;  %v2756_v0 = vadd.f32 %v2755_v4, %v2604_v48  ;;  %v2748_v4 = vadd.f32 %v3836_v44, %v2594_v61  ;;  %v2743_v48 = vadd.f32 %v2742_v32, %v2589_v30 }
 0x8e4   :  { %v3841_v51 = vpop.f32.mrf.mxu1 }
 0x8e5   :  { %v2767_v10 = vadd.f32 %v3841_v51, %v2619_v46  ;;  %v2812_v22 = vadd.f32 %v2796_v40, %v2234_v33  ;;  %v2579_v24 = vpop.permute.xlu1 %2578 }
 0x8e6   :  { %v2758_v26 = vpop.f32.mrf.mxu1 }
 0x8e7   :  { %v2797_v16 = vmax.f32 %v2767_v10, 0.0  ;;  %v2759_v50 = vadd.f32 %v2758_v26, %v2609_v9  ;;  %v2828_v38 = vmax.f32 %v2812_v22, 0.0  ;;  %v2791_v10 = vmax.f32 %v2743_v48, 0.0  ;;  %v4010_v22 = vld [vmem:[#allocation28 + $0x18] sm:$0xff]  }
 0x8e8   :  { %v3844_v60 = vpop.f32.mrf.mxu1 }
 0x8e9   :  { %v2780_v23 = vadd.f32 %v3844_v60, %v2634_v41  ;;  %v2813_v8 = vadd.f32 %v2797_v16, %v2235_v5  ;;  %v2795_v51 = vmax.f32 %v2759_v50, 0.0  ;;  %v2569_v18 = vpop.permute.xlu1 %2568  ;;  %v5513_v50 = vmax.f32 %v5275_v37, 0.0 }
 0x8ea   :  { %v2771_v12 = vpop.f32.mrf.mxu1  ;;  %v5516_v37 = vmax.f32 %v5290_v28, 0.0  ;;  %v4006_v28 = vld [vmem:[#allocation28 + $0x8] sm:$0xff]  }
 0x8eb   :  { %v2800_v25 = vmax.f32 %v2780_v23, 0.0  ;;  %v2772_v42 = vadd.f32 %v2771_v12, %v2624_v43  ;;  %v2829_v60 = vmax.f32 %v2813_v8, 0.0  ;;  %v2811_v7 = vadd.f32 %v2795_v51, %v2233_v63 }
 0x8ec   :  { %v3845_v34 = vpop.f32.mrf.mxu1  ;;  %v2735_v23 = vadd.f32 %v5326_v62, %v2579_v24  ;;  %v2727_v62 = vadd.f32 %v5328_v15, %v2569_v18  ;;  %v5517_v8 = vmax.f32 %v5298_v20, 0.0  ;;  %v4007_v20 = vld [vmem:[%s5426_s23 + $0x8] sm:$0xff]  }
 0x8ed   :  { %v2798_v1 = vmax.f32 %v2772_v42, 0.0  ;;  %v2783_v6 = vadd.f32 %v3845_v34, %v2639_v56  ;;  %v2816_v3 = vadd.f32 %v2800_v25, %v2238_v39  ;;  %v2751_v56 = vadd.f32 %v3837_v17, %v2599_v57 }
 0x8ee   :  { %v2774_v55 = vpop.f32.mrf.mxu1  ;;  %v2847_v12 = vpack.c.bf16 %v2829_v60, %v2828_v38  ;;  %v2827_v25 = vmax.f32 %v2811_v7, 0.0  ;;  %v2789_v34 = vmax.f32 %v2735_v23, 0.0 }
 0x8ef   :  { %v2801_v45 = vmax.f32 %v2783_v6, 0.0  ;;  %v2775_v52 = vadd.f32 %v2774_v55, %v2629_v47  ;;  %v2814_v41 = vadd.f32 %v2798_v1, %v2236_v27  ;;  %v2832_v9 = vmax.f32 %v2816_v3, 0.0  ;;  %v2584_v47 = vpop.permute.xlu0 %2583 }
 0x8f0   :  { %v2794_v27 = vmax.f32 %v2756_v0, 0.0  ;;  %v2793_v17 = vmax.f32 %v2751_v56, 0.0  ;;  %v2740_v44 = vadd.f32 %v2739_v31, %v2584_v47  ;;  %v5511_v31 = vmax.f32 %v5264_v49, 0.0  ;;  %v4008_v47 = vld [vmem:[#allocation28 + $0x10] sm:$0xff]  }
 0x8f1   :  { %v2817_v43 = vadd.f32 %v2801_v45, %v2239_v2  ;;  %v2799_v46 = vmax.f32 %v2775_v52, 0.0  ;;  %v2830_v53 = vmax.f32 %v2814_v41, 0.0  ;;  %v5512_v1 = vmax.f32 %v5268_v13, 0.0 }
 0x8f2   :  { %v2810_v33 = vadd.f32 %v2794_v27, %v2232_v35  ;;  %v2809_v63 = vadd.f32 %v2793_v17, %v5510_v36  ;;  %v2790_v59 = vmax.f32 %v2740_v44, 0.0  ;;  %v5514_v45 = vmax.f32 %v5277_v54, 0.0  ;;  %v4011_v27 = vld [vmem:[%s5426_s23 + $0x18] sm:$0xff]  }
 0x8f3   :  { %v2833_v58 = vmax.f32 %v2817_v43, 0.0  ;;  %v2815_v39 = vadd.f32 %v2799_v46, %v2237_v21  ;;  %v2792_v21 = vmax.f32 %v2748_v4, 0.0  ;;  %v2574_v32 = vpop.permute.xlu0 %2573  ;;  %v2807_v6 = vadd.f32 %v2791_v10, %v5512_v1  ;;  %v4009_v4 = vld [vmem:[%s5426_s23 + $0x10] sm:$0xff]  }
 0x8f4   :  { %v2732_v42 = vadd.f32 %v5322_v14, %v2574_v32  ;;  %v2826_v35 = vmax.f32 %v2810_v33, 0.0  ;;  %v2825_v29 = vmax.f32 %v2809_v63, 0.0  ;;  %v2806_v3 = vadd.f32 %v2790_v59, %v5513_v50 }
 0x8f5   :  { %v2849_v2 = vpack.c.bf16 %v2833_v58, %v2832_v9  ;;  %v2831_v26 = vmax.f32 %v2815_v39, 0.0  ;;  %v2808_v57 = vadd.f32 %v2792_v21, %v5511_v31  ;;  %v2805_v15 = vadd.f32 %v2789_v34, %v5514_v45  ;;  %v4014_v45 = vld [vmem:[#allocation31 + $0x10] sm:$0xff]  }
 0x8f6   :  { %v2846_v61 = vpack.c.bf16 %v2827_v25, %v2826_v35  ;;  %v2788_v14 = vmax.f32 %v2732_v42, 0.0  ;;  %v2787_v52 = vmax.f32 %v2727_v62, 0.0  ;;  %v2823_v13 = vmax.f32 %v2807_v6, 0.0 }
 0x8f7   :  { %v2848_v5 = vpack.c.bf16 %v2831_v26, %v2830_v53  ;;  %3846 = vmatprep.subr.bf16.mxu0 %v2849_v2  ;;  %3886 = vmatprep.subr.bf16.mxu1 %v2849_v2  ;;  %v2564_v16 = vpop.permute.xlu0 %2563  ;;  %v2824_v55 = vmax.f32 %v2808_v57, 0.0  ;;  %v5515_v0 = vmax.f32 %v5285_v19, 0.0  ;;  %v2822_v46 = vmax.f32 %v2806_v3, 0.0  ;;  %v4012_v53 = vld [vmem:[#allocation31] sm:$0xff]   ;;  %v4013_v3 = vld [vmem:[#allocation31 + $0x8] sm:$0xff]  }
 0x8f8   :  { %3847 = vmatpush3.bf16.msra.mxu0 %v2849_v2  ;;  %3887 = vmatpush3.bf16.msra.mxu1 %v2849_v2  ;;  %v2724_v49 = vadd.f32 %v5324_v11, %v2564_v16  ;;  %v2821_v11 = vmax.f32 %v2805_v15, 0.0  ;;  %v2803_v30 = vadd.f32 %v2787_v52, %v5516_v37  ;;  %v2896_v2 = vpop.permute.xlu1 %2895  ;;  %v4015_v15 = vld [vmem:[#allocation31 + $0x18] sm:$0xff]  }
 0x8f9   :  { %3848 = vmatprep.subr.bf16.mxu0 %v2848_v5  ;;  %3888 = vmatprep.subr.bf16.mxu1 %v2848_v5  ;;  %v2845_v40 = vpack.c.bf16 %v2825_v29, %v2824_v55  ;;  %v2804_v41 = vadd.f32 %v2788_v14, %v5515_v0  ;;  %v2844_v56 = vpack.c.bf16 %v2823_v13, %v2822_v46 }
 0x8fa   :  { %v2786_v43 = vmax.f32 %v2724_v49, 0.0  ;;  %v2819_v19 = vmax.f32 %v2803_v30, 0.0 }
 0x8fb   :  { %v2820_v54 = vmax.f32 %v2804_v41, 0.0  ;;  %v2891_v48 = vpop.permute.xlu0 %2890 }
 0x8fc   :  { %3849 = vmatpush3.bf16.msra.mxu0 %v2848_v5  ;;  %3889 = vmatpush3.bf16.msra.mxu1 %v2848_v5  ;;  %v2802_v51 = vadd.f32 %v2786_v43, %v5517_v8  ;;  %v2886_v7 = vpop.permute.xlu1 %2885 }
 0x8fd   :  { %3850 = vmatprep.subr.bf16.mxu0 %v2847_v12  ;;  %3890 = vmatprep.subr.bf16.mxu1 %v2847_v12  ;;  %v2843_v9 = vpack.c.bf16 %v2821_v11, %v2820_v54 }
 0x8fe   :  { %v2818_v58 = vmax.f32 %v2802_v51, 0.0 }
 0x8ff   :  { %v2881_v24 = vpop.permute.xlu0 %2880 }
 0x900   :  { %3851 = vmatpush3.bf16.msra.mxu0 %v2847_v12  ;;  %3891 = vmatpush3.bf16.msra.mxu1 %v2847_v12  ;;  %v2842_v39 = vpack.c.bf16 %v2819_v19, %v2818_v58  ;;  %v2876_v33 = vpop.permute.xlu1 %2875 }
 0x901   :  { %3852 = vmatprep.subr.bf16.mxu0 %v2846_v61  ;;  %3892 = vmatprep.subr.bf16.mxu1 %v2846_v61 }
 0x903   :  { %v2871_v63 = vpop.permute.xlu0 %2870 }
 0x904   :  { %3853 = vmatpush3.bf16.msra.mxu0 %v2846_v61  ;;  %3893 = vmatpush3.bf16.msra.mxu1 %v2846_v61  ;;  %v2866_v34 = vpop.permute.xlu1 %2865 }
 0x905   :  { %3854 = vmatprep.subr.bf16.mxu0 %v2845_v40  ;;  %3894 = vmatprep.subr.bf16.mxu1 %v2845_v40 }
 0x907   :  { %v2861_v6 = vpop.permute.xlu0 %2860 }
 0x908   :  { %3855 = vmatpush3.bf16.msra.mxu0 %v2845_v40  ;;  %3895 = vmatpush3.bf16.msra.mxu1 %v2845_v40  ;;  %v3023_v40 = vpop.permute.xlu1 %3022 }
 0x909   :  { %3856 = vmatprep.subr.bf16.mxu0 %v2844_v56  ;;  %3896 = vmatprep.subr.bf16.mxu1 %v2844_v56 }
 0x90b   :  { %v3018_v52 = vpop.permute.xlu0 %3017 }
 0x90c   :  { %3857 = vmatpush3.bf16.msra.mxu0 %v2844_v56  ;;  %3897 = vmatpush3.bf16.msra.mxu1 %v2844_v56  ;;  %v3033_v0 = vpop.permute.xlu1 %3032 }
 0x90d   :  { %3858 = vmatprep.subr.bf16.mxu0 %v2843_v9  ;;  %3898 = vmatprep.subr.bf16.mxu1 %v2843_v9 }
 0x90f   :  { %v3028_v13 = vpop.permute.xlu0 %3027 }
 0x910   :  { %3859 = vmatpush3.bf16.msra.mxu0 %v2843_v9  ;;  %3899 = vmatpush3.bf16.msra.mxu1 %v2843_v9  ;;  %v3043_v43 = vpop.permute.xlu1 %3042 }
 0x911   :  { %3860 = vmatprep.subr.bf16.mxu0 %v2842_v39  ;;  %3900 = vmatprep.subr.bf16.mxu1 %v2842_v39 }
 0x913   :  { %v3038_v41 = vpop.permute.xlu0 %3037 }
 0x914   :  { %3861 = vmatpush3.bf16.msra.mxu0 %v2842_v39  ;;  %3901 = vmatpush3.bf16.msra.mxu1 %v2842_v39  ;;  %v3053_v37 = vpop.permute.xlu1 %3052 }
 0x917   :  { %3863 = vmatmul.mubr.bf16.vlgmr.msra.gmra.mxu0 %v4006_v28  ;;  %3903 = vmatmul.mubr.bf16.vlgmr.msra.gmra.mxu1 %v4007_v20  ;;  %v3048_v46 = vpop.permute.xlu0 %3047 }
 0x918   :  { %3866 = vmatprep.mubr.bf16.mxu0 %v4008_v47  ;;  %3906 = vmatprep.mubr.bf16.mxu1 %v4009_v4  ;;  %v3184_v8 = vpop.permute.xlu1 %3183 }
 0x91b   :  { %v3179_v56 = vpop.permute.xlu0 %3178 }
 0x91c   :  { %v3194_v58 = vpop.permute.xlu1 %3193 }
 0x91f   :  { %3867 = vmatmul.mubr.bf16.gmra.mxu0 %v4010_v22  ;;  %3907 = vmatmul.mubr.bf16.gmra.mxu1 %v4011_v27  ;;  %v3189_v51 = vpop.permute.xlu0 %3188 }
 0x920   :  { %3878 = vmatprep.mubr.msk.bf16.mxu0 %vm529_vm0, %v4012_v53 }
 0x923   :  { %v3199_v47 = vpop.permute.xlu0 %3198 }
 0x9d7   :  { %v3864_v26 = vpop.f32.mrf.mxu0  ;;  %v3904_v11 = vpop.f32.mrf.mxu1 }
 0x9d8   :  { %v2965_v57 = vadd.f32 %v3864_v26, %v2871_v63  ;;  %v3283_v4 = vadd.f32 %v3904_v11, %v3189_v51 }
 0x9d9   :  { %v2956_v17 = vpop.f32.mrf.mxu0  ;;  %v3274_v30 = vpop.f32.mrf.mxu1 }
 0x9da   :  { %v2989_v61 = vmax.f32 %v2965_v57, 0.0  ;;  %v2957_v16 = vadd.f32 %v2956_v17, %v2861_v6 }
 0x9db   :  { %v3865_v60 = vpop.f32.mrf.mxu0  ;;  %v3905_v54 = vpop.f32.mrf.mxu1 }
 0x9dc   :  { %v2968_v12 = vadd.f32 %v3865_v60, %v2876_v33  ;;  %v2987_v55 = vmax.f32 %v2957_v16, 0.0 }
 0x9dd   :  { %v2959_v5 = vpop.f32.mrf.mxu0  ;;  %v3277_v9 = vpop.f32.mrf.mxu1 }
 0x9de   :  { %v2990_v62 = vmax.f32 %v2968_v12, 0.0  ;;  %v2960_v29 = vadd.f32 %v2959_v5, %v2866_v34  ;;  %v3204_v5 = vpop.permute.xlu1 %3203 }
 0x9df   :  { %v3868_v21 = vpop.f32.mrf.mxu0  ;;  %v3908_v28 = vpop.f32.mrf.mxu1 }
 0x9e0   :  { %v2981_v38 = vadd.f32 %v3868_v21, %v2891_v48  ;;  %v3004_v14 = vpack.c.bf16 %v2990_v62, %v2989_v61  ;;  %v2988_v49 = vmax.f32 %v2960_v29, 0.0 }
 0x9e1   :  { %v2972_v44 = vpop.f32.mrf.mxu0  ;;  %v3290_v60 = vpop.f32.mrf.mxu1 }
 0x9e2   :  { %v2973_v23 = vadd.f32 %v2972_v44, %v2881_v24  ;;  %v2993_v25 = vmax.f32 %v2981_v38, 0.0  ;;  %v3003_v50 = vpack.c.bf16 %v2988_v49, %v2987_v55  ;;  %v3286_v24 = vadd.f32 %v3905_v54, %v3194_v58 }
 0x9e3   :  { %v3869_v32 = vpop.f32.mrf.mxu0  ;;  %v3909_v12 = vpop.f32.mrf.mxu1  ;;  %v3291_v34 = vadd.f32 %v3290_v60, %v3199_v47 }
 0x9e4   :  { %v2984_v36 = vadd.f32 %v3869_v32, %v2896_v2  ;;  %v2991_v59 = vmax.f32 %v2973_v23, 0.0  ;;  %v3275_v2 = vadd.f32 %v3274_v30, %v3179_v56  ;;  %v3209_v32 = vpop.permute.xlu0 %3208  ;;  %v3278_v23 = vadd.f32 %v3277_v9, %v3184_v8 }
 0x9e5   :  { %v2975_v10 = vpop.f32.mrf.mxu0  ;;  %v3293_v6 = vpop.f32.mrf.mxu1 }
 0x9e6   :  { %v2994_v42 = vmax.f32 %v2984_v36, 0.0  ;;  %v2976_v31 = vadd.f32 %v2975_v10, %v2886_v7 }
 0x9e8   :  { %v3006_v35 = vpack.c.bf16 %v2994_v42, %v2993_v25  ;;  %v2992_v18 = vmax.f32 %v2976_v31, 0.0  ;;  %v3299_v42 = vadd.f32 %v3908_v28, %v3209_v32 }
 0x9ea   :  { %v3005_v1 = vpack.c.bf16 %v2992_v18, %v2991_v59  ;;  %3870 = vmatprep.subr.bf16.mxu0 %v3006_v35  ;;  %v3214_v18 = vpop.permute.xlu1 %3213 }
 0x9eb   :  { %3871 = vmatpush3.bf16.msra.mxu0 %v3006_v35  ;;  %v3302_v16 = vadd.f32 %v3909_v12, %v3214_v18 }
 0x9ec   :  { %3872 = vmatprep.subr.bf16.mxu0 %v3005_v1 }
 0x9ef   :  { %3873 = vmatpush3.bf16.msra.mxu0 %v3005_v1 }
 0x9f0   :  { %3874 = vmatprep.subr.bf16.mxu0 %v3004_v14 }
 0x9f3   :  { %3875 = vmatpush3.bf16.msra.mxu0 %v3004_v14 }
 0x9f4   :  { %3876 = vmatprep.subr.bf16.mxu0 %v3003_v50 }
 0x9f7   :  { %3877 = vmatpush3.bf16.msra.mxu0 %v3003_v50  ;;  %v3294_v50 = vadd.f32 %v3293_v6, %v3204_v5 }
 0x9fa   :  { %3879 = vmatmul.mubr.msk.bf16.vlgmr.msra.gmra.mxu0 %vm529_vm0, %v4013_v3 }
 0x9fb   :  { %3882 = vmatprep.mubr.msk.bf16.mxu0 %vm529_vm0, %v4014_v45 }
 0xa02   :  { %3883 = vmatmul.mubr.msk.bf16.gmra.mxu0 %vm529_vm0, %v4015_v15 }
 0xaba   :  { %v3880_v19 = vpop.f32.mrf.mxu0 }
 0xabb   :  { %v3130_v39 = vadd.f32 %v3880_v19, %v3028_v13 }
 0xabc   :  { %v3121_v20 = vpop.f32.mrf.mxu0 }
 0xabd   :  { %v3154_v22 = vmax.f32 %v3130_v39, 0.0  ;;  %v3122_v27 = vadd.f32 %v3121_v20, %v3018_v52 }
 0xabe   :  { %v3881_v53 = vpop.f32.mrf.mxu0 }
 0xabf   :  { %v3307_v26 = vadd.f32 %v3283_v4, %v3154_v22  ;;  %v3152_v48 = vmax.f32 %v3122_v27, 0.0  ;;  %v3133_v17 = vadd.f32 %v3881_v53, %v3033_v0 }
 0xac0   :  { %v3124_v7 = vpop.f32.mrf.mxu0 }
 0xac1   :  { %3315 = vst [vmem:[%s5428_s25 + $0x10] sm:$0xff] %v3307_v26  ;;  %v3305_v21 = vadd.f32 %v3275_v2, %v3152_v48  ;;  %v3155_v44 = vmax.f32 %v3133_v17, 0.0  ;;  %v3125_v38 = vadd.f32 %v3124_v7, %v3023_v40 }
 0xac2   :  { %v3884_v33 = vpop.f32.mrf.mxu0 }
 0xac3   :  { %3313 = vst [vmem:[%s5428_s25] sm:$0xff] %v3305_v21  ;;  %v3308_v36 = vadd.f32 %v3286_v24, %v3155_v44  ;;  %v3153_v63 = vmax.f32 %v3125_v38, 0.0  ;;  %v3146_v10 = vadd.f32 %v3884_v33, %v3048_v46 }
 0xac4   :  { %v3137_v25 = vpop.f32.mrf.mxu0 }
 0xac5   :  { %3316 = vst [vmem:[%s5428_s25 + $0x18] sm:$0xff] %v3308_v36  ;;  %v3306_v31 = vadd.f32 %v3278_v23, %v3153_v63  ;;  %v3158_v57 = vmax.f32 %v3146_v10, 0.0  ;;  %v3138_v59 = vadd.f32 %v3137_v25, %v3038_v41 }
 0xac6   :  { %v3885_v35 = vpop.f32.mrf.mxu0 }
 0xac7   :  { %3314 = vst [vmem:[%s5428_s25 + $0x8] sm:$0xff] %v3306_v31  ;;  %v3311_v62 = vadd.f32 %v3299_v42, %v3158_v57  ;;  %v3156_v29 = vmax.f32 %v3138_v59, 0.0  ;;  %v3149_v1 = vadd.f32 %v3885_v35, %v3053_v37 }
 0xac8   :  { %v3140_v61 = vpop.f32.mrf.mxu0 }
 0xac9   :  { %3319 = vst [vmem:[%s5428_s25 + $0x30] sm:$0xff] %v3311_v62  ;;  %v3309_v14 = vadd.f32 %v3291_v34, %v3156_v29  ;;  %v3159_v49 = vmax.f32 %v3149_v1, 0.0  ;;  %v3141_v55 = vadd.f32 %v3140_v61, %v3043_v43 }
 0xacb   :  { %3317 = vst [vmem:[%s5428_s25 + $0x20] sm:$0xff] %v3309_v14  ;;  %v3312_v3 = vadd.f32 %v3302_v16, %v3159_v49  ;;  %v3157_v45 = vmax.f32 %v3141_v55, 0.0 }
 0xacd   :  { %3320 = vst [vmem:[%s5428_s25 + $0x38] sm:$0xff] %v3312_v3  ;;  %v3310_v15 = vadd.f32 %v3294_v50, %v3157_v45 }
 0xacf   :  { %3318 = vst [vmem:[%s5428_s25 + $0x28] sm:$0xff] %v3310_v15 }
 0xad0   :  { %3325 = vsyncpa [#allocation3], 1 }
 0xad1   :  { %3326 = vsyncpa [#allocation5], 1 }
 0xad2   :  { %3327 = vsyncpa [#allocation8], 1 }
 0xad3   :  { %3328 = vsyncpa [#allocation11], 1 }
 0xad4   :  { %3329 = vsyncpa [#allocation14], 1 }
 0xad5   :  { %3330 = vsyncpa [#allocation17], 1 }
 0xad6   :  { %3331 = vsyncpa [#allocation20], 1 }
 0xad7   :  { %3332 = vsyncpa [#allocation23], 1 }
 0xad8   :  { %3333 = vsyncpa [#allocation26], 1 }
 0xad9   :  { %3334 = vsyncpa [#allocation29], 1 }
 0xada   :  { %3335 = vsyncpa [#allocation32], 1 }

</bundles_post_ra>
